<compile_context>
chip_gen: v7x
topology: tpu7x:2x2x1
jax: 0.10.0
libtpu: 0.0.40
codegen_flags: <defaults>
</compile_context>

<pallas_src>
import functools

import numpy as np

import jax
import jax.numpy as jnp
from jax.experimental import pallas as pl
from jax.experimental.pallas import tpu as pltpu


CLASSES = ['Background', 'Instrument']


# -----------------------------------------------------------------------------
# Host-side weight preparation (banded conv matrices, pool/upsample selectors)
# -----------------------------------------------------------------------------
def _banded_conv_weights(w, W):
    """w: (3,3,Ci,Co) -> (3, W*Ci, W*Co) block-banded (horizontal taps folded)."""
    w = np.asarray(w, np.float32)
    _, _, Ci, Co = w.shape
    out = np.zeros((3, W * Ci, W * Co), np.float32)
    for dh in range(3):
        for x in range(W):
            for dw in range(3):
                xi = x + dw - 1
                if 0 <= xi < W:
                    out[dh, xi * Ci:(xi + 1) * Ci, x * Co:(x + 1) * Co] = w[dh, dw]
    return out


def _fold_taps(b):
    """(3, K, N) -> (3K, N), dh-major rows (matches [dh0|dh1|dh2] im2col lanes)."""
    return b.reshape(-1, b.shape[-1])


def _pool_row_select(NB, H):
    """(2, NB*H//2, NB*H): even / odd row selection per row-block of height H."""
    re = np.zeros((NB * H // 2, NB * H), np.float32)
    ro = np.zeros((NB * H // 2, NB * H), np.float32)
    for b in range(NB):
        for j in range(H // 2):
            re[b * (H // 2) + j, b * H + 2 * j] = 1.0
            ro[b * (H // 2) + j, b * H + 2 * j + 1] = 1.0
    return np.stack([re, ro])


def _pool_col_select(W, C):
    """(2, W*C, (W//2)*C): even / odd column (channel-block) selection."""
    se = np.zeros((W * C, (W // 2) * C), np.float32)
    so = np.zeros((W * C, (W // 2) * C), np.float32)
    for j in range(W // 2):
        for c in range(C):
            se[(2 * j) * C + c, j * C + c] = 1.0
            so[(2 * j + 1) * C + c, j * C + c] = 1.0
    return np.stack([se, so])


def _up_row_dup(B, H):
    """(B*2H, B*H): nearest-neighbour row duplication (per batch block)."""
    p = np.zeros((B * 2 * H, B * H), np.float32)
    for b in range(B):
        for y in range(2 * H):
            p[b * 2 * H + y, b * H + y // 2] = 1.0
    return p


def _up_col_dup(W, C):
    """(W*C, 2W*C): nearest-neighbour column (channel-block) duplication."""
    u = np.zeros((W * C, 2 * W * C), np.float32)
    for x in range(2 * W):
        for c in range(C):
            u[(x // 2) * C + c, x * C + c] = 1.0
    return u


def prepare_kernel_params(params, feature_size, batch_size, time_steps):
    """Expand torch-style NHWC conv params into kernel-ready fused banded matrices."""
    C = int(params['enc1_w'].shape[3])
    S = int(feature_size)
    B = int(batch_size)
    T = int(time_steps)
    W = S * 4
    W1 = S * 2

    def b16(a):
        return jnp.asarray(a, dtype=jnp.bfloat16)

    def f32(a):
        return jnp.asarray(a, dtype=jnp.float32)

    def band(w, width):
        return _fold_taps(_banded_conv_weights(w, width))

    def band_pair(w, width):
        # input channels [0:C] -> first operand half, [C:2C] -> second half
        w = np.asarray(w, np.float32)
        return np.concatenate([band(w[:, :, :C, :], width),
                               band(w[:, :, C:, :], width)], axis=0)

    def band_lstm(w_half):
        # gate-major output columns: [i | f | o | g], each a contiguous S*C slice
        parts = [_banded_conv_weights(w_half[:, :, :, k * C:(k + 1) * C], S)
                 for k in range(4)]
        return _fold_taps(np.concatenate(parts, axis=2))

    def tile_bias(b, width):
        return f32(np.tile(np.asarray(b, np.float32), width)[None])

    lw = np.asarray(params['lstm_w'], np.float32)
    lb = np.asarray(params['lstm_b'], np.float32)

    kp = {
        'we1': b16(band(params['enc1_w'], W)),   'be1': tile_bias(params['enc1_b'], W),
        'we2': b16(band(params['enc2_w'], W1)),  'be2': tile_bias(params['enc2_b'], W1),
        'we3': b16(band(params['enc3_w'], S)),   'be3': tile_bias(params['enc3_b'], S),
        'wlx': b16(band_lstm(lw[:, :, :C, :])),
        'wlh': b16(band_lstm(lw[:, :, C:, :])),
        'bl': f32(np.concatenate([np.tile(lb[k * C:(k + 1) * C], S)
                                  for k in range(4)])[None]),
        'wd2': b16(band_pair(params['dec2_w'], W1)),
        'bd2': tile_bias(params['dec2_b'], W1),
        'wd1': b16(band_pair(params['dec1_w'], W)),
        'bd1': tile_bias(params['dec1_b'], W),
        'whd': b16(band(params['head_w'], W)),   'bhd': tile_bias(params['head_b'], W),
        # pooling selectors cover all T*B row-blocks (encoder is T-batched)
        'pr0': b16(_pool_row_select(T * B, W)),  'ps0': b16(_pool_col_select(W, C)),
        'pr1': b16(_pool_row_select(T * B, W1)), 'ps1': b16(_pool_col_select(W1, C)),
        # upsampling only happens at the last step -> B row-blocks
        'up1r': b16(_up_row_dup(B, S)),  'up1c': b16(_up_col_dup(S, C)),
        'up0r': b16(_up_row_dup(B, W1)), 'up0c': b16(_up_col_dup(W1, C)),
    }
    return kp


_WKEYS = ('we1', 'be1', 'we2', 'be2', 'we3', 'be3',
          'wlx', 'wlh', 'bl',
          'wd2', 'bd2', 'wd1', 'bd1',
          'whd', 'bhd',
          'pr0', 'ps0', 'pr1', 'ps1',
          'up1r', 'up1c', 'up0r', 'up0c')


# -----------------------------------------------------------------------------
# Fused whole-sequence Pallas kernel (single invocation, everything in VMEM)
# -----------------------------------------------------------------------------
def _tc_forward_kernel(
    # inputs
    x_ref, h0_ref, c0_ref,
    we1_ref, be1_ref, we2_ref, be2_ref, we3_ref, be3_ref,
    wlx_ref, wlh_ref, bl_ref,
    wd2_ref, bd2_ref, wd1_ref, bd1_ref,
    whd_ref, bhd_ref,
    pr0_ref, ps0_ref, pr1_ref, ps1_ref,
    up1r_ref, up1c_ref, up0r_ref, up0c_ref,
    # outputs
    pred_ref, hout_ref, cout_ref,
    # scratch (padded row slabs)
    p1p, p2p, f3p, hp, f1p, f2p, uhp, ud2p, d1p,
    *, B, T, H, W, C, Cin, S, CLS,
):
    H1, W1 = H // 2, W // 2
    LX, L0, L1, L2 = W * Cin, W * C, W1 * C, S * C
    TB = T * B
    bf16 = jnp.bfloat16

    for ref in (p1p, p2p, f3p, hp, f1p, f2p, uhp, ud2p, d1p):
        ref[...] = jnp.zeros_like(ref)

    def im2col(ref, hh, lanes):
        # padded slab (NB, hh+2, lanes) -> (NB*hh, 3*lanes), vertical taps in K
        cols = jnp.concatenate([ref[:, dh:dh + hh, :] for dh in range(3)],
                               axis=-1)
        return cols.reshape(-1, 3 * lanes)

    def mm(a, w_ref):
        return jnp.dot(a, w_ref[...], preferred_element_type=jnp.float32)

    def pool(v, r_ref, s_ref):
        rows = jnp.maximum(
            jnp.dot(r_ref[0], v, preferred_element_type=jnp.float32),
            jnp.dot(r_ref[1], v, preferred_element_type=jnp.float32)).astype(bf16)
        return jnp.maximum(
            jnp.dot(rows, s_ref[0], preferred_element_type=jnp.float32),
            jnp.dot(rows, s_ref[1], preferred_element_type=jnp.float32))

    def upsample(v, r_ref, c_ref):
        rows = jnp.dot(r_ref[...], v,
                       preferred_element_type=jnp.float32).astype(bf16)
        return jnp.dot(rows, c_ref[...], preferred_element_type=jnp.float32)

    def store_rows(dst, v, nb, hh):
        dst[:, 1:hh + 1, :] = v.reshape(nb, hh, v.shape[-1]).astype(dst.dtype)

    # ---- encoder, batched over ALL timesteps (M = T*B*rows) -----------------
    f1 = jnp.maximum(mm(im2col(x_ref, H, LX), we1_ref) + be1_ref[...], 0.0)
    store_rows(f1p, f1[(T - 1) * B * H:, :], B, H)      # last-step skip only
    p1 = pool(f1.astype(bf16), pr0_ref, ps0_ref)
    store_rows(p1p, p1, TB, H1)

    f2 = jnp.maximum(mm(im2col(p1p, H1, L1), we2_ref) + be2_ref[...], 0.0)
    store_rows(f2p, f2[(T - 1) * B * H1:, :], B, H1)    # last-step skip only
    p2 = pool(f2.astype(bf16), pr1_ref, ps1_ref)
    store_rows(p2p, p2, TB, S)

    f3 = jnp.maximum(mm(im2col(p2p, S, L2), we3_ref) + be3_ref[...], 0.0)
    store_rows(f3p, f3, TB, S)

    # input->gate pre-activations for all timesteps in ONE matmul (gate-major)
    zx = mm(im2col(f3p, S, L2), wlx_ref) + bl_ref[...]          # (T*B*S, 4*L2)

    # ---- sequential ConvLSTM core: only the h-branch conv + gates per step ---
    store_rows(hp, h0_ref[...], B, S)
    c = c0_ref[...]
    h = h0_ref[...]
    for t in range(T):
        zh = mm(im2col(hp, S, L2), wlh_ref)                     # (B*S, 4*L2)
        z = zx[t * B * S:(t + 1) * B * S, :] + zh
        gi = jax.nn.sigmoid(z[:, 0 * L2:1 * L2])
        gf = jax.nn.sigmoid(z[:, 1 * L2:2 * L2])
        go = jax.nn.sigmoid(z[:, 2 * L2:3 * L2])
        gg = jnp.tanh(z[:, 3 * L2:4 * L2])
        c = gf * c + gi * gg
        h = go * jnp.tanh(c)
        store_rows(hp, h, B, S)

    # ---- decoder + segmentation head: LAST timestep only --------------------
    store_rows(uhp, upsample(h.astype(bf16), up1r_ref, up1c_ref), B, H1)
    d2 = jnp.maximum(
        mm(jnp.concatenate([im2col(uhp, H1, L1), im2col(f2p, H1, L1)], axis=-1),
           wd2_ref) + bd2_ref[...], 0.0)

    store_rows(ud2p, upsample(d2.astype(bf16), up0r_ref, up0c_ref), B, H)
    d1 = jnp.maximum(
        mm(jnp.concatenate([im2col(ud2p, H, L0), im2col(f1p, H, L0)], axis=-1),
           wd1_ref) + bd1_ref[...], 0.0)
    store_rows(d1p, d1, B, H)

    pred = mm(im2col(d1p, H, L0), whd_ref) + bhd_ref[...]

    pred_ref[...] = pred
    hout_ref[...] = h      # exported f32 (no bf16 drift across forward() calls)
    cout_ref[...] = c


def tc_forward_sequence(x, h0, c0, kp):
    """x: (B, T, Cin, H, W) f32; h0/c0: (B*S, S*C) f32.
    Returns (prediction NCHW f32, h_next, c_next)."""
    B, T, Cin, H, W = x.shape
    S = h0.shape[0] // B
    C = h0.shape[1] // S
    H1, W1 = H // 2, W // 2
    CLS = kp['bhd'].shape[1] // W

    # one-time layout prep for the whole sequence: (T*B, H+2, W*Cin), rows padded
    xs = jnp.transpose(x, (1, 0, 3, 4, 2))                       # (T,B,H,W,Cin)
    xs = jnp.pad(xs, ((0, 0), (0, 0), (1, 1), (0, 0), (0, 0)))   # pad H only
    xs = xs.reshape(T * B, H + 2, W * Cin).astype(jnp.bfloat16)

    kernel = functools.partial(_tc_forward_kernel, B=B, T=T, H=H, W=W,
                               C=C, Cin=Cin, S=S, CLS=CLS)

    scratch_shapes = [
        pltpu.VMEM((T * B, H1 + 2, W1 * C), jnp.bfloat16),   # p1p  pool(f1), all t
        pltpu.VMEM((T * B, S + 2, S * C), jnp.bfloat16),     # p2p  pool(f2), all t
        pltpu.VMEM((T * B, S + 2, S * C), jnp.bfloat16),     # f3p  f3, all t
        pltpu.VMEM((B, S + 2, S * C), jnp.bfloat16),         # hp   h state slab
        pltpu.VMEM((B, H + 2, W * C), jnp.bfloat16),         # f1p  last-step skip
        pltpu.VMEM((B, H1 + 2, W1 * C), jnp.bfloat16),       # f2p  last-step skip
        pltpu.VMEM((B, H1 + 2, W1 * C), jnp.bfloat16),       # uhp  upsample(h)
        pltpu.VMEM((B, H + 2, W * C), jnp.bfloat16),         # ud2p upsample(d2)
        pltpu.VMEM((B, H + 2, W * C), jnp.bfloat16),         # d1p
    ]

    pred_flat, h_next, c_next = pl.pallas_call(
        kernel,
        out_shape=(jax.ShapeDtypeStruct((B * H, W * CLS), jnp.float32),
                   jax.ShapeDtypeStruct((B * S, S * C), jnp.float32),
                   jax.ShapeDtypeStruct((B * S, S * C), jnp.float32)),
        scratch_shapes=scratch_shapes,
        compiler_params=pltpu.CompilerParams(
            vmem_limit_bytes=64 * 1024 * 1024),
    )(xs, h0, c0, *[kp[k] for k in _WKEYS])

    prediction = jnp.transpose(pred_flat.reshape(B, H, W, CLS), (0, 3, 1, 2))
    return prediction, h_next, c_next


_tc_forward_jit = jax.jit(tc_forward_sequence)


# -----------------------------------------------------------------------------
# Model parameters (synthetic segmentation model + ConvLSTM)
# -----------------------------------------------------------------------------
def init_params(key, in_ch, feat_ch, feat_size):
    ks = jax.random.split(key, 16)
    s = 0.05
    p = {
        'enc1_w': s * jax.random.normal(ks[0], (3, 3, in_ch, feat_ch), jnp.float32),
        'enc1_b': jnp.zeros((feat_ch,), jnp.float32),
        'enc2_w': s * jax.random.normal(ks[1], (3, 3, feat_ch, feat_ch), jnp.float32),
        'enc2_b': jnp.zeros((feat_ch,), jnp.float32),
        'enc3_w': s * jax.random.normal(ks[2], (3, 3, feat_ch, feat_ch), jnp.float32),
        'enc3_b': jnp.zeros((feat_ch,), jnp.float32),
        'lstm_w': s * jax.random.normal(ks[3], (3, 3, 2 * feat_ch, 4 * feat_ch), jnp.float32),
        'lstm_b': jnp.zeros((4 * feat_ch,), jnp.float32),
        'h0': s * jax.random.normal(ks[4], (1, feat_size, feat_size, feat_ch), jnp.float32),
        'c0': s * jax.random.normal(ks[5], (1, feat_size, feat_size, feat_ch), jnp.float32),
        'dec2_w': s * jax.random.normal(ks[6], (3, 3, 2 * feat_ch, feat_ch), jnp.float32),
        'dec2_b': jnp.zeros((feat_ch,), jnp.float32),
        'dec1_w': s * jax.random.normal(ks[7], (3, 3, 2 * feat_ch, feat_ch), jnp.float32),
        'dec1_b': jnp.zeros((feat_ch,), jnp.float32),
        'head_w': s * jax.random.normal(ks[8], (3, 3, feat_ch, len(CLASSES)), jnp.float32),
        'head_b': jnp.zeros((len(CLASSES),), jnp.float32),
    }
    return p


class TCSegmentationNet:
    """JAX/Pallas port of the torch TCSegmentationNet (inference path)."""

    def __init__(self, params, feature_channels, feature_size, batch_size=1):
        self.params = params
        self.feature_channels = feature_channels
        self.feature_size = feature_size
        self.batch_size = batch_size
        self._kp_cache = {}
        self.states = None
        self.old_prediction = None
        self.old_gt = None
        self.old_prediction_correct = None
        self.v = 0

    def _kp(self, time_steps, batch_size):
        key = (int(time_steps), int(batch_size))
        if key not in self._kp_cache:
            self._kp_cache[key] = prepare_kernel_params(
                self.params, self.feature_size, batch_size, time_steps)
        return self._kp_cache[key]

    def _initial_states(self, batch_size):
        S, C = self.feature_size, self.feature_channels
        h0 = jnp.broadcast_to(self.params['h0'], (batch_size, S, S, C))
        c0 = jnp.broadcast_to(self.params['c0'], (batch_size, S, S, C))
        h0 = h0.reshape(batch_size * S, S * C).astype(jnp.float32)
        c0 = c0.reshape(batch_size * S, S * C).astype(jnp.float32)
        return h0, c0

    def forward(self, x, y, elap, batch_size, reset_states, optimizer,
                compute_loss=False):
        focal = 0
        tc_loss = 0
        if reset_states:
            self.states = None
        if self.states is None:
            self.states = self._initial_states(batch_size)
        h0, c0 = self.states
        kp = self._kp(x.shape[1], batch_size)
        prediction, h_next, c_next = _tc_forward_jit(
            x.astype(jnp.float32), h0, c0, kp)
        self.states = (h_next, c_next)
        # TODO(synk): Focal/Dice/TC-MSE losses, loss.backward() and
        # optimizer.step() (training-inside-forward) are not translated; this
        # is the compute_loss=False inference path (prediction, 0, 0).
        return prediction, focal, tc_loss


# -----------------------------------------------------------------------------
# Plain-JAX reference (bf16 conv inputs, f32 accumulation) for validation
# -----------------------------------------------------------------------------
def _reference_forward(params, x):
    def conv(v, w, b):
        vb = v.astype(jnp.bfloat16).astype(jnp.float32)
        wb = jnp.asarray(w).astype(jnp.bfloat16).astype(jnp.float32)
        Bv, Hv, Wv, _ = v.shape
        vp = jnp.pad(vb, ((0, 0), (1, 1), (1, 1), (0, 0)))
        out = jnp.zeros((Bv, Hv, Wv, w.shape[-1]), jnp.float32)
        for dh in range(3):
            for dw in range(3):
                out = out + jnp.einsum('bhwc,cd->bhwd',
                                       vp[:, dh:dh + Hv, dw:dw + Wv, :],
                                       wb[dh, dw])
        return out + jnp.asarray(b, jnp.float32)

    def pool(v):
        Bv, Hv, Wv, Cv = v.shape
        return v.reshape(Bv, Hv // 2, 2, Wv // 2, 2, Cv).max(axis=(2, 4))

    def up(v):
        return jnp.repeat(jnp.repeat(v, 2, axis=1), 2, axis=2)

    p = params
    Bv, T = x.shape[0], x.shape[1]
    C = p['enc1_w'].shape[3]
    h = jnp.broadcast_to(p['h0'], (Bv,) + p['h0'].shape[1:]).astype(jnp.float32)
    c = jnp.broadcast_to(p['c0'], (Bv,) + p['c0'].shape[1:]).astype(jnp.float32)
    pred = None
    for t in range(T):
        inp = jnp.transpose(x[:, t], (0, 2, 3, 1)).astype(jnp.float32)
        f1 = jnp.maximum(conv(inp, p['enc1_w'], p['enc1_b']), 0.0)
        f2 = jnp.maximum(conv(pool(f1), p['enc2_w'], p['enc2_b']), 0.0)
        f3 = jnp.maximum(conv(pool(f2), p['enc3_w'], p['enc3_b']), 0.0)
        z = conv(jnp.concatenate([f3, h], axis=-1), p['lstm_w'], p['lstm_b'])
        gi = jax.nn.sigmoid(z[..., 0 * C:1 * C])
        gf = jax.nn.sigmoid(z[..., 1 * C:2 * C])
        go = jax.nn.sigmoid(z[..., 2 * C:3 * C])
        gg = jnp.tanh(z[..., 3 * C:4 * C])
        c = gf * c + gi * gg
        h = go * jnp.tanh(c)
        d2 = jnp.maximum(conv(jnp.concatenate([up(h), f2], axis=-1),
                              p['dec2_w'], p['dec2_b']), 0.0)
        d1 = jnp.maximum(conv(jnp.concatenate([up(d2), f1], axis=-1),
                              p['dec1_w'], p['dec1_b']), 0.0)
        pred = conv(d1, p['head_w'], p['head_b'])
    return jnp.transpose(pred, (0, 3, 1, 2))


# -----------------------------------------------------------------------------
# main
# -----------------------------------------------------------------------------
if __name__ == "__main__":
    B, T, CIN, H, W = 2, 4, 3, 16, 16
    FEAT_CH, FEAT_SIZE = 8, 4          # H/4 = 4 after two 2x poolings
    key = jax.random.PRNGKey(0)
    k_x, k_y, k_p = jax.random.split(key, 3)

    x = jax.random.normal(k_x, (B, T, CIN, H, W), jnp.float32)
    labels = jax.random.bernoulli(k_y, 0.5, (B, T, H, W)).astype(jnp.int32)
    y = jax.nn.one_hot(labels, len(CLASSES), axis=2, dtype=jnp.float32)

    params = init_params(k_p, CIN, FEAT_CH, FEAT_SIZE)
    net = TCSegmentationNet(params, FEAT_CH, FEAT_SIZE, batch_size=B)

    prediction, focal, tc_loss = net.forward(
        x, y, elap=None, batch_size=B, reset_states=True, optimizer=None,
        compute_loss=False)
    prediction = jax.block_until_ready(prediction)
    assert prediction.shape == (B, len(CLASSES), H, W)
    assert prediction.dtype == jnp.float32

    # validate against the plain-JAX reference (same bf16 matmul inputs)
    ref = jax.block_until_ready(_reference_forward(params, x))
    np.testing.assert_allclose(np.asarray(prediction), np.asarray(ref),
                               rtol=5e-2, atol=5e-3)

    print("KERNEL_OK")
</pallas_src>

<mosaic_0001>
module attributes {stable_mosaic.version = 11 : i64} {
  func.func @_tc_forward_kernel(%arg0: memref<8x18x48xbf16, #tpu.memory_space<vmem>>, %arg1: memref<8x32xf32, #tpu.memory_space<vmem>>, %arg2: memref<8x32xf32, #tpu.memory_space<vmem>>, %arg3: memref<144x128xbf16, #tpu.memory_space<vmem>>, %arg4: memref<1x128xf32, #tpu.memory_space<vmem>>, %arg5: memref<192x64xbf16, #tpu.memory_space<vmem>>, %arg6: memref<1x64xf32, #tpu.memory_space<vmem>>, %arg7: memref<96x32xbf16, #tpu.memory_space<vmem>>, %arg8: memref<1x32xf32, #tpu.memory_space<vmem>>, %arg9: memref<96x128xbf16, #tpu.memory_space<vmem>>, %arg10: memref<96x128xbf16, #tpu.memory_space<vmem>>, %arg11: memref<1x128xf32, #tpu.memory_space<vmem>>, %arg12: memref<384x64xbf16, #tpu.memory_space<vmem>>, %arg13: memref<1x64xf32, #tpu.memory_space<vmem>>, %arg14: memref<768x128xbf16, #tpu.memory_space<vmem>>, %arg15: memref<1x128xf32, #tpu.memory_space<vmem>>, %arg16: memref<384x32xbf16, #tpu.memory_space<vmem>>, %arg17: memref<1x32xf32, #tpu.memory_space<vmem>>, %arg18: memref<2x64x128xbf16, #tpu.memory_space<vmem>>, %arg19: memref<2x128x64xbf16, #tpu.memory_space<vmem>>, %arg20: memref<2x32x64xbf16, #tpu.memory_space<vmem>>, %arg21: memref<2x64x32xbf16, #tpu.memory_space<vmem>>, %arg22: memref<16x8xbf16, #tpu.memory_space<vmem>>, %arg23: memref<32x64xbf16, #tpu.memory_space<vmem>>, %arg24: memref<32x16xbf16, #tpu.memory_space<vmem>>, %arg25: memref<64x128xbf16, #tpu.memory_space<vmem>>, %arg26: memref<32x32xf32, #tpu.memory_space<vmem>>, %arg27: memref<8x32xf32, #tpu.memory_space<vmem>>, %arg28: memref<8x32xf32, #tpu.memory_space<vmem>>, %arg29: memref<8x10x64xbf16, #tpu.memory_space<vmem>>, %arg30: memref<8x6x32xbf16, #tpu.memory_space<vmem>>, %arg31: memref<8x6x32xbf16, #tpu.memory_space<vmem>>, %arg32: memref<2x6x32xbf16, #tpu.memory_space<vmem>>, %arg33: memref<2x18x128xbf16, #tpu.memory_space<vmem>>, %arg34: memref<2x10x64xbf16, #tpu.memory_space<vmem>>, %arg35: memref<2x10x64xbf16, #tpu.memory_space<vmem>>, %arg36: memref<2x18x128xbf16, #tpu.memory_space<vmem>>, %arg37: memref<2x18x128xbf16, #tpu.memory_space<vmem>>) attributes {dimension_semantics = [], scalar_prefetch = 0 : i64, scratch_operands = 9 : i64, tpu.core_type = #tpu.core_type<tc>} {
    %cst = arith.constant 0.000000e+00 : bf16
    %0 = vector.broadcast %cst : bf16 to vector<8x10x64xbf16>
    %c0 = arith.constant 0 : index
    %c0_0 = arith.constant 0 : index
    %c0_1 = arith.constant 0 : index
    %1 = vector.load %arg29[%c0, %c0_0, %c0_1] : memref<8x10x64xbf16, #tpu.memory_space<vmem>>, vector<8x10x64xbf16>
    tpu.vector_store %arg29[%c0, %c0_0, %c0_1], %0 {strides = array<i32>} : memref<8x10x64xbf16, #tpu.memory_space<vmem>>, vector<8x10x64xbf16>,
    %cst_2 = arith.constant 0.000000e+00 : bf16
    %2 = vector.broadcast %cst_2 : bf16 to vector<8x6x32xbf16>
    %c0_3 = arith.constant 0 : index
    %c0_4 = arith.constant 0 : index
    %c0_5 = arith.constant 0 : index
    %3 = vector.load %arg30[%c0_3, %c0_4, %c0_5] : memref<8x6x32xbf16, #tpu.memory_space<vmem>>, vector<8x6x32xbf16>
    tpu.vector_store %arg30[%c0_3, %c0_4, %c0_5], %2 {strides = array<i32>} : memref<8x6x32xbf16, #tpu.memory_space<vmem>>, vector<8x6x32xbf16>,
    %cst_6 = arith.constant 0.000000e+00 : bf16
    %4 = vector.broadcast %cst_6 : bf16 to vector<8x6x32xbf16>
    %c0_7 = arith.constant 0 : index
    %c0_8 = arith.constant 0 : index
    %c0_9 = arith.constant 0 : index
    %5 = vector.load %arg31[%c0_7, %c0_8, %c0_9] : memref<8x6x32xbf16, #tpu.memory_space<vmem>>, vector<8x6x32xbf16>
    tpu.vector_store %arg31[%c0_7, %c0_8, %c0_9], %4 {strides = array<i32>} : memref<8x6x32xbf16, #tpu.memory_space<vmem>>, vector<8x6x32xbf16>,
    %cst_10 = arith.constant 0.000000e+00 : bf16
    %6 = vector.broadcast %cst_10 : bf16 to vector<2x6x32xbf16>
    %c0_11 = arith.constant 0 : index
    %c0_12 = arith.constant 0 : index
    %c0_13 = arith.constant 0 : index
    %7 = vector.load %arg32[%c0_11, %c0_12, %c0_13] : memref<2x6x32xbf16, #tpu.memory_space<vmem>>, vector<2x6x32xbf16>
    tpu.vector_store %arg32[%c0_11, %c0_12, %c0_13], %6 {strides = array<i32>} : memref<2x6x32xbf16, #tpu.memory_space<vmem>>, vector<2x6x32xbf16>,
    %cst_14 = arith.constant 0.000000e+00 : bf16
    %8 = vector.broadcast %cst_14 : bf16 to vector<2x18x128xbf16>
    %c0_15 = arith.constant 0 : index
    %c0_16 = arith.constant 0 : index
    %c0_17 = arith.constant 0 : index
    %9 = vector.load %arg33[%c0_15, %c0_16, %c0_17] : memref<2x18x128xbf16, #tpu.memory_space<vmem>>, vector<2x18x128xbf16>
    tpu.vector_store %arg33[%c0_15, %c0_16, %c0_17], %8 {strides = array<i32>} : memref<2x18x128xbf16, #tpu.memory_space<vmem>>, vector<2x18x128xbf16>,
    %cst_18 = arith.constant 0.000000e+00 : bf16
    %10 = vector.broadcast %cst_18 : bf16 to vector<2x10x64xbf16>
    %c0_19 = arith.constant 0 : index
    %c0_20 = arith.constant 0 : index
    %c0_21 = arith.constant 0 : index
    %11 = vector.load %arg34[%c0_19, %c0_20, %c0_21] : memref<2x10x64xbf16, #tpu.memory_space<vmem>>, vector<2x10x64xbf16>
    tpu.vector_store %arg34[%c0_19, %c0_20, %c0_21], %10 {strides = array<i32>} : memref<2x10x64xbf16, #tpu.memory_space<vmem>>, vector<2x10x64xbf16>,
    %cst_22 = arith.constant 0.000000e+00 : bf16
    %12 = vector.broadcast %cst_22 : bf16 to vector<2x10x64xbf16>
    %c0_23 = arith.constant 0 : index
    %c0_24 = arith.constant 0 : index
    %c0_25 = arith.constant 0 : index
    %13 = vector.load %arg35[%c0_23, %c0_24, %c0_25] : memref<2x10x64xbf16, #tpu.memory_space<vmem>>, vector<2x10x64xbf16>
    tpu.vector_store %arg35[%c0_23, %c0_24, %c0_25], %12 {strides = array<i32>} : memref<2x10x64xbf16, #tpu.memory_space<vmem>>, vector<2x10x64xbf16>,
    %cst_26 = arith.constant 0.000000e+00 : bf16
    %14 = vector.broadcast %cst_26 : bf16 to vector<2x18x128xbf16>
    %c0_27 = arith.constant 0 : index
    %c0_28 = arith.constant 0 : index
    %c0_29 = arith.constant 0 : index
    %15 = vector.load %arg36[%c0_27, %c0_28, %c0_29] : memref<2x18x128xbf16, #tpu.memory_space<vmem>>, vector<2x18x128xbf16>
    tpu.vector_store %arg36[%c0_27, %c0_28, %c0_29], %14 {strides = array<i32>} : memref<2x18x128xbf16, #tpu.memory_space<vmem>>, vector<2x18x128xbf16>,
    %cst_30 = arith.constant 0.000000e+00 : bf16
    %16 = vector.broadcast %cst_30 : bf16 to vector<2x18x128xbf16>
    %c0_31 = arith.constant 0 : index
    %c0_32 = arith.constant 0 : index
    %c0_33 = arith.constant 0 : index
    %17 = vector.load %arg37[%c0_31, %c0_32, %c0_33] : memref<2x18x128xbf16, #tpu.memory_space<vmem>>, vector<2x18x128xbf16>
    tpu.vector_store %arg37[%c0_31, %c0_32, %c0_33], %16 {strides = array<i32>} : memref<2x18x128xbf16, #tpu.memory_space<vmem>>, vector<2x18x128xbf16>,
    %c0_34 = arith.constant 0 : index
    %c0_35 = arith.constant 0 : index
    %c0_36 = arith.constant 0 : index
    %18 = vector.load %arg0[%c0_34, %c0_35, %c0_36] : memref<8x18x48xbf16, #tpu.memory_space<vmem>>, vector<8x16x48xbf16>
    %c0_37 = arith.constant 0 : index
    %c1 = arith.constant 1 : index
    %c0_38 = arith.constant 0 : index
    %19 = vector.load %arg0[%c0_37, %c1, %c0_38] : memref<8x18x48xbf16, #tpu.memory_space<vmem>>, vector<8x16x48xbf16>
    %c0_39 = arith.constant 0 : index
    %c2 = arith.constant 2 : index
    %c0_40 = arith.constant 0 : index
    %20 = vector.load %arg0[%c0_39, %c2, %c0_40] : memref<8x18x48xbf16, #tpu.memory_space<vmem>>, vector<8x16x48xbf16>
    %21 = tpu.concatenate %18, %19, %20 in 2 : vector<8x16x48xbf16>, vector<8x16x48xbf16>, vector<8x16x48xbf16> -> vector<8x16x144xbf16>
    %22 = vector.shape_cast %21 : vector<8x16x144xbf16> to vector<128x144xbf16>
    %c0_41 = arith.constant 0 : index
    %c0_42 = arith.constant 0 : index
    %23 = vector.load %arg3[%c0_41, %c0_42] : memref<144x128xbf16, #tpu.memory_space<vmem>>, vector<144x128xbf16>
    %cst_43 = arith.constant dense<0.000000e+00> : vector<128x128xf32>
    %24 = tpu.matmul %22, %23, %cst_43 {dimension_numbers = #tpu.dot_dimension_numbers<[1], [0], [0], [1], [0, 0, 1, 1], [], []>} : vector<128x144xbf16>, vector<144x128xbf16>, vector<128x128xf32> -> vector<128x128xf32>
    %c0_44 = arith.constant 0 : index
    %c0_45 = arith.constant 0 : index
    %25 = vector.load %arg4[%c0_44, %c0_45] : memref<1x128xf32, #tpu.memory_space<vmem>>, vector<1x128xf32>
    %26 = vector.broadcast %25 : vector<1x128xf32> to vector<128x128xf32>
    %27 = arith.addf %24, %26 : vector<128x128xf32>
    %cst_46 = arith.constant 0.000000e+00 : f32
    %28 = vector.broadcast %cst_46 : f32 to vector<128x128xf32>
    %29 = arith.maximumf %27, %28 : vector<128x128xf32>
    %30 = vector.extract_strided_slice %29 {offsets = [96, 0], sizes = [32, 128], strides = [1, 1]} : vector<128x128xf32> to vector<32x128xf32>
    %31 = vector.shape_cast %30 : vector<32x128xf32> to vector<2x16x128xf32>
    %32 = arith.truncf %31 : vector<2x16x128xf32> to vector<2x16x128xbf16>
    %c0_47 = arith.constant 0 : index
    %c1_48 = arith.constant 1 : index
    %c0_49 = arith.constant 0 : index
    %33 = vector.load %arg33[%c0_47, %c1_48, %c0_49] : memref<2x18x128xbf16, #tpu.memory_space<vmem>>, vector<2x16x128xbf16>
    tpu.vector_store %arg33[%c0_47, %c1_48, %c0_49], %32 {strides = array<i32>} : memref<2x18x128xbf16, #tpu.memory_space<vmem>>, vector<2x16x128xbf16>,
    %34 = arith.truncf %29 : vector<128x128xf32> to vector<128x128xbf16>
    %c0_50 = arith.constant 0 : index
    %c0_51 = arith.constant 0 : index
    %c0_52 = arith.constant 0 : index
    %35 = vector.load %arg18[%c0_50, %c0_51, %c0_52] : memref<2x64x128xbf16, #tpu.memory_space<vmem>>, vector<1x64x128xbf16>
    %36 = vector.shape_cast %35 : vector<1x64x128xbf16> to vector<64x128xbf16>
    %cst_53 = arith.constant dense<0.000000e+00> : vector<64x128xf32>
    %37 = tpu.matmul %36, %34, %cst_53 {dimension_numbers = #tpu.dot_dimension_numbers<[1], [0], [0], [1], [0, 0, 1, 1], [], []>} : vector<64x128xbf16>, vector<128x128xbf16>, vector<64x128xf32> -> vector<64x128xf32>
    %c1_54 = arith.constant 1 : index
    %c0_55 = arith.constant 0 : index
    %c0_56 = arith.constant 0 : index
    %38 = vector.load %arg18[%c1_54, %c0_55, %c0_56] : memref<2x64x128xbf16, #tpu.memory_space<vmem>>, vector<1x64x128xbf16>
    %39 = vector.shape_cast %38 : vector<1x64x128xbf16> to vector<64x128xbf16>
    %cst_57 = arith.constant dense<0.000000e+00> : vector<64x128xf32>
    %40 = tpu.matmul %39, %34, %cst_57 {dimension_numbers = #tpu.dot_dimension_numbers<[1], [0], [0], [1], [0, 0, 1, 1], [], []>} : vector<64x128xbf16>, vector<128x128xbf16>, vector<64x128xf32> -> vector<64x128xf32>
    %41 = arith.maximumf %37, %40 : vector<64x128xf32>
    %42 = arith.truncf %41 : vector<64x128xf32> to vector<64x128xbf16>
    %c0_58 = arith.constant 0 : index
    %c0_59 = arith.constant 0 : index
    %c0_60 = arith.constant 0 : index
    %43 = vector.load %arg19[%c0_58, %c0_59, %c0_60] : memref<2x128x64xbf16, #tpu.memory_space<vmem>>, vector<1x128x64xbf16>
    %44 = vector.shape_cast %43 : vector<1x128x64xbf16> to vector<128x64xbf16>
    %cst_61 = arith.constant dense<0.000000e+00> : vector<64x64xf32>
    %45 = tpu.matmul %42, %44, %cst_61 {dimension_numbers = #tpu.dot_dimension_numbers<[1], [0], [0], [1], [0, 0, 1, 1], [], []>} : vector<64x128xbf16>, vector<128x64xbf16>, vector<64x64xf32> -> vector<64x64xf32>
    %c1_62 = arith.constant 1 : index
    %c0_63 = arith.constant 0 : index
    %c0_64 = arith.constant 0 : index
    %46 = vector.load %arg19[%c1_62, %c0_63, %c0_64] : memref<2x128x64xbf16, #tpu.memory_space<vmem>>, vector<1x128x64xbf16>
    %47 = vector.shape_cast %46 : vector<1x128x64xbf16> to vector<128x64xbf16>
    %cst_65 = arith.constant dense<0.000000e+00> : vector<64x64xf32>
    %48 = tpu.matmul %42, %47, %cst_65 {dimension_numbers = #tpu.dot_dimension_numbers<[1], [0], [0], [1], [0, 0, 1, 1], [], []>} : vector<64x128xbf16>, vector<128x64xbf16>, vector<64x64xf32> -> vector<64x64xf32>
    %49 = arith.maximumf %45, %48 : vector<64x64xf32>
    %50 = vector.shape_cast %49 : vector<64x64xf32> to vector<8x8x64xf32>
    %51 = arith.truncf %50 : vector<8x8x64xf32> to vector<8x8x64xbf16>
    %c0_66 = arith.constant 0 : index
    %c1_67 = arith.constant 1 : index
    %c0_68 = arith.constant 0 : index
    %52 = vector.load %arg29[%c0_66, %c1_67, %c0_68] : memref<8x10x64xbf16, #tpu.memory_space<vmem>>, vector<8x8x64xbf16>
    tpu.vector_store %arg29[%c0_66, %c1_67, %c0_68], %51 {strides = array<i32>} : memref<8x10x64xbf16, #tpu.memory_space<vmem>>, vector<8x8x64xbf16>,
    %c0_69 = arith.constant 0 : index
    %c0_70 = arith.constant 0 : index
    %c0_71 = arith.constant 0 : index
    %53 = vector.load %arg29[%c0_69, %c0_70, %c0_71] : memref<8x10x64xbf16, #tpu.memory_space<vmem>>, vector<8x8x64xbf16>
    %c0_72 = arith.constant 0 : index
    %c1_73 = arith.constant 1 : index
    %c0_74 = arith.constant 0 : index
    %54 = vector.load %arg29[%c0_72, %c1_73, %c0_74] : memref<8x10x64xbf16, #tpu.memory_space<vmem>>, vector<8x8x64xbf16>
    %c0_75 = arith.constant 0 : index
    %c2_76 = arith.constant 2 : index
    %c0_77 = arith.constant 0 : index
    %55 = vector.load %arg29[%c0_75, %c2_76, %c0_77] : memref<8x10x64xbf16, #tpu.memory_space<vmem>>, vector<8x8x64xbf16>
    %56 = tpu.concatenate %53, %54, %55 in 2 : vector<8x8x64xbf16>, vector<8x8x64xbf16>, vector<8x8x64xbf16> -> vector<8x8x192xbf16>
    %57 = vector.shape_cast %56 : vector<8x8x192xbf16> to vector<64x192xbf16>
    %c0_78 = arith.constant 0 : index
    %c0_79 = arith.constant 0 : index
    %58 = vector.load %arg5[%c0_78, %c0_79] : memref<192x64xbf16, #tpu.memory_space<vmem>>, vector<192x64xbf16>
    %cst_80 = arith.constant dense<0.000000e+00> : vector<64x64xf32>
    %59 = tpu.matmul %57, %58, %cst_80 {dimension_numbers = #tpu.dot_dimension_numbers<[1], [0], [0], [1], [0, 0, 1, 1], [], []>} : vector<64x192xbf16>, vector<192x64xbf16>, vector<64x64xf32> -> vector<64x64xf32>
    %c0_81 = arith.constant 0 : index
    %c0_82 = arith.constant 0 : index
    %60 = vector.load %arg6[%c0_81, %c0_82] : memref<1x64xf32, #tpu.memory_space<vmem>>, vector<1x64xf32>
    %61 = vector.broadcast %60 : vector<1x64xf32> to vector<64x64xf32>
    %62 = arith.addf %59, %61 : vector<64x64xf32>
    %cst_83 = arith.constant 0.000000e+00 : f32
    %63 = vector.broadcast %cst_83 : f32 to vector<64x64xf32>
    %64 = arith.maximumf %62, %63 : vector<64x64xf32>
    %65 = vector.extract_strided_slice %64 {offsets = [48, 0], sizes = [16, 64], strides = [1, 1]} : vector<64x64xf32> to vector<16x64xf32>
    %66 = vector.shape_cast %65 : vector<16x64xf32> to vector<2x8x64xf32>
    %67 = arith.truncf %66 : vector<2x8x64xf32> to vector<2x8x64xbf16>
    %c0_84 = arith.constant 0 : index
    %c1_85 = arith.constant 1 : index
    %c0_86 = arith.constant 0 : index
    %68 = vector.load %arg34[%c0_84, %c1_85, %c0_86] : memref<2x10x64xbf16, #tpu.memory_space<vmem>>, vector<2x8x64xbf16>
    tpu.vector_store %arg34[%c0_84, %c1_85, %c0_86], %67 {strides = array<i32>} : memref<2x10x64xbf16, #tpu.memory_space<vmem>>, vector<2x8x64xbf16>,
    %69 = arith.truncf %64 : vector<64x64xf32> to vector<64x64xbf16>
    %c0_87 = arith.constant 0 : index
    %c0_88 = arith.constant 0 : index
    %c0_89 = arith.constant 0 : index
    %70 = vector.load %arg20[%c0_87, %c0_88, %c0_89] : memref<2x32x64xbf16, #tpu.memory_space<vmem>>, vector<1x32x64xbf16>
    %71 = vector.shape_cast %70 : vector<1x32x64xbf16> to vector<32x64xbf16>
    %cst_90 = arith.constant dense<0.000000e+00> : vector<32x64xf32>
    %72 = tpu.matmul %71, %69, %cst_90 {dimension_numbers = #tpu.dot_dimension_numbers<[1], [0], [0], [1], [0, 0, 1, 1], [], []>} : vector<32x64xbf16>, vector<64x64xbf16>, vector<32x64xf32> -> vector<32x64xf32>
    %c1_91 = arith.constant 1 : index
    %c0_92 = arith.constant 0 : index
    %c0_93 = arith.constant 0 : index
    %73 = vector.load %arg20[%c1_91, %c0_92, %c0_93] : memref<2x32x64xbf16, #tpu.memory_space<vmem>>, vector<1x32x64xbf16>
    %74 = vector.shape_cast %73 : vector<1x32x64xbf16> to vector<32x64xbf16>
    %cst_94 = arith.constant dense<0.000000e+00> : vector<32x64xf32>
    %75 = tpu.matmul %74, %69, %cst_94 {dimension_numbers = #tpu.dot_dimension_numbers<[1], [0], [0], [1], [0, 0, 1, 1], [], []>} : vector<32x64xbf16>, vector<64x64xbf16>, vector<32x64xf32> -> vector<32x64xf32>
    %76 = arith.maximumf %72, %75 : vector<32x64xf32>
    %77 = arith.truncf %76 : vector<32x64xf32> to vector<32x64xbf16>
    %c0_95 = arith.constant 0 : index
    %c0_96 = arith.constant 0 : index
    %c0_97 = arith.constant 0 : index
    %78 = vector.load %arg21[%c0_95, %c0_96, %c0_97] : memref<2x64x32xbf16, #tpu.memory_space<vmem>>, vector<1x64x32xbf16>
    %79 = vector.shape_cast %78 : vector<1x64x32xbf16> to vector<64x32xbf16>
    %cst_98 = arith.constant dense<0.000000e+00> : vector<32x32xf32>
    %80 = tpu.matmul %77, %79, %cst_98 {dimension_numbers = #tpu.dot_dimension_numbers<[1], [0], [0], [1], [0, 0, 1, 1], [], []>} : vector<32x64xbf16>, vector<64x32xbf16>, vector<32x32xf32> -> vector<32x32xf32>
    %c1_99 = arith.constant 1 : index
    %c0_100 = arith.constant 0 : index
    %c0_101 = arith.constant 0 : index
    %81 = vector.load %arg21[%c1_99, %c0_100, %c0_101] : memref<2x64x32xbf16, #tpu.memory_space<vmem>>, vector<1x64x32xbf16>
    %82 = vector.shape_cast %81 : vector<1x64x32xbf16> to vector<64x32xbf16>
    %cst_102 = arith.constant dense<0.000000e+00> : vector<32x32xf32>
    %83 = tpu.matmul %77, %82, %cst_102 {dimension_numbers = #tpu.dot_dimension_numbers<[1], [0], [0], [1], [0, 0, 1, 1], [], []>} : vector<32x64xbf16>, vector<64x32xbf16>, vector<32x32xf32> -> vector<32x32xf32>
    %84 = arith.maximumf %80, %83 : vector<32x32xf32>
    %85 = vector.shape_cast %84 : vector<32x32xf32> to vector<8x4x32xf32>
    %86 = arith.truncf %85 : vector<8x4x32xf32> to vector<8x4x32xbf16>
    %c0_103 = arith.constant 0 : index
    %c1_104 = arith.constant 1 : index
    %c0_105 = arith.constant 0 : index
    %87 = vector.load %arg30[%c0_103, %c1_104, %c0_105] : memref<8x6x32xbf16, #tpu.memory_space<vmem>>, vector<8x4x32xbf16>
    tpu.vector_store %arg30[%c0_103, %c1_104, %c0_105], %86 {strides = array<i32>} : memref<8x6x32xbf16, #tpu.memory_space<vmem>>, vector<8x4x32xbf16>,
    %c0_106 = arith.constant 0 : index
    %c0_107 = arith.constant 0 : index
    %c0_108 = arith.constant 0 : index
    %88 = vector.load %arg30[%c0_106, %c0_107, %c0_108] : memref<8x6x32xbf16, #tpu.memory_space<vmem>>, vector<8x4x32xbf16>
    %c0_109 = arith.constant 0 : index
    %c1_110 = arith.constant 1 : index
    %c0_111 = arith.constant 0 : index
    %89 = vector.load %arg30[%c0_109, %c1_110, %c0_111] : memref<8x6x32xbf16, #tpu.memory_space<vmem>>, vector<8x4x32xbf16>
    %c0_112 = arith.constant 0 : index
    %c2_113 = arith.constant 2 : index
    %c0_114 = arith.constant 0 : index
    %90 = vector.load %arg30[%c0_112, %c2_113, %c0_114] : memref<8x6x32xbf16, #tpu.memory_space<vmem>>, vector<8x4x32xbf16>
    %91 = tpu.concatenate %88, %89, %90 in 2 : vector<8x4x32xbf16>, vector<8x4x32xbf16>, vector<8x4x32xbf16> -> vector<8x4x96xbf16>
    %92 = vector.shape_cast %91 : vector<8x4x96xbf16> to vector<32x96xbf16>
    %c0_115 = arith.constant 0 : index
    %c0_116 = arith.constant 0 : index
    %93 = vector.load %arg7[%c0_115, %c0_116] : memref<96x32xbf16, #tpu.memory_space<vmem>>, vector<96x32xbf16>
    %cst_117 = arith.constant dense<0.000000e+00> : vector<32x32xf32>
    %94 = tpu.matmul %92, %93, %cst_117 {dimension_numbers = #tpu.dot_dimension_numbers<[1], [0], [0], [1], [0, 0, 1, 1], [], []>} : vector<32x96xbf16>, vector<96x32xbf16>, vector<32x32xf32> -> vector<32x32xf32>
    %c0_118 = arith.constant 0 : index
    %c0_119 = arith.constant 0 : index
    %95 = vector.load %arg8[%c0_118, %c0_119] : memref<1x32xf32, #tpu.memory_space<vmem>>, vector<1x32xf32>
    %96 = vector.broadcast %95 : vector<1x32xf32> to vector<32x32xf32>
    %97 = arith.addf %94, %96 : vector<32x32xf32>
    %cst_120 = arith.constant 0.000000e+00 : f32
    %98 = vector.broadcast %cst_120 : f32 to vector<32x32xf32>
    %99 = arith.maximumf %97, %98 : vector<32x32xf32>
    %100 = vector.shape_cast %99 : vector<32x32xf32> to vector<8x4x32xf32>
    %101 = arith.truncf %100 : vector<8x4x32xf32> to vector<8x4x32xbf16>
    %c0_121 = arith.constant 0 : index
    %c1_122 = arith.constant 1 : index
    %c0_123 = arith.constant 0 : index
    %102 = vector.load %arg31[%c0_121, %c1_122, %c0_123] : memref<8x6x32xbf16, #tpu.memory_space<vmem>>, vector<8x4x32xbf16>
    tpu.vector_store %arg31[%c0_121, %c1_122, %c0_123], %101 {strides = array<i32>} : memref<8x6x32xbf16, #tpu.memory_space<vmem>>, vector<8x4x32xbf16>,
    %c0_124 = arith.constant 0 : index
    %c0_125 = arith.constant 0 : index
    %c0_126 = arith.constant 0 : index
    %103 = vector.load %arg31[%c0_124, %c0_125, %c0_126] : memref<8x6x32xbf16, #tpu.memory_space<vmem>>, vector<8x4x32xbf16>
    %c0_127 = arith.constant 0 : index
    %c1_128 = arith.constant 1 : index
    %c0_129 = arith.constant 0 : index
    %104 = vector.load %arg31[%c0_127, %c1_128, %c0_129] : memref<8x6x32xbf16, #tpu.memory_space<vmem>>, vector<8x4x32xbf16>
    %c0_130 = arith.constant 0 : index
    %c2_131 = arith.constant 2 : index
    %c0_132 = arith.constant 0 : index
    %105 = vector.load %arg31[%c0_130, %c2_131, %c0_132] : memref<8x6x32xbf16, #tpu.memory_space<vmem>>, vector<8x4x32xbf16>
    %106 = tpu.concatenate %103, %104, %105 in 2 : vector<8x4x32xbf16>, vector<8x4x32xbf16>, vector<8x4x32xbf16> -> vector<8x4x96xbf16>
    %107 = vector.shape_cast %106 : vector<8x4x96xbf16> to vector<32x96xbf16>
    %c0_133 = arith.constant 0 : index
    %c0_134 = arith.constant 0 : index
    %108 = vector.load %arg9[%c0_133, %c0_134] : memref<96x128xbf16, #tpu.memory_space<vmem>>, vector<96x128xbf16>
    %cst_135 = arith.constant dense<0.000000e+00> : vector<32x128xf32>
    %109 = tpu.matmul %107, %108, %cst_135 {dimension_numbers = #tpu.dot_dimension_numbers<[1], [0], [0], [1], [0, 0, 1, 1], [], []>} : vector<32x96xbf16>, vector<96x128xbf16>, vector<32x128xf32> -> vector<32x128xf32>
    %c0_136 = arith.constant 0 : index
    %c0_137 = arith.constant 0 : index
    %110 = vector.load %arg11[%c0_136, %c0_137] : memref<1x128xf32, #tpu.memory_space<vmem>>, vector<1x128xf32>
    %111 = vector.broadcast %110 : vector<1x128xf32> to vector<32x128xf32>
    %112 = arith.addf %109, %111 : vector<32x128xf32>
    %c0_138 = arith.constant 0 : index
    %c0_139 = arith.constant 0 : index
    %113 = vector.load %arg1[%c0_138, %c0_139] : memref<8x32xf32, #tpu.memory_space<vmem>>, vector<8x32xf32>
    %114 = vector.shape_cast %113 : vector<8x32xf32> to vector<2x4x32xf32>
    %115 = arith.truncf %114 : vector<2x4x32xf32> to vector<2x4x32xbf16>
    %c0_140 = arith.constant 0 : index
    %c1_141 = arith.constant 1 : index
    %c0_142 = arith.constant 0 : index
    %116 = vector.load %arg32[%c0_140, %c1_141, %c0_142] : memref<2x6x32xbf16, #tpu.memory_space<vmem>>, vector<2x4x32xbf16>
    tpu.vector_store %arg32[%c0_140, %c1_141, %c0_142], %115 {strides = array<i32>} : memref<2x6x32xbf16, #tpu.memory_space<vmem>>, vector<2x4x32xbf16>,
    %c0_143 = arith.constant 0 : index
    %c0_144 = arith.constant 0 : index
    %117 = vector.load %arg2[%c0_143, %c0_144] : memref<8x32xf32, #tpu.memory_space<vmem>>, vector<8x32xf32>
    %c0_145 = arith.constant 0 : index
    %c0_146 = arith.constant 0 : index
    %c0_147 = arith.constant 0 : index
    %118 = vector.load %arg32[%c0_145, %c0_146, %c0_147] : memref<2x6x32xbf16, #tpu.memory_space<vmem>>, vector<2x4x32xbf16>
    %c0_148 = arith.constant 0 : index
    %c1_149 = arith.constant 1 : index
    %c0_150 = arith.constant 0 : index
    %119 = vector.load %arg32[%c0_148, %c1_149, %c0_150] : memref<2x6x32xbf16, #tpu.memory_space<vmem>>, vector<2x4x32xbf16>
    %c0_151 = arith.constant 0 : index
    %c2_152 = arith.constant 2 : index
    %c0_153 = arith.constant 0 : index
    %120 = vector.load %arg32[%c0_151, %c2_152, %c0_153] : memref<2x6x32xbf16, #tpu.memory_space<vmem>>, vector<2x4x32xbf16>
    %121 = tpu.concatenate %118, %119, %120 in 2 : vector<2x4x32xbf16>, vector<2x4x32xbf16>, vector<2x4x32xbf16> -> vector<2x4x96xbf16>
    %122 = vector.shape_cast %121 : vector<2x4x96xbf16> to vector<8x96xbf16>
    %c0_154 = arith.constant 0 : index
    %c0_155 = arith.constant 0 : index
    %123 = vector.load %arg10[%c0_154, %c0_155] : memref<96x128xbf16, #tpu.memory_space<vmem>>, vector<96x128xbf16>
    %cst_156 = arith.constant dense<0.000000e+00> : vector<8x128xf32>
    %124 = tpu.matmul %122, %123, %cst_156 {dimension_numbers = #tpu.dot_dimension_numbers<[1], [0], [0], [1], [0, 0, 1, 1], [], []>} : vector<8x96xbf16>, vector<96x128xbf16>, vector<8x128xf32> -> vector<8x128xf32>
    %125 = vector.extract_strided_slice %112 {offsets = [0, 0], sizes = [8, 128], strides = [1, 1]} : vector<32x128xf32> to vector<8x128xf32>
    %126 = arith.addf %125, %124 : vector<8x128xf32>
    %127 = vector.extract_strided_slice %126 {offsets = [0, 0], sizes = [8, 32], strides = [1, 1]} : vector<8x128xf32> to vector<8x32xf32>
    %128 = arith.negf %127 : vector<8x32xf32>
    %129 = math.exp %128 : vector<8x32xf32>
    %cst_157 = arith.constant 1.000000e+00 : f32
    %130 = vector.broadcast %cst_157 : f32 to vector<8x32xf32>
    %131 = arith.addf %130, %129 : vector<8x32xf32>
    %132 = arith.divf %130, %131 : vector<8x32xf32>
    %133 = vector.extract_strided_slice %126 {offsets = [0, 32], sizes = [8, 32], strides = [1, 1]} : vector<8x128xf32> to vector<8x32xf32>
    %134 = arith.negf %133 : vector<8x32xf32>
    %135 = math.exp %134 : vector<8x32xf32>
    %cst_158 = arith.constant 1.000000e+00 : f32
    %136 = vector.broadcast %cst_158 : f32 to vector<8x32xf32>
    %137 = arith.addf %136, %135 : vector<8x32xf32>
    %138 = arith.divf %136, %137 : vector<8x32xf32>
    %139 = vector.extract_strided_slice %126 {offsets = [0, 64], sizes = [8, 32], strides = [1, 1]} : vector<8x128xf32> to vector<8x32xf32>
    %140 = arith.negf %139 : vector<8x32xf32>
    %141 = math.exp %140 : vector<8x32xf32>
    %cst_159 = arith.constant 1.000000e+00 : f32
    %142 = vector.broadcast %cst_159 : f32 to vector<8x32xf32>
    %143 = arith.addf %142, %141 : vector<8x32xf32>
    %144 = arith.divf %142, %143 : vector<8x32xf32>
    %145 = vector.extract_strided_slice %126 {offsets = [0, 96], sizes = [8, 32], strides = [1, 1]} : vector<8x128xf32> to vector<8x32xf32>
    %146 = math.tanh %145 : vector<8x32xf32>
    %147 = arith.mulf %138, %117 : vector<8x32xf32>
    %148 = arith.mulf %132, %146 : vector<8x32xf32>
    %149 = arith.addf %147, %148 : vector<8x32xf32>
    %150 = math.tanh %149 : vector<8x32xf32>
    %151 = arith.mulf %144, %150 : vector<8x32xf32>
    %152 = vector.shape_cast %151 : vector<8x32xf32> to vector<2x4x32xf32>
    %153 = arith.truncf %152 : vector<2x4x32xf32> to vector<2x4x32xbf16>
    %c0_160 = arith.constant 0 : index
    %c1_161 = arith.constant 1 : index
    %c0_162 = arith.constant 0 : index
    %154 = vector.load %arg32[%c0_160, %c1_161, %c0_162] : memref<2x6x32xbf16, #tpu.memory_space<vmem>>, vector<2x4x32xbf16>
    tpu.vector_store %arg32[%c0_160, %c1_161, %c0_162], %153 {strides = array<i32>} : memref<2x6x32xbf16, #tpu.memory_space<vmem>>, vector<2x4x32xbf16>,
    %c0_163 = arith.constant 0 : index
    %c0_164 = arith.constant 0 : index
    %c0_165 = arith.constant 0 : index
    %155 = vector.load %arg32[%c0_163, %c0_164, %c0_165] : memref<2x6x32xbf16, #tpu.memory_space<vmem>>, vector<2x4x32xbf16>
    %c0_166 = arith.constant 0 : index
    %c1_167 = arith.constant 1 : index
    %c0_168 = arith.constant 0 : index
    %156 = vector.load %arg32[%c0_166, %c1_167, %c0_168] : memref<2x6x32xbf16, #tpu.memory_space<vmem>>, vector<2x4x32xbf16>
    %c0_169 = arith.constant 0 : index
    %c2_170 = arith.constant 2 : index
    %c0_171 = arith.constant 0 : index
    %157 = vector.load %arg32[%c0_169, %c2_170, %c0_171] : memref<2x6x32xbf16, #tpu.memory_space<vmem>>, vector<2x4x32xbf16>
    %158 = tpu.concatenate %155, %156, %157 in 2 : vector<2x4x32xbf16>, vector<2x4x32xbf16>, vector<2x4x32xbf16> -> vector<2x4x96xbf16>
    %159 = vector.shape_cast %158 : vector<2x4x96xbf16> to vector<8x96xbf16>
    %c0_172 = arith.constant 0 : index
    %c0_173 = arith.constant 0 : index
    %160 = vector.load %arg10[%c0_172, %c0_173] : memref<96x128xbf16, #tpu.memory_space<vmem>>, vector<96x128xbf16>
    %cst_174 = arith.constant dense<0.000000e+00> : vector<8x128xf32>
    %161 = tpu.matmul %159, %160, %cst_174 {dimension_numbers = #tpu.dot_dimension_numbers<[1], [0], [0], [1], [0, 0, 1, 1], [], []>} : vector<8x96xbf16>, vector<96x128xbf16>, vector<8x128xf32> -> vector<8x128xf32>
    %162 = vector.extract_strided_slice %112 {offsets = [8, 0], sizes = [8, 128], strides = [1, 1]} : vector<32x128xf32> to vector<8x128xf32>
    %163 = arith.addf %162, %161 : vector<8x128xf32>
    %164 = vector.extract_strided_slice %163 {offsets = [0, 0], sizes = [8, 32], strides = [1, 1]} : vector<8x128xf32> to vector<8x32xf32>
    %165 = arith.negf %164 : vector<8x32xf32>
    %166 = math.exp %165 : vector<8x32xf32>
    %cst_175 = arith.constant 1.000000e+00 : f32
    %167 = vector.broadcast %cst_175 : f32 to vector<8x32xf32>
    %168 = arith.addf %167, %166 : vector<8x32xf32>
    %169 = arith.divf %167, %168 : vector<8x32xf32>
    %170 = vector.extract_strided_slice %163 {offsets = [0, 32], sizes = [8, 32], strides = [1, 1]} : vector<8x128xf32> to vector<8x32xf32>
    %171 = arith.negf %170 : vector<8x32xf32>
    %172 = math.exp %171 : vector<8x32xf32>
    %cst_176 = arith.constant 1.000000e+00 : f32
    %173 = vector.broadcast %cst_176 : f32 to vector<8x32xf32>
    %174 = arith.addf %173, %172 : vector<8x32xf32>
    %175 = arith.divf %173, %174 : vector<8x32xf32>
    %176 = vector.extract_strided_slice %163 {offsets = [0, 64], sizes = [8, 32], strides = [1, 1]} : vector<8x128xf32> to vector<8x32xf32>
    %177 = arith.negf %176 : vector<8x32xf32>
    %178 = math.exp %177 : vector<8x32xf32>
    %cst_177 = arith.constant 1.000000e+00 : f32
    %179 = vector.broadcast %cst_177 : f32 to vector<8x32xf32>
    %180 = arith.addf %179, %178 : vector<8x32xf32>
    %181 = arith.divf %179, %180 : vector<8x32xf32>
    %182 = vector.extract_strided_slice %163 {offsets = [0, 96], sizes = [8, 32], strides = [1, 1]} : vector<8x128xf32> to vector<8x32xf32>
    %183 = math.tanh %182 : vector<8x32xf32>
    %184 = arith.mulf %175, %149 : vector<8x32xf32>
    %185 = arith.mulf %169, %183 : vector<8x32xf32>
    %186 = arith.addf %184, %185 : vector<8x32xf32>
    %187 = math.tanh %186 : vector<8x32xf32>
    %188 = arith.mulf %181, %187 : vector<8x32xf32>
    %189 = vector.shape_cast %188 : vector<8x32xf32> to vector<2x4x32xf32>
    %190 = arith.truncf %189 : vector<2x4x32xf32> to vector<2x4x32xbf16>
    %c0_178 = arith.constant 0 : index
    %c1_179 = arith.constant 1 : index
    %c0_180 = arith.constant 0 : index
    %191 = vector.load %arg32[%c0_178, %c1_179, %c0_180] : memref<2x6x32xbf16, #tpu.memory_space<vmem>>, vector<2x4x32xbf16>
    tpu.vector_store %arg32[%c0_178, %c1_179, %c0_180], %190 {strides = array<i32>} : memref<2x6x32xbf16, #tpu.memory_space<vmem>>, vector<2x4x32xbf16>,
    %c0_181 = arith.constant 0 : index
    %c0_182 = arith.constant 0 : index
    %c0_183 = arith.constant 0 : index
    %192 = vector.load %arg32[%c0_181, %c0_182, %c0_183] : memref<2x6x32xbf16, #tpu.memory_space<vmem>>, vector<2x4x32xbf16>
    %c0_184 = arith.constant 0 : index
    %c1_185 = arith.constant 1 : index
    %c0_186 = arith.constant 0 : index
    %193 = vector.load %arg32[%c0_184, %c1_185, %c0_186] : memref<2x6x32xbf16, #tpu.memory_space<vmem>>, vector<2x4x32xbf16>
    %c0_187 = arith.constant 0 : index
    %c2_188 = arith.constant 2 : index
    %c0_189 = arith.constant 0 : index
    %194 = vector.load %arg32[%c0_187, %c2_188, %c0_189] : memref<2x6x32xbf16, #tpu.memory_space<vmem>>, vector<2x4x32xbf16>
    %195 = tpu.concatenate %192, %193, %194 in 2 : vector<2x4x32xbf16>, vector<2x4x32xbf16>, vector<2x4x32xbf16> -> vector<2x4x96xbf16>
    %196 = vector.shape_cast %195 : vector<2x4x96xbf16> to vector<8x96xbf16>
    %c0_190 = arith.constant 0 : index
    %c0_191 = arith.constant 0 : index
    %197 = vector.load %arg10[%c0_190, %c0_191] : memref<96x128xbf16, #tpu.memory_space<vmem>>, vector<96x128xbf16>
    %cst_192 = arith.constant dense<0.000000e+00> : vector<8x128xf32>
    %198 = tpu.matmul %196, %197, %cst_192 {dimension_numbers = #tpu.dot_dimension_numbers<[1], [0], [0], [1], [0, 0, 1, 1], [], []>} : vector<8x96xbf16>, vector<96x128xbf16>, vector<8x128xf32> -> vector<8x128xf32>
    %199 = vector.extract_strided_slice %112 {offsets = [16, 0], sizes = [8, 128], strides = [1, 1]} : vector<32x128xf32> to vector<8x128xf32>
    %200 = arith.addf %199, %198 : vector<8x128xf32>
    %201 = vector.extract_strided_slice %200 {offsets = [0, 0], sizes = [8, 32], strides = [1, 1]} : vector<8x128xf32> to vector<8x32xf32>
    %202 = arith.negf %201 : vector<8x32xf32>
    %203 = math.exp %202 : vector<8x32xf32>
    %cst_193 = arith.constant 1.000000e+00 : f32
    %204 = vector.broadcast %cst_193 : f32 to vector<8x32xf32>
    %205 = arith.addf %204, %203 : vector<8x32xf32>
    %206 = arith.divf %204, %205 : vector<8x32xf32>
    %207 = vector.extract_strided_slice %200 {offsets = [0, 32], sizes = [8, 32], strides = [1, 1]} : vector<8x128xf32> to vector<8x32xf32>
    %208 = arith.negf %207 : vector<8x32xf32>
    %209 = math.exp %208 : vector<8x32xf32>
    %cst_194 = arith.constant 1.000000e+00 : f32
    %210 = vector.broadcast %cst_194 : f32 to vector<8x32xf32>
    %211 = arith.addf %210, %209 : vector<8x32xf32>
    %212 = arith.divf %210, %211 : vector<8x32xf32>
    %213 = vector.extract_strided_slice %200 {offsets = [0, 64], sizes = [8, 32], strides = [1, 1]} : vector<8x128xf32> to vector<8x32xf32>
    %214 = arith.negf %213 : vector<8x32xf32>
    %215 = math.exp %214 : vector<8x32xf32>
    %cst_195 = arith.constant 1.000000e+00 : f32
    %216 = vector.broadcast %cst_195 : f32 to vector<8x32xf32>
    %217 = arith.addf %216, %215 : vector<8x32xf32>
    %218 = arith.divf %216, %217 : vector<8x32xf32>
    %219 = vector.extract_strided_slice %200 {offsets = [0, 96], sizes = [8, 32], strides = [1, 1]} : vector<8x128xf32> to vector<8x32xf32>
    %220 = math.tanh %219 : vector<8x32xf32>
    %221 = arith.mulf %212, %186 : vector<8x32xf32>
    %222 = arith.mulf %206, %220 : vector<8x32xf32>
    %223 = arith.addf %221, %222 : vector<8x32xf32>
    %224 = math.tanh %223 : vector<8x32xf32>
    %225 = arith.mulf %218, %224 : vector<8x32xf32>
    %226 = vector.shape_cast %225 : vector<8x32xf32> to vector<2x4x32xf32>
    %227 = arith.truncf %226 : vector<2x4x32xf32> to vector<2x4x32xbf16>
    %c0_196 = arith.constant 0 : index
    %c1_197 = arith.constant 1 : index
    %c0_198 = arith.constant 0 : index
    %228 = vector.load %arg32[%c0_196, %c1_197, %c0_198] : memref<2x6x32xbf16, #tpu.memory_space<vmem>>, vector<2x4x32xbf16>
    tpu.vector_store %arg32[%c0_196, %c1_197, %c0_198], %227 {strides = array<i32>} : memref<2x6x32xbf16, #tpu.memory_space<vmem>>, vector<2x4x32xbf16>,
    %c0_199 = arith.constant 0 : index
    %c0_200 = arith.constant 0 : index
    %c0_201 = arith.constant 0 : index
    %229 = vector.load %arg32[%c0_199, %c0_200, %c0_201] : memref<2x6x32xbf16, #tpu.memory_space<vmem>>, vector<2x4x32xbf16>
    %c0_202 = arith.constant 0 : index
    %c1_203 = arith.constant 1 : index
    %c0_204 = arith.constant 0 : index
    %230 = vector.load %arg32[%c0_202, %c1_203, %c0_204] : memref<2x6x32xbf16, #tpu.memory_space<vmem>>, vector<2x4x32xbf16>
    %c0_205 = arith.constant 0 : index
    %c2_206 = arith.constant 2 : index
    %c0_207 = arith.constant 0 : index
    %231 = vector.load %arg32[%c0_205, %c2_206, %c0_207] : memref<2x6x32xbf16, #tpu.memory_space<vmem>>, vector<2x4x32xbf16>
    %232 = tpu.concatenate %229, %230, %231 in 2 : vector<2x4x32xbf16>, vector<2x4x32xbf16>, vector<2x4x32xbf16> -> vector<2x4x96xbf16>
    %233 = vector.shape_cast %232 : vector<2x4x96xbf16> to vector<8x96xbf16>
    %c0_208 = arith.constant 0 : index
    %c0_209 = arith.constant 0 : index
    %234 = vector.load %arg10[%c0_208, %c0_209] : memref<96x128xbf16, #tpu.memory_space<vmem>>, vector<96x128xbf16>
    %cst_210 = arith.constant dense<0.000000e+00> : vector<8x128xf32>
    %235 = tpu.matmul %233, %234, %cst_210 {dimension_numbers = #tpu.dot_dimension_numbers<[1], [0], [0], [1], [0, 0, 1, 1], [], []>} : vector<8x96xbf16>, vector<96x128xbf16>, vector<8x128xf32> -> vector<8x128xf32>
    %236 = vector.extract_strided_slice %112 {offsets = [24, 0], sizes = [8, 128], strides = [1, 1]} : vector<32x128xf32> to vector<8x128xf32>
    %237 = arith.addf %236, %235 : vector<8x128xf32>
    %238 = vector.extract_strided_slice %237 {offsets = [0, 0], sizes = [8, 32], strides = [1, 1]} : vector<8x128xf32> to vector<8x32xf32>
    %239 = arith.negf %238 : vector<8x32xf32>
    %240 = math.exp %239 : vector<8x32xf32>
    %cst_211 = arith.constant 1.000000e+00 : f32
    %241 = vector.broadcast %cst_211 : f32 to vector<8x32xf32>
    %242 = arith.addf %241, %240 : vector<8x32xf32>
    %243 = arith.divf %241, %242 : vector<8x32xf32>
    %244 = vector.extract_strided_slice %237 {offsets = [0, 32], sizes = [8, 32], strides = [1, 1]} : vector<8x128xf32> to vector<8x32xf32>
    %245 = arith.negf %244 : vector<8x32xf32>
    %246 = math.exp %245 : vector<8x32xf32>
    %cst_212 = arith.constant 1.000000e+00 : f32
    %247 = vector.broadcast %cst_212 : f32 to vector<8x32xf32>
    %248 = arith.addf %247, %246 : vector<8x32xf32>
    %249 = arith.divf %247, %248 : vector<8x32xf32>
    %250 = vector.extract_strided_slice %237 {offsets = [0, 64], sizes = [8, 32], strides = [1, 1]} : vector<8x128xf32> to vector<8x32xf32>
    %251 = arith.negf %250 : vector<8x32xf32>
    %252 = math.exp %251 : vector<8x32xf32>
    %cst_213 = arith.constant 1.000000e+00 : f32
    %253 = vector.broadcast %cst_213 : f32 to vector<8x32xf32>
    %254 = arith.addf %253, %252 : vector<8x32xf32>
    %255 = arith.divf %253, %254 : vector<8x32xf32>
    %256 = vector.extract_strided_slice %237 {offsets = [0, 96], sizes = [8, 32], strides = [1, 1]} : vector<8x128xf32> to vector<8x32xf32>
    %257 = math.tanh %256 : vector<8x32xf32>
    %258 = arith.mulf %249, %223 : vector<8x32xf32>
    %259 = arith.mulf %243, %257 : vector<8x32xf32>
    %260 = arith.addf %258, %259 : vector<8x32xf32>
    %261 = math.tanh %260 : vector<8x32xf32>
    %262 = arith.mulf %255, %261 : vector<8x32xf32>
    %263 = vector.shape_cast %262 : vector<8x32xf32> to vector<2x4x32xf32>
    %264 = arith.truncf %263 : vector<2x4x32xf32> to vector<2x4x32xbf16>
    %c0_214 = arith.constant 0 : index
    %c1_215 = arith.constant 1 : index
    %c0_216 = arith.constant 0 : index
    %265 = vector.load %arg32[%c0_214, %c1_215, %c0_216] : memref<2x6x32xbf16, #tpu.memory_space<vmem>>, vector<2x4x32xbf16>
    tpu.vector_store %arg32[%c0_214, %c1_215, %c0_216], %264 {strides = array<i32>} : memref<2x6x32xbf16, #tpu.memory_space<vmem>>, vector<2x4x32xbf16>,
    %266 = arith.truncf %262 : vector<8x32xf32> to vector<8x32xbf16>
    %c0_217 = arith.constant 0 : index
    %c0_218 = arith.constant 0 : index
    %267 = vector.load %arg22[%c0_217, %c0_218] : memref<16x8xbf16, #tpu.memory_space<vmem>>, vector<16x8xbf16>
    %cst_219 = arith.constant dense<0.000000e+00> : vector<16x32xf32>
    %268 = tpu.matmul %267, %266, %cst_219 {dimension_numbers = #tpu.dot_dimension_numbers<[1], [0], [0], [1], [0, 0, 1, 1], [], []>} : vector<16x8xbf16>, vector<8x32xbf16>, vector<16x32xf32> -> vector<16x32xf32>
    %269 = arith.truncf %268 : vector<16x32xf32> to vector<16x32xbf16>
    %c0_220 = arith.constant 0 : index
    %c0_221 = arith.constant 0 : index
    %270 = vector.load %arg23[%c0_220, %c0_221] : memref<32x64xbf16, #tpu.memory_space<vmem>>, vector<32x64xbf16>
    %cst_222 = arith.constant dense<0.000000e+00> : vector<16x64xf32>
    %271 = tpu.matmul %269, %270, %cst_222 {dimension_numbers = #tpu.dot_dimension_numbers<[1], [0], [0], [1], [0, 0, 1, 1], [], []>} : vector<16x32xbf16>, vector<32x64xbf16>, vector<16x64xf32> -> vector<16x64xf32>
    %272 = vector.shape_cast %271 : vector<16x64xf32> to vector<2x8x64xf32>
    %273 = arith.truncf %272 : vector<2x8x64xf32> to vector<2x8x64xbf16>
    %c0_223 = arith.constant 0 : index
    %c1_224 = arith.constant 1 : index
    %c0_225 = arith.constant 0 : index
    %274 = vector.load %arg35[%c0_223, %c1_224, %c0_225] : memref<2x10x64xbf16, #tpu.memory_space<vmem>>, vector<2x8x64xbf16>
    tpu.vector_store %arg35[%c0_223, %c1_224, %c0_225], %273 {strides = array<i32>} : memref<2x10x64xbf16, #tpu.memory_space<vmem>>, vector<2x8x64xbf16>,
    %c0_226 = arith.constant 0 : index
    %c0_227 = arith.constant 0 : index
    %c0_228 = arith.constant 0 : index
    %275 = vector.load %arg35[%c0_226, %c0_227, %c0_228] : memref<2x10x64xbf16, #tpu.memory_space<vmem>>, vector<2x8x64xbf16>
    %c0_229 = arith.constant 0 : index
    %c1_230 = arith.constant 1 : index
    %c0_231 = arith.constant 0 : index
    %276 = vector.load %arg35[%c0_229, %c1_230, %c0_231] : memref<2x10x64xbf16, #tpu.memory_space<vmem>>, vector<2x8x64xbf16>
    %c0_232 = arith.constant 0 : index
    %c2_233 = arith.constant 2 : index
    %c0_234 = arith.constant 0 : index
    %277 = vector.load %arg35[%c0_232, %c2_233, %c0_234] : memref<2x10x64xbf16, #tpu.memory_space<vmem>>, vector<2x8x64xbf16>
    %278 = tpu.concatenate %275, %276, %277 in 2 : vector<2x8x64xbf16>, vector<2x8x64xbf16>, vector<2x8x64xbf16> -> vector<2x8x192xbf16>
    %279 = vector.shape_cast %278 : vector<2x8x192xbf16> to vector<16x192xbf16>
    %c0_235 = arith.constant 0 : index
    %c0_236 = arith.constant 0 : index
    %c0_237 = arith.constant 0 : index
    %280 = vector.load %arg34[%c0_235, %c0_236, %c0_237] : memref<2x10x64xbf16, #tpu.memory_space<vmem>>, vector<2x8x64xbf16>
    %c0_238 = arith.constant 0 : index
    %c1_239 = arith.constant 1 : index
    %c0_240 = arith.constant 0 : index
    %281 = vector.load %arg34[%c0_238, %c1_239, %c0_240] : memref<2x10x64xbf16, #tpu.memory_space<vmem>>, vector<2x8x64xbf16>
    %c0_241 = arith.constant 0 : index
    %c2_242 = arith.constant 2 : index
    %c0_243 = arith.constant 0 : index
    %282 = vector.load %arg34[%c0_241, %c2_242, %c0_243] : memref<2x10x64xbf16, #tpu.memory_space<vmem>>, vector<2x8x64xbf16>
    %283 = tpu.concatenate %280, %281, %282 in 2 : vector<2x8x64xbf16>, vector<2x8x64xbf16>, vector<2x8x64xbf16> -> vector<2x8x192xbf16>
    %284 = vector.shape_cast %283 : vector<2x8x192xbf16> to vector<16x192xbf16>
    %285 = tpu.concatenate %279, %284 in 1 : vector<16x192xbf16>, vector<16x192xbf16> -> vector<16x384xbf16>
    %c0_244 = arith.constant 0 : index
    %c0_245 = arith.constant 0 : index
    %286 = vector.load %arg12[%c0_244, %c0_245] : memref<384x64xbf16, #tpu.memory_space<vmem>>, vector<384x64xbf16>
    %cst_246 = arith.constant dense<0.000000e+00> : vector<16x64xf32>
    %287 = tpu.matmul %285, %286, %cst_246 {dimension_numbers = #tpu.dot_dimension_numbers<[1], [0], [0], [1], [0, 0, 1, 1], [], []>} : vector<16x384xbf16>, vector<384x64xbf16>, vector<16x64xf32> -> vector<16x64xf32>
    %c0_247 = arith.constant 0 : index
    %c0_248 = arith.constant 0 : index
    %288 = vector.load %arg13[%c0_247, %c0_248] : memref<1x64xf32, #tpu.memory_space<vmem>>, vector<1x64xf32>
    %289 = vector.broadcast %288 : vector<1x64xf32> to vector<16x64xf32>
    %290 = arith.addf %287, %289 : vector<16x64xf32>
    %cst_249 = arith.constant 0.000000e+00 : f32
    %291 = vector.broadcast %cst_249 : f32 to vector<16x64xf32>
    %292 = arith.maximumf %290, %291 : vector<16x64xf32>
    %293 = arith.truncf %292 : vector<16x64xf32> to vector<16x64xbf16>
    %c0_250 = arith.constant 0 : index
    %c0_251 = arith.constant 0 : index
    %294 = vector.load %arg24[%c0_250, %c0_251] : memref<32x16xbf16, #tpu.memory_space<vmem>>, vector<32x16xbf16>
    %cst_252 = arith.constant dense<0.000000e+00> : vector<32x64xf32>
    %295 = tpu.matmul %294, %293, %cst_252 {dimension_numbers = #tpu.dot_dimension_numbers<[1], [0], [0], [1], [0, 0, 1, 1], [], []>} : vector<32x16xbf16>, vector<16x64xbf16>, vector<32x64xf32> -> vector<32x64xf32>
    %296 = arith.truncf %295 : vector<32x64xf32> to vector<32x64xbf16>
    %c0_253 = arith.constant 0 : index
    %c0_254 = arith.constant 0 : index
    %297 = vector.load %arg25[%c0_253, %c0_254] : memref<64x128xbf16, #tpu.memory_space<vmem>>, vector<64x128xbf16>
    %cst_255 = arith.constant dense<0.000000e+00> : vector<32x128xf32>
    %298 = tpu.matmul %296, %297, %cst_255 {dimension_numbers = #tpu.dot_dimension_numbers<[1], [0], [0], [1], [0, 0, 1, 1], [], []>} : vector<32x64xbf16>, vector<64x128xbf16>, vector<32x128xf32> -> vector<32x128xf32>
    %299 = vector.shape_cast %298 : vector<32x128xf32> to vector<2x16x128xf32>
    %300 = arith.truncf %299 : vector<2x16x128xf32> to vector<2x16x128xbf16>
    %c0_256 = arith.constant 0 : index
    %c1_257 = arith.constant 1 : index
    %c0_258 = arith.constant 0 : index
    %301 = vector.load %arg36[%c0_256, %c1_257, %c0_258] : memref<2x18x128xbf16, #tpu.memory_space<vmem>>, vector<2x16x128xbf16>
    tpu.vector_store %arg36[%c0_256, %c1_257, %c0_258], %300 {strides = array<i32>} : memref<2x18x128xbf16, #tpu.memory_space<vmem>>, vector<2x16x128xbf16>,
    %c0_259 = arith.constant 0 : index
    %c0_260 = arith.constant 0 : index
    %c0_261 = arith.constant 0 : index
    %302 = vector.load %arg36[%c0_259, %c0_260, %c0_261] : memref<2x18x128xbf16, #tpu.memory_space<vmem>>, vector<2x16x128xbf16>
    %c0_262 = arith.constant 0 : index
    %c1_263 = arith.constant 1 : index
    %c0_264 = arith.constant 0 : index
    %303 = vector.load %arg36[%c0_262, %c1_263, %c0_264] : memref<2x18x128xbf16, #tpu.memory_space<vmem>>, vector<2x16x128xbf16>
    %c0_265 = arith.constant 0 : index
    %c2_266 = arith.constant 2 : index
    %c0_267 = arith.constant 0 : index
    %304 = vector.load %arg36[%c0_265, %c2_266, %c0_267] : memref<2x18x128xbf16, #tpu.memory_space<vmem>>, vector<2x16x128xbf16>
    %305 = tpu.concatenate %302, %303, %304 in 2 : vector<2x16x128xbf16>, vector<2x16x128xbf16>, vector<2x16x128xbf16> -> vector<2x16x384xbf16>
    %306 = vector.shape_cast %305 : vector<2x16x384xbf16> to vector<32x384xbf16>
    %c0_268 = arith.constant 0 : index
    %c0_269 = arith.constant 0 : index
    %c0_270 = arith.constant 0 : index
    %307 = vector.load %arg33[%c0_268, %c0_269, %c0_270] : memref<2x18x128xbf16, #tpu.memory_space<vmem>>, vector<2x16x128xbf16>
    %c0_271 = arith.constant 0 : index
    %c1_272 = arith.constant 1 : index
    %c0_273 = arith.constant 0 : index
    %308 = vector.load %arg33[%c0_271, %c1_272, %c0_273] : memref<2x18x128xbf16, #tpu.memory_space<vmem>>, vector<2x16x128xbf16>
    %c0_274 = arith.constant 0 : index
    %c2_275 = arith.constant 2 : index
    %c0_276 = arith.constant 0 : index
    %309 = vector.load %arg33[%c0_274, %c2_275, %c0_276] : memref<2x18x128xbf16, #tpu.memory_space<vmem>>, vector<2x16x128xbf16>
    %310 = tpu.concatenate %307, %308, %309 in 2 : vector<2x16x128xbf16>, vector<2x16x128xbf16>, vector<2x16x128xbf16> -> vector<2x16x384xbf16>
    %311 = vector.shape_cast %310 : vector<2x16x384xbf16> to vector<32x384xbf16>
    %312 = tpu.concatenate %306, %311 in 1 : vector<32x384xbf16>, vector<32x384xbf16> -> vector<32x768xbf16>
    %c0_277 = arith.constant 0 : index
    %c0_278 = arith.constant 0 : index
    %313 = vector.load %arg14[%c0_277, %c0_278] : memref<768x128xbf16, #tpu.memory_space<vmem>>, vector<768x128xbf16>
    %cst_279 = arith.constant dense<0.000000e+00> : vector<32x128xf32>
    %314 = tpu.matmul %312, %313, %cst_279 {dimension_numbers = #tpu.dot_dimension_numbers<[1], [0], [0], [1], [0, 0, 1, 1], [], []>} : vector<32x768xbf16>, vector<768x128xbf16>, vector<32x128xf32> -> vector<32x128xf32>
    %c0_280 = arith.constant 0 : index
    %c0_281 = arith.constant 0 : index
    %315 = vector.load %arg15[%c0_280, %c0_281] : memref<1x128xf32, #tpu.memory_space<vmem>>, vector<1x128xf32>
    %316 = vector.broadcast %315 : vector<1x128xf32> to vector<32x128xf32>
    %317 = arith.addf %314, %316 : vector<32x128xf32>
    %cst_282 = arith.constant 0.000000e+00 : f32
    %318 = vector.broadcast %cst_282 : f32 to vector<32x128xf32>
    %319 = arith.maximumf %317, %318 : vector<32x128xf32>
    %320 = vector.shape_cast %319 : vector<32x128xf32> to vector<2x16x128xf32>
    %321 = arith.truncf %320 : vector<2x16x128xf32> to vector<2x16x128xbf16>
    %c0_283 = arith.constant 0 : index
    %c1_284 = arith.constant 1 : index
    %c0_285 = arith.constant 0 : index
    %322 = vector.load %arg37[%c0_283, %c1_284, %c0_285] : memref<2x18x128xbf16, #tpu.memory_space<vmem>>, vector<2x16x128xbf16>
    tpu.vector_store %arg37[%c0_283, %c1_284, %c0_285], %321 {strides = array<i32>} : memref<2x18x128xbf16, #tpu.memory_space<vmem>>, vector<2x16x128xbf16>,
    %c0_286 = arith.constant 0 : index
    %c0_287 = arith.constant 0 : index
    %c0_288 = arith.constant 0 : index
    %323 = vector.load %arg37[%c0_286, %c0_287, %c0_288] : memref<2x18x128xbf16, #tpu.memory_space<vmem>>, vector<2x16x128xbf16>
    %c0_289 = arith.constant 0 : index
    %c1_290 = arith.constant 1 : index
    %c0_291 = arith.constant 0 : index
    %324 = vector.load %arg37[%c0_289, %c1_290, %c0_291] : memref<2x18x128xbf16, #tpu.memory_space<vmem>>, vector<2x16x128xbf16>
    %c0_292 = arith.constant 0 : index
    %c2_293 = arith.constant 2 : index
    %c0_294 = arith.constant 0 : index
    %325 = vector.load %arg37[%c0_292, %c2_293, %c0_294] : memref<2x18x128xbf16, #tpu.memory_space<vmem>>, vector<2x16x128xbf16>
    %326 = tpu.concatenate %323, %324, %325 in 2 : vector<2x16x128xbf16>, vector<2x16x128xbf16>, vector<2x16x128xbf16> -> vector<2x16x384xbf16>
    %327 = vector.shape_cast %326 : vector<2x16x384xbf16> to vector<32x384xbf16>
    %c0_295 = arith.constant 0 : index
    %c0_296 = arith.constant 0 : index
    %328 = vector.load %arg16[%c0_295, %c0_296] : memref<384x32xbf16, #tpu.memory_space<vmem>>, vector<384x32xbf16>
    %cst_297 = arith.constant dense<0.000000e+00> : vector<32x32xf32>
    %329 = tpu.matmul %327, %328, %cst_297 {dimension_numbers = #tpu.dot_dimension_numbers<[1], [0], [0], [1], [0, 0, 1, 1], [], []>} : vector<32x384xbf16>, vector<384x32xbf16>, vector<32x32xf32> -> vector<32x32xf32>
    %c0_298 = arith.constant 0 : index
    %c0_299 = arith.constant 0 : index
    %330 = vector.load %arg17[%c0_298, %c0_299] : memref<1x32xf32, #tpu.memory_space<vmem>>, vector<1x32xf32>
    %331 = vector.broadcast %330 : vector<1x32xf32> to vector<32x32xf32>
    %332 = arith.addf %329, %331 : vector<32x32xf32>
    %c0_300 = arith.constant 0 : index
    %c0_301 = arith.constant 0 : index
    %333 = vector.load %arg26[%c0_300, %c0_301] : memref<32x32xf32, #tpu.memory_space<vmem>>, vector<32x32xf32>
    tpu.vector_store %arg26[%c0_300, %c0_301], %332 {strides = array<i32>} : memref<32x32xf32, #tpu.memory_space<vmem>>, vector<32x32xf32>,
    %c0_302 = arith.constant 0 : index
    %c0_303 = arith.constant 0 : index
    %334 = vector.load %arg27[%c0_302, %c0_303] : memref<8x32xf32, #tpu.memory_space<vmem>>, vector<8x32xf32>
    tpu.vector_store %arg27[%c0_302, %c0_303], %262 {strides = array<i32>} : memref<8x32xf32, #tpu.memory_space<vmem>>, vector<8x32xf32>,
    %c0_304 = arith.constant 0 : index
    %c0_305 = arith.constant 0 : index
    %335 = vector.load %arg28[%c0_304, %c0_305] : memref<8x32xf32, #tpu.memory_space<vmem>>, vector<8x32xf32>
    tpu.vector_store %arg28[%c0_304, %c0_305], %260 {strides = array<i32>} : memref<8x32xf32, #tpu.memory_space<vmem>>, vector<8x32xf32>,
    return
  }
}

</mosaic_0001>

<bundles_post_ra>
// kernel: tc_forward_sequence.1
= control target key start
LH: loop header
LB: loop body
LE: loop exit
PB: predicated region body
PF: predicated region fallthrough
CT: control target
= control target key end

     0   :  { %s9886_s0 = inlined_call_operand.hbm [shape: bf16[8,18,48], index: 0, kind: input, shape index: {}]   ;;  %s9887_s1 = inlined_call_operand.hbm [shape: f32[8,32], index: 1, kind: input, shape index: {}]   ;;  %s9888_s2 = inlined_call_operand.hbm [shape: f32[8,32], index: 2, kind: input, shape index: {}]   ;;  %s9889_s3 = inlined_call_operand.hbm [shape: bf16[144,128], index: 3, kind: input, shape index: {}]   ;;  %s9890_s4 = inlined_call_operand.hbm [shape: f32[1,128], index: 4, kind: input, shape index: {}]   ;;  %s9891_s5 = inlined_call_operand.hbm [shape: bf16[192,64], index: 5, kind: input, shape index: {}]   ;;  %s9892_s6 = inlined_call_operand.hbm [shape: f32[1,64], index: 6, kind: input, shape index: {}]   ;;  %s9893_s7 = inlined_call_operand.hbm [shape: bf16[96,32], index: 7, kind: input, shape index: {}]   ;;  %s9894_s8 = inlined_call_operand.hbm [shape: f32[1,32], index: 8, kind: input, shape index: {}]   ;;  %s9895_s9 = inlined_call_operand.hbm [shape: bf16[96,128], index: 9, kind: input, shape index: {}]   ;;  %s9896_s10 = inlined_call_operand.hbm [shape: bf16[96,128], index: 10, kind: input, shape index: {}]   ;;  %s9897_s11 = inlined_call_operand.hbm [shape: f32[1,128], index: 11, kind: input, shape index: {}]   ;;  %s9898_s12 = inlined_call_operand.hbm [shape: bf16[384,64], index: 12, kind: input, shape index: {}]   ;;  %s9899_s13 = inlined_call_operand.hbm [shape: f32[1,64], index: 13, kind: input, shape index: {}]   ;;  %s9900_s14 = inlined_call_operand.hbm [shape: bf16[768,128], index: 14, kind: input, shape index: {}]   ;;  %s9901_s15 = inlined_call_operand.hbm [shape: f32[1,128], index: 15, kind: input, shape index: {}]   ;;  %s9902_s16 = inlined_call_operand.hbm [shape: bf16[384,32], index: 16, kind: input, shape index: {}]   ;;  %s9903_s17 = inlined_call_operand.hbm [shape: f32[1,32], index: 17, kind: input, shape index: {}]   ;;  %s9904_s18 = inlined_call_operand.hbm [shape: bf16[2,64,128], index: 18, kind: input, shape index: {}]   ;;  %s9905_s19 = inlined_call_operand.hbm [shape: bf16[2,128,64], index: 19, kind: input, shape index: {}]   ;;  %s9906_s20 = inlined_call_operand.hbm [shape: bf16[2,32,64], index: 20, kind: input, shape index: {}]   ;;  %s9907_s21 = inlined_call_operand.hbm [shape: bf16[2,64,32], index: 21, kind: input, shape index: {}]   ;;  %s9908_s22 = inlined_call_operand.hbm [shape: bf16[16,8], index: 22, kind: input, shape index: {}]   ;;  %s9909_s23 = inlined_call_operand.hbm [shape: bf16[32,64], index: 23, kind: input, shape index: {}]   ;;  %s9910_s24 = inlined_call_operand.hbm [shape: bf16[32,16], index: 24, kind: input, shape index: {}]   ;;  %s9911_s25 = inlined_call_operand.hbm [shape: bf16[64,128], index: 25, kind: input, shape index: {}]   ;;  %s9912_s26 = inlined_call_operand.hbm [shape: f32[32,32], index: 26, kind: output, shape index: {0}]   ;;  %s9913_s27 = inlined_call_operand.hbm [shape: f32[8,32], index: 27, kind: output, shape index: {1}]   ;;  %s9914_s28 = inlined_call_operand.hbm [shape: f32[8,32], index: 28, kind: output, shape index: {2}]  }
   0x1   :  { %9931 = sst [smem:[#allocation72_spill]] %s9886_s0 }
   0x2   :  { %9932 = sst [smem:[#allocation73_spill]] %s9887_s1 }
   0x3   :  { %9933 = sst [smem:[#allocation74_spill]] %s9888_s2 }
   0x4   :  { %9934 = sst [smem:[#allocation75_spill]] %s9889_s3 }
   0x5   :  { %9935 = sst [smem:[#allocation76_spill]] %s9890_s4 }
   0x6   :  { %9936 = sst [smem:[#allocation77_spill]] %s9891_s5 }
   0x7   :  { %9937 = sst [smem:[#allocation78_spill]] %s9892_s6 }
   0x8   :  { %9938 = sst [smem:[#allocation79_spill]] %s9893_s7 }
   0x9   :  { %9939 = sst [smem:[#allocation80_spill]] %s9894_s8 }
   0xa   :  { %9940 = sst [smem:[#allocation81_spill]] %s9895_s9 }
   0xb   :  { %9941 = sst [smem:[#allocation82_spill]] %s9896_s10 }
   0xc   :  { %9942 = sst [smem:[#allocation83_spill]] %s9897_s11 }
   0xd   :  { %9943 = sst [smem:[#allocation84_spill]] %s9898_s12 }
   0xe   :  { %9944 = sst [smem:[#allocation85_spill]] %s9912_s26 }
   0xf   :  { %9945 = sst [smem:[#allocation86_spill]] %s9913_s27 }
  0x10   :  { %9946 = sst [smem:[#allocation87_spill]] %s9914_s28 }
  0x11   :  { %34 = vsyncpa [#allocation12], 0 }
  0x12   :  { %35 = vsyncpa [#allocation15], 0 }
  0x13   :  { %36 = vsyncpa [#allocation18], 0 }
  0x14   :  { %37 = vsyncpa [#allocation21], 0 }
  0x15   :  { %38 = vsyncpa [#allocation24], 0 }
  0x16   :  { %39 = vsyncpa [#allocation27], 0 }
  0x17   :  { %40 = vsyncpa [#allocation30], 0 }
  0x18   :  { %41 = vsyncpa [#allocation33], 0 }
  0x19   :  { %42 = vsyncpa [#allocation36], 0 }
  0x1a   :  { %43 = vsyncpa [#allocation39], 0 }
  0x1b   :  { %44 = vsyncpa [#allocation42], 0 }
  0x1c   :  { %45 = vsyncpa [#allocation45], 0 }
  0x1d   :  { %46 = vsyncpa [#allocation48], 0 }
  0x1e   :  { %47 = vsyncpa [#allocation51], 0 }
  0x1f   :  { %48 = vsyncpa [#allocation13], 0 }
  0x20   :  { %49 = vsyncpa [#allocation54], 0  ;;  %s8484_s8 = smov [#allocation14]   ;;  %s9947_s3 = sld [smem:[#allocation73_spill]] }
  0x21   :  { %s68_s5 = sshll.u32 %s8484_s8, 4  ;;  %s69_s5 = int_to_ptr.vmem [resolvable:$true] %s68_s5 }
  0x26   :  { %s7814_s6 = scalar_lea.hbm %s9947_s3, 128 }
  0x27   :  { %p7815_p0 = scmp.ne.s32.totalorder %s9947_s3, %s7814_s6  ;;  %p7818_p1 = scmp.lt.u32.totalorder %s7814_s6, %s9947_s3 }
  0x29   :  { %p7820_p2 = pnand %p7818_p1, %p7815_p0 }
  0x2b   :  { %7823 = shalt.err (!%p7820_p2)
}
  0x2c   :  { %s7824_s2 = scalar_lea.vmem %s69_s5, 128  ;;  %p7829_p4 = scmp.lt.s32.totalorder %s69_s5, %s69_s5 }
  0x2d   :  { %p7825_p3 = scmp.ne.s32.totalorder %s69_s5, %s7824_s2  ;;  %p7830_p5 = scmp.lt.s32.totalorder %s7824_s2, %s7824_s2 }
  0x2f   :  { %p7831_p6 = por %p7830_p5, %p7829_p4 }
  0x31   :  { %p7832_p7 = pnand %p7831_p6, %p7825_p3 }
  0x33   :  { %7835 = shalt.err (!%p7832_p7)
}
  0x34   :  { %71 = dma.hbm_to_vmem [thread:$0]  %s9947_s3, 128, %s69_s5, [#allocation15]  }
  0x35   :  { %s8485_s1 = smov [#allocation17]   ;;  %s8486_s8 = smov [#allocation20]  }
  0x36   :  { %s87_s4 = sshll.u32 %s8485_s1, 4  ;;  %s109_s9 = sshll.u32 %s8486_s8, 4  ;;  %s88_s4 = int_to_ptr.vmem [resolvable:$true] %s87_s4  ;;  %s110_s9 = int_to_ptr.vmem [resolvable:$true] %s109_s9 }
  0x37   :  { %s9948_s10 = sld [smem:[#allocation75_spill]] }
  0x3d   :  { %s7836_s0 = scalar_lea.hbm %s9948_s10, 1152 }
  0x3e   :  { %p7837_p8 = scmp.ne.s32.totalorder %s9948_s10, %s7836_s0  ;;  %p7840_p9 = scmp.lt.u32.totalorder %s7836_s0, %s9948_s10 }
  0x40   :  { %p7842_p10 = pnand %p7840_p9, %p7837_p8 }
  0x42   :  { %7845 = shalt.err (!%p7842_p10)
}
  0x43   :  { %s7846_s5 = scalar_lea.vmem %s88_s4, 1152  ;;  %p7851_p12 = scmp.lt.s32.totalorder %s88_s4, %s88_s4 }
  0x44   :  { %p7847_p11 = scmp.ne.s32.totalorder %s88_s4, %s7846_s5  ;;  %p7852_p13 = scmp.lt.s32.totalorder %s7846_s5, %s7846_s5 }
  0x46   :  { %p7853_p0 = por %p7852_p13, %p7851_p12 }
  0x48   :  { %p7854_p1 = pnand %p7853_p0, %p7847_p11 }
  0x4a   :  { %7857 = shalt.err (!%p7854_p1)
}
  0x4b   :  { %s8487_s3 = smov 64   ;;  %s8488_s7 = smov 4  }
  0x4c   :  { %93 = dma.hbm_to_vmem [thread:$0]  %s9948_s10, 1152, %s88_s4, [#allocation18], %s8487_s3, %s8487_s3, %s8488_s7  }
  0x4d   :  { %s9949_s30 = sld [smem:[#allocation77_spill]] }
  0x53   :  { %s7858_s6 = scalar_lea.hbm %s9949_s30, 1536 }
  0x54   :  { %p7859_p2 = scmp.ne.s32.totalorder %s9949_s30, %s7858_s6  ;;  %p7862_p3 = scmp.lt.u32.totalorder %s7858_s6, %s9949_s30 }
  0x56   :  { %p7864_p4 = pnand %p7862_p3, %p7859_p2 }
  0x58   :  { %7867 = shalt.err (!%p7864_p4)
}
  0x59   :  { %s7868_s5 = scalar_lea.vmem %s110_s9, 1536  ;;  %p7873_p6 = scmp.lt.s32.totalorder %s110_s9, %s110_s9 }
  0x5a   :  { %p7869_p5 = scmp.ne.s32.totalorder %s110_s9, %s7868_s5  ;;  %p7874_p7 = scmp.lt.s32.totalorder %s7868_s5, %s7868_s5 }
  0x5c   :  { %p7875_p8 = por %p7874_p7, %p7873_p6 }
  0x5e   :  { %p7876_p9 = pnand %p7875_p8, %p7869_p5 }
  0x60   :  { %7879 = shalt.err (!%p7876_p9)
}
  0x61   :  { %115 = dma.hbm_to_vmem [thread:$0]  %s9949_s30, 1536, %s110_s9, [#allocation21], %s8487_s3, %s8487_s3, %s8488_s7  }
  0x62   :  { %s8489_s12 = smov [#allocation23]   ;;  %s8490_s26 = smov [#allocation26]  }
  0x63   :  { %s131_s1 = sshll.u32 %s8489_s12, 4  ;;  %s153_s8 = sshll.u32 %s8490_s26, 4  ;;  %s132_s1 = int_to_ptr.vmem [resolvable:$true] %s131_s1  ;;  %s154_s8 = int_to_ptr.vmem [resolvable:$true] %s153_s8 }
  0x64   :  { %s9950_s11 = sld [smem:[#allocation79_spill]] }
  0x6a   :  { %s7880_s29 = scalar_lea.hbm %s9950_s11, 768 }
  0x6b   :  { %p7881_p10 = scmp.ne.s32.totalorder %s9950_s11, %s7880_s29  ;;  %p7884_p11 = scmp.lt.u32.totalorder %s7880_s29, %s9950_s11 }
  0x6d   :  { %p7886_p12 = pnand %p7884_p11, %p7881_p10 }
  0x6f   :  { %7889 = shalt.err (!%p7886_p12)
}
  0x70   :  { %s7890_s9 = scalar_lea.vmem %s132_s1, 768  ;;  %p7895_p0 = scmp.lt.s32.totalorder %s132_s1, %s132_s1 }
  0x71   :  { %p7891_p13 = scmp.ne.s32.totalorder %s132_s1, %s7890_s9  ;;  %p7896_p1 = scmp.lt.s32.totalorder %s7890_s9, %s7890_s9 }
  0x73   :  { %p7897_p2 = por %p7896_p1, %p7895_p0 }
  0x75   :  { %p7898_p3 = pnand %p7897_p2, %p7891_p13 }
  0x77   :  { %7901 = shalt.err (!%p7898_p3)
}
  0x78   :  { %137 = dma.hbm_to_vmem [thread:$0]  %s9950_s11, 768, %s132_s1, [#allocation24], %s8487_s3, %s8487_s3, %s8488_s7  }
  0x79   :  { %s9951_s28 = sld [smem:[#allocation81_spill]] }
  0x7f   :  { %s7902_s12 = scalar_lea.hbm %s9951_s28, 768 }
  0x80   :  { %p7903_p4 = scmp.ne.s32.totalorder %s9951_s28, %s7902_s12  ;;  %p7906_p5 = scmp.lt.u32.totalorder %s7902_s12, %s9951_s28 }
  0x82   :  { %p7908_p6 = pnand %p7906_p5, %p7903_p4 }
  0x84   :  { %7911 = shalt.err (!%p7908_p6)
}
  0x85   :  { %s7912_s2 = scalar_lea.vmem %s154_s8, 768  ;;  %p7917_p8 = scmp.lt.s32.totalorder %s154_s8, %s154_s8 }
  0x86   :  { %p7913_p7 = scmp.ne.s32.totalorder %s154_s8, %s7912_s2  ;;  %p7918_p9 = scmp.lt.s32.totalorder %s7912_s2, %s7912_s2 }
  0x88   :  { %p7919_p10 = por %p7918_p9, %p7917_p8 }
  0x8a   :  { %p7920_p11 = pnand %p7919_p10, %p7913_p7 }
  0x8c   :  { %7923 = shalt.err (!%p7920_p11)
}
  0x8d   :  { %159 = dma.hbm_to_vmem [thread:$0]  %s9951_s28, 768, %s154_s8, [#allocation27], %s8487_s3, %s8487_s3, %s8488_s7  }
  0x8e   :  { %s8491_s5 = smov [#allocation29]   ;;  %s8492_s30 = smov [#allocation32]  }
  0x8f   :  { %s178_s9 = sshll.u32 %s8491_s5, 4  ;;  %s200_s4 = sshll.u32 %s8492_s30, 4  ;;  %s179_s9 = int_to_ptr.vmem [resolvable:$true] %s178_s9  ;;  %s201_s4 = int_to_ptr.vmem [resolvable:$true] %s200_s4 }
  0x90   :  { %s9952_s12 = sld [smem:[#allocation83_spill]] }
  0x96   :  { %s7924_s26 = scalar_lea.hbm %s9952_s12, 16 }
  0x97   :  { %p7925_p12 = scmp.ne.s32.totalorder %s9952_s12, %s7924_s26  ;;  %p7928_p13 = scmp.lt.u32.totalorder %s7924_s26, %s9952_s12 }
  0x99   :  { %p7930_p0 = pnand %p7928_p13, %p7925_p12 }
  0x9b   :  { %7933 = shalt.err (!%p7930_p0)
}
  0x9c   :  { %s7934_s8 = scalar_lea.vmem %s179_s9, 16  ;;  %s7938_s28 = scalar_lea.vmem %s179_s9, 32 }
  0x9d   :  { %p7935_p1 = scmp.ne.s32.totalorder %s179_s9, %s7934_s8  ;;  %p7939_p2 = scmp.lt.s32.totalorder %s179_s9, %s179_s9 }
  0x9e   :  { %p7940_p3 = scmp.lt.s32.totalorder %s7938_s28, %s7934_s8 }
  0xa0   :  { %p7941_p4 = por %p7940_p3, %p7939_p2 }
  0xa2   :  { %p7942_p5 = pnand %p7941_p4, %p7935_p1 }
  0xa4   :  { %7945 = shalt.err (!%p7942_p5)
}
  0xa5   :  { %181 = dma.hbm_to_vmem [thread:$0]  %s9952_s12, 16, %s179_s9, [#allocation30]  }
  0xa6   :  { %s7946_s10 = scalar_lea.hbm %s9899_s13, 16 }
  0xa7   :  { %p7947_p6 = scmp.ne.s32.totalorder %s9899_s13, %s7946_s10  ;;  %p7950_p7 = scmp.lt.u32.totalorder %s7946_s10, %s9899_s13 }
  0xa9   :  { %p7952_p8 = pnand %p7950_p7, %p7947_p6 }
  0xab   :  { %7955 = shalt.err (!%p7952_p8)
}
  0xac   :  { %s7956_s29 = scalar_lea.vmem %s201_s4, 16  ;;  %s7960_s2 = scalar_lea.vmem %s201_s4, 32 }
  0xad   :  { %p7957_p9 = scmp.ne.s32.totalorder %s201_s4, %s7956_s29  ;;  %p7961_p10 = scmp.lt.s32.totalorder %s201_s4, %s201_s4 }
  0xae   :  { %p7962_p11 = scmp.lt.s32.totalorder %s7960_s2, %s7956_s29 }
  0xb0   :  { %p7963_p12 = por %p7962_p11, %p7961_p10 }
  0xb2   :  { %p7964_p13 = pnand %p7963_p12, %p7957_p9 }
  0xb4   :  { %7967 = shalt.err (!%p7964_p13)
}
  0xb5   :  { %203 = dma.hbm_to_vmem [thread:$0]  %s9899_s13, 16, %s201_s4, [#allocation33]  }
  0xb6   :  { %s8493_s8 = smov [#allocation35]   ;;  %s8494_s1 = smov [#allocation38]  }
  0xb7   :  { %s222_s28 = sshll.u32 %s8493_s8, 4  ;;  %s244_s11 = sshll.u32 %s8494_s1, 4  ;;  %s223_s28 = int_to_ptr.vmem [resolvable:$true] %s222_s28  ;;  %s245_s11 = int_to_ptr.vmem [resolvable:$true] %s244_s11 }
  0xb8   :  { %s7968_s10 = scalar_lea.hbm %s9901_s15, 16 }
  0xb9   :  { %p7969_p0 = scmp.ne.s32.totalorder %s9901_s15, %s7968_s10  ;;  %p7972_p1 = scmp.lt.u32.totalorder %s7968_s10, %s9901_s15 }
  0xbb   :  { %p7974_p2 = pnand %p7972_p1, %p7969_p0 }
  0xbd   :  { %7977 = shalt.err (!%p7974_p2)
}
  0xbe   :  { %s7978_s13 = scalar_lea.vmem %s223_s28, 16  ;;  %s7982_s4 = scalar_lea.vmem %s223_s28, 32 }
  0xbf   :  { %p7979_p3 = scmp.ne.s32.totalorder %s223_s28, %s7978_s13  ;;  %p7983_p4 = scmp.lt.s32.totalorder %s223_s28, %s223_s28 }
  0xc0   :  { %p7984_p5 = scmp.lt.s32.totalorder %s7982_s4, %s7978_s13 }
  0xc2   :  { %p7985_p6 = por %p7984_p5, %p7983_p4 }
  0xc4   :  { %p7986_p7 = pnand %p7985_p6, %p7979_p3 }
  0xc6   :  { %7989 = shalt.err (!%p7986_p7)
}
  0xc7   :  { %225 = dma.hbm_to_vmem [thread:$0]  %s9901_s15, 16, %s223_s28, [#allocation36]  }
  0xc8   :  { %s7990_s8 = scalar_lea.hbm %s9903_s17, 16 }
  0xc9   :  { %p7991_p8 = scmp.ne.s32.totalorder %s9903_s17, %s7990_s8  ;;  %p7994_p9 = scmp.lt.u32.totalorder %s7990_s8, %s9903_s17 }
  0xcb   :  { %p7996_p10 = pnand %p7994_p9, %p7991_p8 }
  0xcd   :  { %7999 = shalt.err (!%p7996_p10)
}
  0xce   :  { %s8000_s27 = scalar_lea.vmem %s245_s11, 16  ;;  %s8004_s26 = scalar_lea.vmem %s245_s11, 32 }
  0xcf   :  { %p8001_p11 = scmp.ne.s32.totalorder %s245_s11, %s8000_s27  ;;  %p8005_p12 = scmp.lt.s32.totalorder %s245_s11, %s245_s11 }
  0xd0   :  { %p8006_p13 = scmp.lt.s32.totalorder %s8004_s26, %s8000_s27 }
  0xd2   :  { %p8007_p0 = por %p8006_p13, %p8005_p12 }
  0xd4   :  { %p8008_p1 = pnand %p8007_p0, %p8001_p11 }
  0xd6   :  { %8011 = shalt.err (!%p8008_p1)
}
  0xd7   :  { %247 = dma.hbm_to_vmem [thread:$0]  %s9903_s17, 16, %s245_s11, [#allocation39]  }
  0xd8   :  { %s8495_s6 = smov [#allocation41]   ;;  %s8496_s13 = smov [#allocation44]  }
  0xd9   :  { %s265_s0 = sshll.u32 %s8495_s6, 4  ;;  %s289_s4 = sshll.u32 %s8496_s13, 4  ;;  %s266_s0 = int_to_ptr.vmem [resolvable:$true] %s265_s0  ;;  %s290_s4 = int_to_ptr.vmem [resolvable:$true] %s289_s4 }
  0xda   :  { %s8012_s9 = scalar_lea.hbm %s9905_s19, 2048 }
  0xdb   :  { %p8013_p2 = scmp.ne.s32.totalorder %s9905_s19, %s8012_s9  ;;  %p8016_p3 = scmp.lt.u32.totalorder %s8012_s9, %s9905_s19 }
  0xdd   :  { %p8018_p4 = pnand %p8016_p3, %p8013_p2 }
  0xdf   :  { %8021 = shalt.err (!%p8018_p4)
}
  0xe0   :  { %s8022_s17 = scalar_lea.vmem %s266_s0, 2048  ;;  %p8027_p6 = scmp.lt.s32.totalorder %s266_s0, %s266_s0 }
  0xe1   :  { %p8023_p5 = scmp.ne.s32.totalorder %s266_s0, %s8022_s17  ;;  %p8028_p7 = scmp.lt.s32.totalorder %s8022_s17, %s8022_s17 }
  0xe3   :  { %p8029_p8 = por %p8028_p7, %p8027_p6 }
  0xe5   :  { %p8030_p9 = pnand %p8029_p8, %p8023_p5 }
  0xe7   :  { %8033 = shalt.err (!%p8030_p9)
}
  0xe8   :  { %271 = dma.hbm_to_vmem [thread:$0]  %s9905_s19, 2048, %s266_s0, [#allocation42], %s8487_s3, %s8487_s3, %s8488_s7  }
  0xe9   :  { %s8034_s26 = scalar_lea.hbm %s9907_s21, 1024 }
  0xea   :  { %p8035_p10 = scmp.ne.s32.totalorder %s9907_s21, %s8034_s26  ;;  %p8038_p11 = scmp.lt.u32.totalorder %s8034_s26, %s9907_s21 }
  0xec   :  { %p8040_p12 = pnand %p8038_p11, %p8035_p10 }
  0xee   :  { %8043 = shalt.err (!%p8040_p12)
}
  0xef   :  { %s8044_s29 = scalar_lea.vmem %s290_s4, 1024  ;;  %p8049_p0 = scmp.lt.s32.totalorder %s290_s4, %s290_s4 }
  0xf0   :  { %p8045_p13 = scmp.ne.s32.totalorder %s290_s4, %s8044_s29  ;;  %p8050_p1 = scmp.lt.s32.totalorder %s8044_s29, %s8044_s29 }
  0xf2   :  { %p8051_p2 = por %p8050_p1, %p8049_p0 }
  0xf4   :  { %p8052_p3 = pnand %p8051_p2, %p8045_p13 }
  0xf6   :  { %8055 = shalt.err (!%p8052_p3)
}
  0xf7   :  { %295 = dma.hbm_to_vmem [thread:$0]  %s9907_s21, 1024, %s290_s4, [#allocation45], %s8487_s3, %s8487_s3, %s8488_s7  }
  0xf8   :  { %s8497_s2 = smov [#allocation47]   ;;  %s8498_s12 = smov [#allocation11]  }
  0xf9   :  { %s313_s9 = sshll.u32 %s8497_s2, 4  ;;  %s55_s8 = sshll.u32 %s8498_s12, 4  ;;  %s314_s9 = int_to_ptr.vmem [resolvable:$true] %s313_s9  ;;  %s56_s8 = int_to_ptr.vmem [resolvable:$true] %s55_s8 }
  0xfa   :  { %s8056_s17 = scalar_lea.hbm %s9909_s23, 256 }
  0xfb   :  { %p8057_p4 = scmp.ne.s32.totalorder %s9909_s23, %s8056_s17  ;;  %p8060_p5 = scmp.lt.u32.totalorder %s8056_s17, %s9909_s23 }
  0xfd   :  { %p8062_p6 = pnand %p8060_p5, %p8057_p4 }
  0xff   :  { %8065 = shalt.err (!%p8062_p6)
}
 0x100   :  { %s8066_s21 = scalar_lea.vmem %s314_s9, 256  ;;  %p8071_p8 = scmp.lt.s32.totalorder %s314_s9, %s314_s9 }
 0x101   :  { %p8067_p7 = scmp.ne.s32.totalorder %s314_s9, %s8066_s21  ;;  %p8072_p9 = scmp.lt.s32.totalorder %s8066_s21, %s8066_s21 }
 0x103   :  { %p8073_p10 = por %p8072_p9, %p8071_p8 }
 0x105   :  { %p8074_p11 = pnand %p8073_p10, %p8067_p7 }
 0x107   :  { %8077 = shalt.err (!%p8074_p11)
}
 0x108   :  { %319 = dma.hbm_to_vmem [thread:$0]  %s9909_s23, 256, %s314_s9, [#allocation48], %s8487_s3, %s8487_s3, %s8488_s7  }
 0x109   :  { %s9953_s6 = sld [smem:[#allocation72_spill]] }
 0x10f   :  { %s8078_s13 = scalar_lea.hbm %s9953_s6, 1536 }
 0x110   :  { %p8079_p12 = scmp.ne.s32.totalorder %s9953_s6, %s8078_s13  ;;  %p8082_p13 = scmp.lt.u32.totalorder %s8078_s13, %s9953_s6 }
 0x112   :  { %p8084_p0 = pnand %p8082_p13, %p8079_p12 }
 0x114   :  { %8087 = shalt.err (!%p8084_p0)
}
 0x115   :  { %s8088_s12 = scalar_lea.vmem %s56_s8, 1536  ;;  %p8093_p2 = scmp.lt.s32.totalorder %s56_s8, %s56_s8 }
 0x116   :  { %p8089_p1 = scmp.ne.s32.totalorder %s56_s8, %s8088_s12  ;;  %p8094_p3 = scmp.lt.s32.totalorder %s8088_s12, %s8088_s12 }
 0x118   :  { %p8095_p4 = por %p8094_p3, %p8093_p2 }
 0x11a   :  { %p8096_p5 = pnand %p8095_p4, %p8089_p1 }
 0x11c   :  { %8099 = shalt.err (!%p8096_p5)
}
 0x11d   :  { %61 = dma.hbm_to_vmem [thread:$0]  %s9953_s6, 1536, %s56_s8, [#allocation12], %s8487_s3, %s8487_s3, %s8488_s7  }
 0x11e   :  { %s8499_s1 = smov [#allocation16]   ;;  %s8500_s17 = smov [#allocation19]  }
 0x11f   :  { %s78_s5 = sshll.u32 %s8499_s1, 4  ;;  %s100_s11 = sshll.u32 %s8500_s17, 4  ;;  %s79_s5 = int_to_ptr.vmem [resolvable:$true] %s78_s5  ;;  %s101_s11 = int_to_ptr.vmem [resolvable:$true] %s100_s11 }
 0x120   :  { %s9954_s27 = sld [smem:[#allocation74_spill]] }
 0x126   :  { %s8100_s21 = scalar_lea.hbm %s9954_s27, 128 }
 0x127   :  { %p8101_p6 = scmp.ne.s32.totalorder %s9954_s27, %s8100_s21  ;;  %p8104_p7 = scmp.lt.u32.totalorder %s8100_s21, %s9954_s27 }
 0x129   :  { %p8106_p8 = pnand %p8104_p7, %p8101_p6 }
 0x12b   :  { %8109 = shalt.err (!%p8106_p8)
}
 0x12c   :  { %s8110_s8 = scalar_lea.vmem %s79_s5, 128  ;;  %p8115_p10 = scmp.lt.s32.totalorder %s79_s5, %s79_s5 }
 0x12d   :  { %p8111_p9 = scmp.ne.s32.totalorder %s79_s5, %s8110_s8  ;;  %p8116_p11 = scmp.lt.s32.totalorder %s8110_s8, %s8110_s8 }
 0x12f   :  { %p8117_p12 = por %p8116_p11, %p8115_p10 }
 0x131   :  { %p8118_p13 = pnand %p8117_p12, %p8111_p9 }
 0x133   :  { %8121 = shalt.err (!%p8118_p13)
}
 0x134   :  { %81 = dma.hbm_to_vmem [thread:$0]  %s9954_s27, 128, %s79_s5, [#allocation15]  }
 0x135   :  { %s9955_s0 = sld [smem:[#allocation76_spill]] }
 0x13b   :  { %s8122_s2 = scalar_lea.hbm %s9955_s0, 16 }
 0x13c   :  { %p8123_p0 = scmp.ne.s32.totalorder %s9955_s0, %s8122_s2  ;;  %p8126_p1 = scmp.lt.u32.totalorder %s8122_s2, %s9955_s0 }
 0x13e   :  { %p8128_p2 = pnand %p8126_p1, %p8123_p0 }
 0x140   :  { %8131 = shalt.err (!%p8128_p2)
}
 0x141   :  { %s8132_s17 = scalar_lea.vmem %s101_s11, 16  ;;  %s8136_s30 = scalar_lea.vmem %s101_s11, 32 }
 0x142   :  { %p8133_p3 = scmp.ne.s32.totalorder %s101_s11, %s8132_s17  ;;  %p8137_p4 = scmp.lt.s32.totalorder %s101_s11, %s101_s11 }
 0x143   :  { %p8138_p5 = scmp.lt.s32.totalorder %s8136_s30, %s8132_s17 }
 0x145   :  { %p8139_p6 = por %p8138_p5, %p8137_p4 }
 0x147   :  { %p8140_p7 = pnand %p8139_p6, %p8133_p3 }
 0x149   :  { %8143 = shalt.err (!%p8140_p7)
}
 0x14a   :  { %103 = dma.hbm_to_vmem [thread:$0]  %s9955_s0, 16, %s101_s11, [#allocation18]  }
 0x14b   :  { %s8501_s27 = smov [#allocation22]   ;;  %s8502_s4 = smov [#allocation25]  }
 0x14c   :  { %s122_s21 = sshll.u32 %s8501_s27, 4  ;;  %s144_s26 = sshll.u32 %s8502_s4, 4  ;;  %s123_s21 = int_to_ptr.vmem [resolvable:$true] %s122_s21  ;;  %s145_s26 = int_to_ptr.vmem [resolvable:$true] %s144_s26 }
 0x14d   :  { %s9956_s8 = sld [smem:[#allocation78_spill]] }
 0x153   :  { %s8144_s6 = scalar_lea.hbm %s9956_s8, 16 }
 0x154   :  { %p8145_p8 = scmp.ne.s32.totalorder %s9956_s8, %s8144_s6  ;;  %p8148_p9 = scmp.lt.u32.totalorder %s8144_s6, %s9956_s8 }
 0x156   :  { %p8150_p10 = pnand %p8148_p9, %p8145_p8 }
 0x158   :  { %8153 = shalt.err (!%p8150_p10)
}
 0x159   :  { %s8154_s11 = scalar_lea.vmem %s123_s21, 16  ;;  %s8158_s0 = scalar_lea.vmem %s123_s21, 32 }
 0x15a   :  { %p8155_p11 = scmp.ne.s32.totalorder %s123_s21, %s8154_s11  ;;  %p8159_p12 = scmp.lt.s32.totalorder %s123_s21, %s123_s21 }
 0x15b   :  { %p8160_p13 = scmp.lt.s32.totalorder %s8158_s0, %s8154_s11 }
 0x15d   :  { %p8161_p0 = por %p8160_p13, %p8159_p12 }
 0x15f   :  { %p8162_p1 = pnand %p8161_p0, %p8155_p11 }
 0x161   :  { %8165 = shalt.err (!%p8162_p1)
}
 0x162   :  { %125 = dma.hbm_to_vmem [thread:$0]  %s9956_s8, 16, %s123_s21, [#allocation21]  }
 0x163   :  { %s9957_s17 = sld [smem:[#allocation80_spill]] }
 0x169   :  { %s8166_s30 = scalar_lea.hbm %s9957_s17, 16 }
 0x16a   :  { %p8167_p2 = scmp.ne.s32.totalorder %s9957_s17, %s8166_s30  ;;  %p8170_p3 = scmp.lt.u32.totalorder %s8166_s30, %s9957_s17 }
 0x16c   :  { %p8172_p4 = pnand %p8170_p3, %p8167_p2 }
 0x16e   :  { %8175 = shalt.err (!%p8172_p4)
}
 0x16f   :  { %s8176_s15 = scalar_lea.vmem %s145_s26, 16  ;;  %s8180_s28 = scalar_lea.vmem %s145_s26, 32 }
 0x170   :  { %p8177_p5 = scmp.ne.s32.totalorder %s145_s26, %s8176_s15  ;;  %p8181_p6 = scmp.lt.s32.totalorder %s145_s26, %s145_s26 }
 0x171   :  { %p8182_p7 = scmp.lt.s32.totalorder %s8180_s28, %s8176_s15 }
 0x173   :  { %p8183_p8 = por %p8182_p7, %p8181_p6 }
 0x175   :  { %p8184_p9 = pnand %p8183_p8, %p8177_p5 }
 0x177   :  { %8187 = shalt.err (!%p8184_p9)
}
 0x178   :  { %147 = dma.hbm_to_vmem [thread:$0]  %s9957_s17, 16, %s145_s26, [#allocation24]  }
 0x179   :  { %s8503_s6 = smov [#allocation28]   ;;  %s8504_s29 = smov [#allocation31]  }
 0x17a   :  { %s165_s13 = sshll.u32 %s8503_s6, 4  ;;  %s187_s19 = sshll.u32 %s8504_s29, 4  ;;  %s166_s13 = int_to_ptr.vmem [resolvable:$true] %s165_s13  ;;  %s188_s19 = int_to_ptr.vmem [resolvable:$true] %s187_s19 }
 0x17b   :  { %s9958_s0 = sld [smem:[#allocation82_spill]] }
 0x181   :  { %s8188_s12 = scalar_lea.hbm %s9958_s0, 768 }
 0x182   :  { %p8189_p10 = scmp.ne.s32.totalorder %s9958_s0, %s8188_s12  ;;  %p8192_p11 = scmp.lt.u32.totalorder %s8188_s12, %s9958_s0 }
 0x184   :  { %p8194_p12 = pnand %p8192_p11, %p8189_p10 }
 0x186   :  { %8197 = shalt.err (!%p8194_p12)
}
 0x187   :  { %s8198_s26 = scalar_lea.vmem %s166_s13, 768  ;;  %p8203_p0 = scmp.lt.s32.totalorder %s166_s13, %s166_s13 }
 0x188   :  { %p8199_p13 = scmp.ne.s32.totalorder %s166_s13, %s8198_s26  ;;  %p8204_p1 = scmp.lt.s32.totalorder %s8198_s26, %s8198_s26 }
 0x18a   :  { %p8205_p2 = por %p8204_p1, %p8203_p0 }
 0x18c   :  { %p8206_p3 = pnand %p8205_p2, %p8199_p13 }
 0x18e   :  { %8209 = shalt.err (!%p8206_p3)
}
 0x18f   :  { %171 = dma.hbm_to_vmem [thread:$0]  %s9958_s0, 768, %s166_s13, [#allocation27], %s8487_s3, %s8487_s3, %s8488_s7  }
 0x190   :  { %s9959_s4 = sld [smem:[#allocation84_spill]] }
 0x196   :  { %s8210_s15 = scalar_lea.hbm %s9959_s4, 3072 }
 0x197   :  { %p8211_p4 = scmp.ne.s32.totalorder %s9959_s4, %s8210_s15  ;;  %p8214_p5 = scmp.lt.u32.totalorder %s8210_s15, %s9959_s4 }
 0x199   :  { %p8216_p6 = pnand %p8214_p5, %p8211_p4 }
 0x19b   :  { %8219 = shalt.err (!%p8216_p6)
}
 0x19c   :  { %s8220_s29 = scalar_lea.vmem %s188_s19, 3072  ;;  %p8225_p8 = scmp.lt.s32.totalorder %s188_s19, %s188_s19 }
 0x19d   :  { %p8221_p7 = scmp.ne.s32.totalorder %s188_s19, %s8220_s29  ;;  %p8226_p9 = scmp.lt.s32.totalorder %s8220_s29, %s8220_s29 }
 0x19f   :  { %p8227_p10 = por %p8226_p9, %p8225_p8 }
 0x1a1   :  { %p8228_p11 = pnand %p8227_p10, %p8221_p7 }
 0x1a3   :  { %8231 = shalt.err (!%p8228_p11)
}
 0x1a4   :  { %193 = dma.hbm_to_vmem [thread:$0]  %s9959_s4, 3072, %s188_s19, [#allocation30], %s8487_s3, %s8487_s3, %s8488_s7  }
 0x1a5   :  { %s8505_s11 = smov [#allocation34]   ;;  %s8506_s12 = smov [#allocation37]  }
 0x1a6   :  { %s209_s0 = sshll.u32 %s8505_s11, 4  ;;  %s231_s23 = sshll.u32 %s8506_s12, 4  ;;  %s210_s0 = int_to_ptr.vmem [resolvable:$true] %s209_s0  ;;  %s232_s23 = int_to_ptr.vmem [resolvable:$true] %s231_s23 }
 0x1a7   :  { %s8232_s30 = scalar_lea.hbm %s9900_s14, 6144 }
 0x1a8   :  { %p8233_p12 = scmp.ne.s32.totalorder %s9900_s14, %s8232_s30  ;;  %p8236_p13 = scmp.lt.u32.totalorder %s8232_s30, %s9900_s14 }
 0x1aa   :  { %p8238_p0 = pnand %p8236_p13, %p8233_p12 }
 0x1ac   :  { %8241 = shalt.err (!%p8238_p0)
}
 0x1ad   :  { %s8242_s19 = scalar_lea.vmem %s210_s0, 6144  ;;  %p8247_p2 = scmp.lt.s32.totalorder %s210_s0, %s210_s0 }
 0x1ae   :  { %p8243_p1 = scmp.ne.s32.totalorder %s210_s0, %s8242_s19  ;;  %p8248_p3 = scmp.lt.s32.totalorder %s8242_s19, %s8242_s19 }
 0x1b0   :  { %p8249_p4 = por %p8248_p3, %p8247_p2 }
 0x1b2   :  { %p8250_p5 = pnand %p8249_p4, %p8243_p1 }
 0x1b4   :  { %8253 = shalt.err (!%p8250_p5)
}
 0x1b5   :  { %215 = dma.hbm_to_vmem [thread:$0]  %s9900_s14, 6144, %s210_s0, [#allocation33], %s8487_s3, %s8487_s3, %s8488_s7  }
 0x1b6   :  { %s8254_s21 = scalar_lea.hbm %s9902_s16, 3072 }
 0x1b7   :  { %p8255_p6 = scmp.ne.s32.totalorder %s9902_s16, %s8254_s21  ;;  %p8258_p7 = scmp.lt.u32.totalorder %s8254_s21, %s9902_s16 }
 0x1b9   :  { %p8260_p8 = pnand %p8258_p7, %p8255_p6 }
 0x1bb   :  { %8263 = shalt.err (!%p8260_p8)
}
 0x1bc   :  { %s8264_s2 = scalar_lea.vmem %s232_s23, 3072  ;;  %p8269_p10 = scmp.lt.s32.totalorder %s232_s23, %s232_s23 }
 0x1bd   :  { %p8265_p9 = scmp.ne.s32.totalorder %s232_s23, %s8264_s2  ;;  %p8270_p11 = scmp.lt.s32.totalorder %s8264_s2, %s8264_s2 }
 0x1bf   :  { %p8271_p12 = por %p8270_p11, %p8269_p10 }
 0x1c1   :  { %p8272_p13 = pnand %p8271_p12, %p8265_p9 }
 0x1c3   :  { %8275 = shalt.err (!%p8272_p13)
}
 0x1c4   :  { %237 = dma.hbm_to_vmem [thread:$0]  %s9902_s16, 3072, %s232_s23, [#allocation36], %s8487_s3, %s8487_s3, %s8488_s7  }
 0x1c5   :  { %s8507_s0 = smov [#allocation40]   ;;  %s8508_s9 = smov [#allocation43]  }
 0x1c6   :  { %s253_s12 = sshll.u32 %s8507_s0, 4  ;;  %s277_s1 = sshll.u32 %s8508_s9, 4  ;;  %s254_s12 = int_to_ptr.vmem [resolvable:$true] %s253_s12  ;;  %s278_s1 = int_to_ptr.vmem [resolvable:$true] %s277_s1 }
 0x1c7   :  { %s8276_s17 = scalar_lea.hbm %s9904_s18, 1024 }
 0x1c8   :  { %p8277_p0 = scmp.ne.s32.totalorder %s9904_s18, %s8276_s17  ;;  %p8280_p1 = scmp.lt.u32.totalorder %s8276_s17, %s9904_s18 }
 0x1ca   :  { %p8282_p2 = pnand %p8280_p1, %p8277_p0 }
 0x1cc   :  { %8285 = shalt.err (!%p8282_p2)
}
 0x1cd   :  { %s8286_s16 = scalar_lea.vmem %s254_s12, 1024  ;;  %p8291_p4 = scmp.lt.s32.totalorder %s254_s12, %s254_s12 }
 0x1ce   :  { %p8287_p3 = scmp.ne.s32.totalorder %s254_s12, %s8286_s16  ;;  %p8292_p5 = scmp.lt.s32.totalorder %s8286_s16, %s8286_s16 }
 0x1d0   :  { %p8293_p6 = por %p8292_p5, %p8291_p4 }
 0x1d2   :  { %p8294_p7 = pnand %p8293_p6, %p8287_p3 }
 0x1d4   :  { %8297 = shalt.err (!%p8294_p7)
}
 0x1d5   :  { %259 = dma.hbm_to_vmem [thread:$0]  %s9904_s18, 1024, %s254_s12, [#allocation39], %s8487_s3, %s8487_s3, %s8488_s7  }
 0x1d6   :  { %s8298_s21 = scalar_lea.hbm %s9906_s20, 512 }
 0x1d7   :  { %p8299_p8 = scmp.ne.s32.totalorder %s9906_s20, %s8298_s21  ;;  %p8302_p9 = scmp.lt.u32.totalorder %s8298_s21, %s9906_s20 }
 0x1d9   :  { %p8304_p10 = pnand %p8302_p9, %p8299_p8 }
 0x1db   :  { %8307 = shalt.err (!%p8304_p10)
}
 0x1dc   :  { %s8308_s2 = scalar_lea.vmem %s278_s1, 512  ;;  %p8313_p12 = scmp.lt.s32.totalorder %s278_s1, %s278_s1 }
 0x1dd   :  { %p8309_p11 = scmp.ne.s32.totalorder %s278_s1, %s8308_s2  ;;  %p8314_p13 = scmp.lt.s32.totalorder %s8308_s2, %s8308_s2 }
 0x1df   :  { %p8315_p0 = por %p8314_p13, %p8313_p12 }
 0x1e1   :  { %p8316_p1 = pnand %p8315_p0, %p8309_p11 }
 0x1e3   :  { %8319 = shalt.err (!%p8316_p1)
}
 0x1e4   :  { %283 = dma.hbm_to_vmem [thread:$0]  %s9906_s20, 512, %s278_s1, [#allocation42], %s8487_s3, %s8487_s3, %s8488_s7  }
 0x1e5   :  { %s8509_s11 = smov [#allocation46]   ;;  %s8510_s12 = smov [#allocation49]  }
 0x1e6   :  { %s301_s0 = sshll.u32 %s8509_s11, 4  ;;  %s325_s9 = sshll.u32 %s8510_s12, 4  ;;  %s302_s0 = int_to_ptr.vmem [resolvable:$true] %s301_s0  ;;  %s326_s9 = int_to_ptr.vmem [resolvable:$true] %s325_s9 }
 0x1e7   :  { %s8320_s17 = scalar_lea.hbm %s9908_s22, 128 }
 0x1e8   :  { %p8321_p2 = scmp.ne.s32.totalorder %s9908_s22, %s8320_s17  ;;  %p8324_p3 = scmp.lt.u32.totalorder %s8320_s17, %s9908_s22 }
 0x1ea   :  { %p8326_p4 = pnand %p8324_p3, %p8321_p2 }
 0x1ec   :  { %8329 = shalt.err (!%p8326_p4)
}
 0x1ed   :  { %s8330_s20 = scalar_lea.vmem %s302_s0, 128  ;;  %p8335_p6 = scmp.lt.s32.totalorder %s302_s0, %s302_s0 }
 0x1ee   :  { %p8331_p5 = scmp.ne.s32.totalorder %s302_s0, %s8330_s20  ;;  %p8336_p7 = scmp.lt.s32.totalorder %s8330_s20, %s8330_s20 }
 0x1f0   :  { %p8337_p8 = por %p8336_p7, %p8335_p6 }
 0x1f2   :  { %p8338_p9 = pnand %p8337_p8, %p8331_p5 }
 0x1f4   :  { %8341 = shalt.err (!%p8338_p9)
}
 0x1f5   :  { %307 = dma.hbm_to_vmem [thread:$0]  %s9908_s22, 128, %s302_s0, [#allocation45], %s8487_s3, %s8487_s3, %s8488_s7  }
 0x1f6   :  { %s8342_s15 = scalar_lea.hbm %s9910_s24, 256 }
 0x1f7   :  { %p8343_p10 = scmp.ne.s32.totalorder %s9910_s24, %s8342_s15  ;;  %p8346_p11 = scmp.lt.u32.totalorder %s8342_s15, %s9910_s24 }
 0x1f9   :  { %p8348_p12 = pnand %p8346_p11, %p8343_p10 }
 0x1fb   :  { %8351 = shalt.err (!%p8348_p12)
}
 0x1fc   :  { %s8352_s29 = scalar_lea.vmem %s326_s9, 256  ;;  %p8357_p0 = scmp.lt.s32.totalorder %s326_s9, %s326_s9 }
 0x1fd   :  { %p8353_p13 = scmp.ne.s32.totalorder %s326_s9, %s8352_s29  ;;  %p8358_p1 = scmp.lt.s32.totalorder %s8352_s29, %s8352_s29 }
 0x1ff   :  { %p8359_p2 = por %p8358_p1, %p8357_p0 }
 0x201   :  { %p8360_p3 = pnand %p8359_p2, %p8353_p13 }
 0x203   :  { %8363 = shalt.err (!%p8360_p3)
}
 0x204   :  { %331 = dma.hbm_to_vmem [thread:$0]  %s9910_s24, 256, %s326_s9, [#allocation48], %s8487_s3, %s8487_s3, %s8488_s7  }
 0x205   :  { %s8511_s2 = smov [#allocation50]   ;;  %s8364_s0 = scalar_lea.hbm %s9911_s25, 512 }
 0x206   :  { %s337_s18 = sshll.u32 %s8511_s2, 4  ;;  %p8365_p4 = scmp.ne.s32.totalorder %s9911_s25, %s8364_s0  ;;  %s338_s18 = int_to_ptr.vmem [resolvable:$true] %s337_s18 }
 0x207   :  { %p8368_p5 = scmp.lt.u32.totalorder %s8364_s0, %s9911_s25 }
 0x209   :  { %p8370_p6 = pnand %p8368_p5, %p8365_p4 }
 0x20b   :  { %8373 = shalt.err (!%p8370_p6)
}
 0x20c   :  { %s8374_s5 = scalar_lea.vmem %s338_s18, 512  ;;  %p8379_p8 = scmp.lt.s32.totalorder %s338_s18, %s338_s18 }
 0x20d   :  { %p8375_p7 = scmp.ne.s32.totalorder %s338_s18, %s8374_s5  ;;  %p8380_p9 = scmp.lt.s32.totalorder %s8374_s5, %s8374_s5 }
 0x20f   :  { %p8381_p10 = por %p8380_p9, %p8379_p8 }
 0x211   :  { %p8382_p11 = pnand %p8381_p10, %p8375_p7 }
 0x213   :  { %8385 = shalt.err (!%p8382_p11)
}
 0x214   :  { %343 = dma.hbm_to_vmem [thread:$0]  %s9911_s25, 512, %s338_s18, [#allocation51], %s8487_s3, %s8487_s3, %s8488_s7  }
 0x215   :  { %8452 = dma.done.wait [#allocation12], 1536  }
 0x216   :  { %8453 = vsyncadd [#allocation12], 4294965760 }
 0x217   :  { %8454 = dma.done.wait [#allocation15], 256  }
 0x218   :  { %8455 = vsyncadd [#allocation15], 4294967040 }
 0x219   :  { %8456 = dma.done.wait [#allocation18], 1168  }
 0x21a   :  { %8457 = vsyncadd [#allocation18], 4294966128 }
 0x21b   :  { %8458 = dma.done.wait [#allocation21], 1552  }
 0x21c   :  { %8459 = vsyncadd [#allocation21], 4294965744 }
 0x21d   :  { %8460 = dma.done.wait [#allocation24], 784  }
 0x21e   :  { %8461 = vsyncadd [#allocation24], 4294966512 }
 0x21f   :  { %8462 = dma.done.wait [#allocation27], 1536  }
 0x220   :  { %8463 = vsyncadd [#allocation27], 4294965760 }
 0x221   :  { %8464 = dma.done.wait [#allocation30], 3088  }
 0x222   :  { %8465 = vsyncadd [#allocation30], 4294964208 }
 0x223   :  { %8466 = dma.done.wait [#allocation33], 6160  }
 0x224   :  { %8467 = vsyncadd [#allocation33], 4294961136 }
 0x225   :  { %8468 = dma.done.wait [#allocation36], 3088  }
 0x226   :  { %8469 = vsyncadd [#allocation36], 4294964208 }
 0x227   :  { %8470 = dma.done.wait [#allocation39], 1040  }
 0x228   :  { %8471 = vsyncadd [#allocation39], 4294966256 }
 0x229   :  { %8472 = dma.done.wait [#allocation42], 2560  }
 0x22a   :  { %8473 = vsyncadd [#allocation42], 4294964736 }
 0x22b   :  { %8474 = dma.done.wait [#allocation45], 1152  }
 0x22c   :  { %8475 = vsyncadd [#allocation45], 4294966144 }
 0x22d   :  { %8476 = dma.done.wait [#allocation48], 512  }
 0x22e   :  { %8477 = vsyncadd [#allocation48], 4294966784 }
 0x22f   :  { %8478 = dma.done.wait [#allocation51], 512  }
 0x230   :  { %8479 = vsyncadd [#allocation51], 4294966784  ;;  %v8512_v0 = vmov 0   ;;  %vm582_vm0 = vsmask.f32 7424  ;;  %vm719_vm1 = vcmask 1046528  }
 0x231   :  { %898 = vmatprep.subr.bf16.mxu0 %v8512_v0  ;;  %460 = vst [vmem:[#allocation6] sm:$0xf] %v8512_v0  ;;  %461 = vst [vmem:[#allocation6 + $0x4] sm:$0xf] %v8512_v0  ;;  %v486_v1 = vld [vmem:[#allocation11] sm:$0xf] }
 0x232   :  { %462 = vst [vmem:[#allocation6 + $0x8] sm:$0x1] %v8512_v0  ;;  %463 = vst [vmem:[#allocation6 + $0xc] sm:$0xf] %v8512_v0  ;;  %v487_v2 = vld [vmem:[#allocation11 + $0x4] sm:$0xf] }
 0x233   :  { %464 = vst [vmem:[#allocation6 + $0x10] sm:$0xf] %v8512_v0  ;;  %465 = vst [vmem:[#allocation6 + $0x14] sm:$0x1] %v8512_v0  ;;  %v9051_v3 = vcombine.low %v486_v1, %v487_v2  ;;  %v510_v5 = vld [vmem:[#allocation11] sm:$0xe] }
 0x234   :  { %474 = vst [vmem:[#allocation9] sm:$0xf] %v8512_v0  ;;  %475 = vst [vmem:[#allocation9 + $0x4] sm:$0xf] %v8512_v0  ;;  %v7491_v6 = vld [vmem:[#allocation17] sm:$0xff]   ;;  %v6379_v12 = vcombine.low %v510_v5, %v487_v2  ;;  %v7492_v37 = vld [vmem:[#allocation17 + $0x8] sm:$0xff]  }
 0x235   :  { %476 = vst [vmem:[#allocation9 + $0x8] sm:$0x1] %v8512_v0  ;;  %477 = vst [vmem:[#allocation9 + $0xc] sm:$0xf] %v8512_v0  ;;  %v488_v7 = vld [vmem:[#allocation11 + $0xc] sm:$0xf]  ;;  %899 = vmatpush1.bf16.msra.mxu0 %v7491_v6 }
 0x236   :  { %478 = vst [vmem:[#allocation9 + $0x10] sm:$0xf] %v8512_v0  ;;  %479 = vst [vmem:[#allocation9 + $0x14] sm:$0x1] %v8512_v0  ;;  %v489_v8 = vld [vmem:[#allocation11 + $0x10] sm:$0xf]  ;;  %900 = vmatprep.subr.bf16.mxu0 %v8512_v0 }
 0x237   :  { %480 = vst [vmem:[#allocation10] sm:$0xf] %v8512_v0  ;;  %481 = vst [vmem:[#allocation10 + $0x4] sm:$0xf] %v8512_v0  ;;  %v584_v9 = vshrl.u32 %v9051_v3, 16  ;;  %v586_v10 = vshll.u32 %v9051_v3, 16  ;;  %v9055_v15 = vcombine.low %v488_v7, %v489_v8 }
 0x238   :  { %482 = vst [vmem:[#allocation10 + $0x8] sm:$0x1] %v8512_v0  ;;  %483 = vst [vmem:[#allocation10 + $0xc] sm:$0xf] %v8512_v0  ;;  %v511_v13 = vld [vmem:[#allocation11 + $0xc] sm:$0xe] }
 0x239   :  { %484 = vst [vmem:[#allocation10 + $0x10] sm:$0xf] %v8512_v0  ;;  %485 = vst [vmem:[#allocation10 + $0x14] sm:$0x1] %v8512_v0  ;;  %v6380_v17 = vcombine.low %v511_v13, %v489_v8  ;;  %v490_v18 = vld [vmem:[#allocation11 + $0x18] sm:$0xf]  ;;  %901 = vmatpush1.bf16.msra.mxu0 %v7492_v37 }
 0x23a   :  { %v7468_v4 = vld [vmem:[#allocation11 + $0x8] ss:$0 sps:$4 sm:$0x11]   ;;  %v7471_v16 = vld [vmem:[#allocation11 + $0x14] ss:$0 sps:$4 sm:$0x11]   ;;  %902 = vmatprep.subr.bf16.mxu0 %v8512_v0 }
 0x23b   :  { %v591_v11 = vshll.u32 %v7468_v4, 16  ;;  %v721_v14 = vrot.slane %v7468_v4, 1  ;;  %v588_v19 = vrot.slane %v586_v10, 1  ;;  %v491_v21 = vld [vmem:[#allocation11 + $0x1c] sm:$0xf]  ;;  %v596_v22 = vshrl.u32 %v9055_v15, 16 }
 0x23c   :  { %v598_v23 = vshll.u32 %v9055_v15, 16  ;;  %v603_v24 = vshll.u32 %v7471_v16, 16  ;;  %v9060_v25 = vld [vmem:[#allocation11 + $0x20] ss:$0 sps:$4 sm:$0x11]   ;;  %v720_v27 = vrot.slane %v6379_v12, 1  ;;  %v9062_v29 = vcombine.low %v490_v18, %v491_v21 }
 0x23d   :  { %v593_v20 = vrot.slane %v591_v11, 1  ;;  %v589_v26 = vor.u32 %v588_v19, %v584_v9  ;;  %v723_v28 = vrot.slane %v6380_v17, 1  ;;  %v512_v30 = vld [vmem:[#allocation11 + $0x18] sm:$0xe]  ;;  %v492_v31 = vld [vmem:[#allocation11 + $0x24] sm:$0xf] }
 0x23e   :  { %v600_v32 = vrot.slane %v598_v23, 1  ;;  %v605_v33 = vrot.slane %v603_v24, 1  ;;  %v615_v34 = vshll.u32 %v9060_v25, 16  ;;  %v6381_v35 = vcombine.low %v512_v30, %v491_v21  ;;  %v493_v36 = vld [vmem:[#allocation11 + $0x28] sm:$0xf]  ;;  %s8513_s25 = smov 48  }
 0x23f   :  { %v594_v38 = vsel %vm582_vm0, %v589_v26, %v593_v20  ;;  %v608_v39 = vshrl.u32 %v9062_v29, 16  ;;  %v610_v40 = vshll.u32 %v9062_v29, 16  ;;  %v513_v41 = vld [vmem:[#allocation11 + $0x24] sm:$0xe]  ;;  %v724_v43 = vrot.slane %v7471_v16, 1  ;;  %s8514_s7 = smov 96  }
 0x240   :  { %679 = vrot.lane.b32.xlu0 %v594_v38, %s8513_s25  ;;  %v601_v42 = vor.u32 %v600_v32, %v596_v22  ;;  %v617_v44 = vrot.slane %v615_v34, 1  ;;  %v726_v45 = vrot.slane %v6381_v35, 1  ;;  %v9069_v46 = vld [vmem:[#allocation11 + $0x2c] ss:$0 sps:$4 sm:$0x11]   ;;  %v722_v47 = vsel %vm719_vm1, %v720_v27, %v721_v14  ;;  %v7493_v52 = vld [vmem:[#allocation17 + $0x10] sm:$0xff]  }
 0x241   :  { %v612_v48 = vrot.slane %v610_v40, 1  ;;  %v9072_v49 = vcombine.low %v492_v31, %v493_v36  ;;  %v494_v50 = vld [vmem:[#allocation11 + $0x30] sm:$0xf]  ;;  %v495_v51 = vld [vmem:[#allocation11 + $0x34] sm:$0xf]  ;;  %v727_v54 = vrot.slane %v9060_v25, 1  ;;  %v6382_v56 = vcombine.low %v513_v41, %v493_v36  ;;  %903 = vmatpush1.bf16.msra.mxu0 %v7493_v52 }
 0x242   :  { %v606_v53 = vsel %vm582_vm0, %v601_v42, %v605_v33  ;;  %v627_v55 = vshll.u32 %v9069_v46, 16  ;;  %v514_v57 = vld [vmem:[#allocation11 + $0x30] sm:$0xe]  ;;  %v730_v61 = vrot.slane %v9069_v46, 1  ;;  %v725_v63 = vsel %vm719_vm1, %v723_v28, %v724_v43  ;;  %v496_v5 = vld [vmem:[#allocation11 + $0x3c] sm:$0xf]  ;;  %904 = vmatprep.subr.bf16.mxu0 %v8512_v0 }
 0x243   :  { %681 = vrot.lane.b32.xlu1 %v606_v53, %s8513_s25  ;;  %v613_v58 = vor.u32 %v612_v48, %v608_v39  ;;  %v620_v59 = vshrl.u32 %v9072_v49, 16  ;;  %v622_v60 = vshll.u32 %v9072_v49, 16  ;;  %v9082_v62 = vld [vmem:[#allocation11 + $0x38] ss:$0 sps:$4 sm:$0x11]   ;;  %v9086_v2 = vcombine.low %v494_v50, %v495_v51  ;;  %v7494_v7 = vld [vmem:[#allocation17 + $0x18] sm:$0xff]  }
 0x244   :  { %744 = vrot.lane.b32.xlu0 %v722_v47, %s8514_s7  ;;  %v629_v1 = vrot.slane %v627_v55, 1  ;;  %v6383_v4 = vcombine.low %v514_v57, %v495_v51  ;;  %v497_v6 = vld [vmem:[#allocation11 + $0x40] sm:$0xf]  ;;  %v639_v10 = vshll.u32 %v9082_v62, 16  ;;  %v515_v11 = vld [vmem:[#allocation11 + $0x3c] sm:$0xe]  ;;  %v728_v24 = vsel %vm719_vm1, %v726_v45, %v727_v54 }
 0x245   :  { %v618_v8 = vsel %vm582_vm0, %v613_v58, %v617_v44  ;;  %v624_v9 = vrot.slane %v622_v60, 1  ;;  %v729_v12 = vrot.slane %v6382_v56, 1  ;;  %v632_v13 = vshrl.u32 %v9086_v2, 16  ;;  %v498_v17 = vld [vmem:[#allocation11 + $0x48] sm:$0xf]  ;;  %905 = vmatpush1.bf16.msra.mxu0 %v7494_v7  ;;  %v7495_v34 = vld [vmem:[#allocation17 + $0x20] sm:$0xff]  }
 0x246   :  { %v634_v14 = vshll.u32 %v9086_v2, 16  ;;  %v732_v16 = vrot.slane %v6383_v4, 1  ;;  %v641_v19 = vrot.slane %v639_v10, 1  ;;  %v9094_v20 = vcombine.low %v496_v5, %v497_v6  ;;  %v7483_v21 = vld [vmem:[#allocation11 + $0x44] ss:$0 sps:$4 sm:$0x11]   ;;  %906 = vmatprep.subr.bf16.mxu0 %v8512_v0 }
 0x247   :  { %746 = vrot.lane.b32.xlu1 %v725_v63, %s8514_s7  ;;  %v625_v18 = vor.u32 %v624_v9, %v620_v59  ;;  %v6384_v22 = vcombine.low %v515_v11, %v497_v6  ;;  %v499_v23 = vld [vmem:[#allocation11 + $0x4c] sm:$0xf]  ;;  %v9100_v27 = vld [vmem:[#allocation11 + $0x50] ss:$0 sps:$4 sm:$0x11]   ;;  %v651_v32 = vshll.u32 %v7483_v21, 16  ;;  %v731_v45 = vsel %vm719_vm1, %v729_v12, %v730_v61 }
 0x248   :  { %683 = vrot.lane.b32.xlu0 %v618_v8, %s8513_s25  ;;  %v636_v25 = vrot.slane %v634_v14, 1  ;;  %v9098_v26 = vcombine.low %v498_v17, %v499_v23  ;;  %v644_v30 = vshrl.u32 %v9094_v20, 16  ;;  %v646_v31 = vshll.u32 %v9094_v20, 16  ;;  %v516_v33 = vld [vmem:[#allocation11 + $0x48] sm:$0xe]  ;;  %v7496_v44 = vld [vmem:[#allocation17 + $0x28] sm:$0xff]  }
 0x249   :  { %v630_v28 = vsel %vm582_vm0, %v625_v18, %v629_v1  ;;  %v733_v36 = vrot.slane %v9082_v62, 1  ;;  %v735_v37 = vrot.slane %v6384_v22, 1  ;;  %v500_v39 = vld [vmem:[#allocation11 + $0x54] sm:$0xf]  ;;  %v663_v42 = vshll.u32 %v9100_v27, 16  ;;  %907 = vmatpush1.bf16.msra.mxu0 %v7495_v34  ;;  %v7497_v1 = vld [vmem:[#allocation17 + $0x30] sm:$0xff]  }
 0x24a   :  { %v637_v35 = vor.u32 %v636_v25, %v632_v13  ;;  %v656_v38 = vshrl.u32 %v9098_v26, 16  ;;  %v648_v40 = vrot.slane %v646_v31, 1  ;;  %v658_v41 = vshll.u32 %v9098_v26, 16  ;;  %v501_v43 = vld [vmem:[#allocation11 + $0x58] sm:$0xf]  ;;  %908 = vmatprep.subr.bf16.mxu0 %v8512_v0  ;;  %v7498_v8 = vld [vmem:[#allocation17 + $0x38] sm:$0xff]  }
 0x24b   :  { %748 = vrot.lane.b32.xlu1 %v728_v24, %s8514_s7  ;;  %v653_v46 = vrot.slane %v651_v32, 1  ;;  %v6385_v47 = vcombine.low %v516_v33, %v499_v23  ;;  %v7489_v48 = vld [vmem:[#allocation11 + $0x5c] ss:$0 sps:$4 sm:$0x11]   ;;  %v9114_v53 = vcombine.low %v500_v39, %v501_v43  ;;  %v517_v54 = vld [vmem:[#allocation11 + $0x54] sm:$0xe]  ;;  %v734_v61 = vsel %vm719_vm1, %v732_v16, %v733_v36 }
 0x24c   :  { %685 = vrot.lane.b32.xlu0 %v630_v28, %s8513_s25  ;;  %v642_v50 = vsel %vm582_vm0, %v637_v35, %v641_v19  ;;  %v649_v51 = vor.u32 %v648_v40, %v644_v30  ;;  %v660_v52 = vrot.slane %v658_v41, 1  ;;  %v736_v55 = vrot.slane %v7483_v21, 1  ;;  %v7499_v14 = vld [vmem:[#allocation17 + $0x40] sm:$0xff]   ;;  %s8515_s10 = smov 32  }
 0x24d   :  { %v665_v56 = vrot.slane %v663_v42, 1  ;;  %v738_v57 = vrot.slane %v6385_v47, 1  ;;  %v739_v58 = vrot.slane %v9100_v27, 1  ;;  %v670_v59 = vshll.u32 %v9114_v53, 16  ;;  %909 = vmatpush1.bf16.msra.mxu0 %v7496_v44 }
 0x24e   :  { %v675_v60 = vshll.u32 %v7489_v48, 16  ;;  %v6386_v62 = vcombine.low %v517_v54, %v501_v43  ;;  %v742_v63 = vrot.slane %v7489_v48, 1  ;;  %v654_v4 = vsel %vm582_vm0, %v649_v51, %v653_v46  ;;  %910 = vmatprep.subr.bf16.mxu0 %v8512_v0  ;;  %v7500_v48 = vld [vmem:[#allocation40] sm:$0xff]   ;;  %v7509_v51 = vld [vmem:[#allocation41 + $0x48] sm:$0xff]  }
 0x24f   :  { %750 = vrot.lane.b32.xlu1 %v731_v45, %s8514_s7  ;;  %v661_v5 = vor.u32 %v660_v52, %v656_v38  ;;  %v668_v6 = vshrl.u32 %v9114_v53, 16  ;;  %v672_v7 = vrot.slane %v670_v59, 1  ;;  %v737_v9 = vsel %vm719_vm1, %v735_v37, %v736_v55  ;;  %7131 = vmatprep.mubr.bf16.mxu1 %v7500_v48  ;;  %v7510_v52 = vld [vmem:[#allocation41 + $0x50] sm:$0xff]  }
 0x250   :  { %687 = vrot.lane.b32.xlu0 %v642_v50, %s8513_s25  ;;  %v677_v12 = vrot.slane %v675_v60, 1  ;;  %v741_v13 = vrot.slane %v6386_v62, 1  ;;  %v740_v16 = vsel %vm719_vm1, %v738_v57, %v739_v58  ;;  %vm760_vm2 = vcmask 392192   ;;  %v7508_v50 = vld [vmem:[#allocation41 + $0x40] sm:$0xff]  }
 0x251   :  { %911 = vmatpush1.bf16.msra.mxu0 %v7497_v1  ;;  %v666_v10 = vsel %vm582_vm0, %v661_v5, %v665_v56  ;;  %v673_v11 = vor.u32 %v672_v7, %v668_v6  ;;  %vm881_vm3 = vcmask 130048   ;;  %vm777_vm4 = vcmask 785408  }
 0x252   :  { %912 = vmatprep.subr.bf16.mxu0 %v8512_v0  ;;  %v743_v18 = vsel %vm719_vm1, %v741_v13, %v742_v63  ;;  %vm425_vm5 = vcmask 516096   ;;  %vm1023_vm6 = vsmask.f32 256  ;;  %vm1067_vm8 = vsmask.f32 7938 }
 0x253   :  { %752 = vrot.lane.b32.xlu1 %v734_v61, %s8514_s7  ;;  %v678_v17 = vsel %vm582_vm0, %v673_v11, %v677_v12  ;;  %426 = vst.msk [vmem:[#allocation2 + $0x4] sm:$0x1] %vm425_vm5, %v8512_v0  ;;  %428 = vst.msk [vmem:[#allocation2 + $0xc] sm:$0x1] %vm425_vm5, %v8512_v0  ;;  %vm1066_vm9 = vcmask 1043456   ;;  %vm1073_vm11 = vcmask 1040384  }
 0x254   :  { %689 = vrot.lane.b32.xlu0 %v654_v4, %s8513_s25  ;;  %430 = vst.msk [vmem:[#allocation2 + $0x14] sm:$0x1] %vm425_vm5, %v8512_v0  ;;  %432 = vst.msk [vmem:[#allocation2 + $0x1c] sm:$0x1] %vm425_vm5, %v8512_v0  ;;  %vm1024_vm10 = vsmask.f32 4368 }
 0x255   :  { %913 = vmatpush1.bf16.msra.mxu0 %v7498_v8  ;;  %434 = vst.msk [vmem:[#allocation2 + $0x24] sm:$0x1] %vm425_vm5, %v8512_v0  ;;  %436 = vst.msk [vmem:[#allocation2 + $0x2c] sm:$0x1] %vm425_vm5, %v8512_v0  ;;  %vm423_vm15 = vcmask 519168  }
 0x256   :  { %914 = vmatprep.subr.bf16.mxu0 %v8512_v0  ;;  %438 = vst.msk [vmem:[#allocation2 + $0x34] sm:$0x1] %vm425_vm5, %v8512_v0  ;;  %440 = vst.msk [vmem:[#allocation2 + $0x3c] sm:$0x1] %vm425_vm5, %v8512_v0 }
 0x257   :  { %754 = vrot.lane.b32.xlu1 %v737_v9, %s8514_s7  ;;  %467 = vst.msk [vmem:[#allocation7 + $0x4] sm:$0x1] %vm425_vm5, %v8512_v0  ;;  %469 = vst.msk [vmem:[#allocation7 + $0xc] sm:$0x1] %vm425_vm5, %v8512_v0 }
 0x258   :  { %691 = vrot.lane.b32.xlu0 %v666_v10, %s8513_s25  ;;  %471 = vst.msk [vmem:[#allocation8 + $0x4] sm:$0x1] %vm425_vm5, %v8512_v0  ;;  %473 = vst.msk [vmem:[#allocation8 + $0xc] sm:$0x1] %vm425_vm5, %v8512_v0 }
 0x259   :  { %915 = vmatpush1.bf16.msra.mxu0 %v7499_v14  ;;  %vm9184_vm7 = vmand %vm425_vm5, %vm1023_vm6  ;;  %429 = vst.msk [vmem:[#allocation2 + $0x10] sm:$0xf] %vm423_vm15, %v8512_v0  ;;  %vm1897_vm5 = vcmask 523264  }
 0x25a   :  { %7187 = vmatprep.subr.bf16.mxu0 %v7508_v50  ;;  %vm9235_vm12 = vmand %vm1066_vm9, %vm1067_vm8  ;;  %424 = vst.msk [vmem:[#allocation2] sm:$0xf] %vm423_vm15, %v8512_v0 }
 0x25b   :  { %756 = vrot.lane.b32.xlu1 %v740_v16, %s8514_s7  ;;  %vm9240_vm13 = vmor %vm1023_vm6, %vm1024_vm10  ;;  %427 = vst.msk [vmem:[#allocation2 + $0x8] sm:$0xf] %vm423_vm15, %v8512_v0 }
 0x25c   :  { %693 = vrot.lane.b32.xlu0 %v678_v17, %s8513_s25  ;;  %vm9246_vm14 = vmand %vm1073_vm11, %vm1023_vm6  ;;  %431 = vst.msk [vmem:[#allocation2 + $0x18] sm:$0xf] %vm423_vm15, %v8512_v0  ;;  %vm441_vm6 = vcmask 256000   ;;  %vm2811_vm11 = vcmask 261120  }
 0x25d   :  { %433 = vst.msk [vmem:[#allocation2 + $0x20] sm:$0xf] %vm423_vm15, %v8512_v0  ;;  %435 = vst.msk [vmem:[#allocation2 + $0x28] sm:$0xf] %vm423_vm15, %v8512_v0 }
 0x25e   :  { %437 = vst.msk [vmem:[#allocation2 + $0x30] sm:$0xf] %vm423_vm15, %v8512_v0  ;;  %439 = vst.msk [vmem:[#allocation2 + $0x38] sm:$0xf] %vm423_vm15, %v8512_v0 }
 0x25f   :  { %758 = vrot.lane.b32.xlu1 %v743_v18, %s8514_s7  ;;  %466 = vst.msk [vmem:[#allocation7] sm:$0xf] %vm423_vm15, %v8512_v0  ;;  %468 = vst.msk [vmem:[#allocation7 + $0x8] sm:$0xf] %vm423_vm15, %v8512_v0 }
 0x260   :  { %470 = vst.msk [vmem:[#allocation8] sm:$0xf] %vm423_vm15, %v8512_v0  ;;  %472 = vst.msk [vmem:[#allocation8 + $0x8] sm:$0xf] %vm423_vm15, %v8512_v0 }
 0x261   :  { %446 = vst.msk [vmem:[#allocation3 + $0x10] sm:$0x7] %vm441_vm6, %v8512_v0  ;;  %447 = vst.msk [vmem:[#allocation3 + $0x14] sm:$0x7] %vm441_vm6, %v8512_v0 }
 0x262   :  { %442 = vst.msk [vmem:[#allocation3] sm:$0x7] %vm441_vm6, %v8512_v0  ;;  %443 = vst.msk [vmem:[#allocation3 + $0x4] sm:$0x7] %vm441_vm6, %v8512_v0 }
 0x263   :  { %444 = vst.msk [vmem:[#allocation3 + $0x8] sm:$0x7] %vm441_vm6, %v8512_v0  ;;  %445 = vst.msk [vmem:[#allocation3 + $0xc] sm:$0x7] %vm441_vm6, %v8512_v0 }
 0x264   :  { %448 = vst.msk [vmem:[#allocation3 + $0x18] sm:$0x7] %vm441_vm6, %v8512_v0  ;;  %449 = vst.msk [vmem:[#allocation3 + $0x1c] sm:$0x7] %vm441_vm6, %v8512_v0 }
 0x265   :  { %450 = vst.msk [vmem:[#allocation4] sm:$0x7] %vm441_vm6, %v8512_v0  ;;  %451 = vst.msk [vmem:[#allocation4 + $0x4] sm:$0x7] %vm441_vm6, %v8512_v0 }
 0x266   :  { %452 = vst.msk [vmem:[#allocation4 + $0x8] sm:$0x7] %vm441_vm6, %v8512_v0  ;;  %453 = vst.msk [vmem:[#allocation4 + $0xc] sm:$0x7] %vm441_vm6, %v8512_v0 }
 0x267   :  { %454 = vst.msk [vmem:[#allocation4 + $0x10] sm:$0x7] %vm441_vm6, %v8512_v0  ;;  %455 = vst.msk [vmem:[#allocation4 + $0x14] sm:$0x7] %vm441_vm6, %v8512_v0 }
 0x268   :  { %456 = vst.msk [vmem:[#allocation4 + $0x18] sm:$0x7] %vm441_vm6, %v8512_v0  ;;  %457 = vst.msk [vmem:[#allocation4 + $0x1c] sm:$0x7] %vm441_vm6, %v8512_v0 }
 0x269   :  { %458 = vst.msk [vmem:[#allocation5] sm:$0x7] %vm441_vm6, %v8512_v0  ;;  %459 = vst.msk [vmem:[#allocation5 + $0x4] sm:$0x7] %vm441_vm6, %v8512_v0 }
 0x2b2   :  { %v680_v19 = vpop.permute.xlu0 %679 }
 0x2b3   :  { %v762_v22 = vsel %vm760_vm2, %v9051_v3, %v680_v19 }
 0x2b5   :  { %v682_v21 = vpop.permute.xlu1 %681 }
 0x2b6   :  { %v745_v23 = vpop.permute.xlu0 %744  ;;  %v764_v27 = vsel %vm760_vm2, %v9055_v15, %v682_v21 }
 0x2b7   :  { %6397 = vmatprep.mubr.msk.bf16.mxu0 %vm881_vm3, %v745_v23  ;;  %v779_v24 = vsel %vm777_vm4, %v762_v22, %v745_v23 }
 0x2b8   :  { %931 = vmatmul.mubr.bf16.vlgmr.msra.gmra.mrb[0].mxu0 %v779_v24 }
 0x2b9   :  { %v747_v25 = vpop.permute.xlu1 %746  ;;  %7188 = vmatpush3.bf16.msra.mxu0 %v7508_v50 }
 0x2ba   :  { %6398 = vmatprep.mubr.msk.bf16.mxu0 %vm881_vm3, %v747_v25  ;;  %v782_v30 = vsel %vm777_vm4, %v764_v27, %v747_v25  ;;  %v684_v31 = vpop.permute.xlu0 %683  ;;  %7189 = vmatprep.subr.bf16.mxu0 %v7509_v51 }
 0x2bb   :  { %v766_v3 = vsel %vm760_vm2, %v9062_v29, %v684_v31 }
 0x2bd   :  { %v749_v28 = vpop.permute.xlu1 %748  ;;  %7190 = vmatpush3.bf16.msra.mxu0 %v7509_v51 }
 0x2be   :  { %v785_v32 = vsel %vm777_vm4, %v766_v3, %v749_v28  ;;  %v686_v34 = vpop.permute.xlu0 %685  ;;  %7191 = vmatprep.subr.bf16.mxu0 %v7510_v52 }
 0x2bf   :  { %v768_v15 = vsel %vm760_vm2, %v9072_v49, %v686_v34 }
 0x2c0   :  { %939 = vmatmul.mubr.bf16.gmra.mrb[4].mxu0 %v782_v30 }
 0x2c1   :  { %6399 = vmatprep.mubr.msk.bf16.mxu0 %vm881_vm3, %v749_v28  ;;  %v751_v33 = vpop.permute.xlu1 %750  ;;  %7192 = vmatpush3.bf16.msra.mxu0 %v7510_v52 }
 0x2c2   :  { %v788_v35 = vsel %vm777_vm4, %v768_v15, %v751_v33  ;;  %v688_v37 = vpop.permute.xlu0 %687 }
 0x2c3   :  { %v770_v29 = vsel %vm760_vm2, %v9086_v2, %v688_v37 }
 0x2c5   :  { %v753_v36 = vpop.permute.xlu1 %752 }
 0x2c6   :  { %v791_v38 = vsel %vm777_vm4, %v770_v29, %v753_v36  ;;  %v690_v40 = vpop.permute.xlu0 %689 }
 0x2c7   :  { %v772_v49 = vsel %vm760_vm2, %v9094_v20, %v690_v40 }
 0x2c8   :  { %947 = vmatmul.mubr.bf16.gmra.mrb[8].mxu0 %v785_v32 }
 0x2c9   :  { %6400 = vmatprep.mubr.msk.bf16.mxu0 %vm881_vm3, %v751_v33  ;;  %v755_v39 = vpop.permute.xlu1 %754 }
 0x2ca   :  { %v794_v41 = vsel %vm777_vm4, %v772_v49, %v755_v39  ;;  %v692_v43 = vpop.permute.xlu0 %691 }
 0x2cb   :  { %v774_v2 = vsel %vm760_vm2, %v9098_v26, %v692_v43 }
 0x2cd   :  { %v757_v42 = vpop.permute.xlu1 %756 }
 0x2ce   :  { %v797_v44 = vsel %vm777_vm4, %v774_v2, %v757_v42  ;;  %v694_v46 = vpop.permute.xlu0 %693 }
 0x2cf   :  { %v776_v20 = vsel %vm760_vm2, %v9114_v53, %v694_v46  ;;  %v9188_v53 = vld [vmem:[#allocation19] ss:$0 sm:$0xff]  ;;  %vm9315_vm2 = vmand %vm423_vm15, %vm1067_vm8  ;;  %vm2617_vm8 = vsmask.f32 2306  ;;  %vm8518_vm15 = vmmov 0  }
 0x2d0   :  { %955 = vmatmul.mubr.bf16.gmra.mrb[12].mxu0 %v788_v35  ;;  %vm9465_vm10 = vmand %vm441_vm6, %vm2617_vm8 }
 0x2d1   :  { %6401 = vmatprep.mubr.msk.bf16.mxu0 %vm881_vm3, %v753_v36  ;;  %v759_v45 = vpop.permute.xlu1 %758 }
 0x2d2   :  { %v800_v47 = vsel %vm777_vm4, %v776_v20, %v759_v45 }
 0x2d8   :  { %963 = vmatmul.mubr.bf16.gmra.mrb[16].mxu0 %v791_v38 }
 0x2d9   :  { %6402 = vmatprep.mubr.msk.bf16.mxu0 %vm881_vm3, %v755_v39 }
 0x2e0   :  { %971 = vmatmul.mubr.bf16.gmra.mrb[20].mxu0 %v794_v41 }
 0x2e1   :  { %6403 = vmatprep.mubr.msk.bf16.mxu0 %vm881_vm3, %v757_v42 }
 0x2e8   :  { %979 = vmatmul.mubr.bf16.gmra.mrb[24].mxu0 %v797_v44 }
 0x2e9   :  { %6404 = vmatprep.mubr.msk.bf16.mxu0 %vm881_vm3, %v759_v45 }
 0x2f0   :  { %987 = vmatmul.mubr.bf16.gmra.mrb[28].mxu0 %v800_v47 }
 0x38b   :  { %v932_v54 = vpop.f32.mrb[0].mxu0 }
 0x38c   :  { %v933_v55 = vadd.f32 %v9188_v53, %v932_v54  ;;  %v934_v56 = vpop.f32.mrb[1].mxu0 }
 0x38d   :  { %v935_v57 = vpop.f32.mrb[2].mxu0 }
 0x38e   :  { %v936_v58 = vadd.f32 %v9188_v53, %v935_v57  ;;  %v937_v59 = vpop.f32.mrb[3].mxu0  ;;  %v995_v60 = vmax.f32 %v933_v55, 0.0 }
 0x390   :  { %v996_v61 = vmax.f32 %v936_v58, 0.0 }
 0x392   :  { %v9192_v62 = vpack.c.bf16 %v996_v61, %v995_v60 }
 0x393   :  { %v940_v63 = vpop.f32.mrb[4].mxu0 }
 0x394   :  { %v941_v1 = vadd.f32 %v9188_v53, %v940_v63  ;;  %v942_v4 = vpop.f32.mrb[5].mxu0  ;;  %7115 = vmatprep.subr.bf16.mxu1 %v9192_v62 }
 0x395   :  { %v943_v5 = vpop.f32.mrb[6].mxu0  ;;  %7116 = vmatpush3.bf16.msra.mxu1 %v9192_v62 }
 0x396   :  { %v944_v6 = vadd.f32 %v9188_v53, %v943_v5  ;;  %v945_v7 = vpop.f32.mrb[7].mxu0  ;;  %v997_v8 = vmax.f32 %v941_v1, 0.0 }
 0x397   :  { %v1069_v7 = vld [vmem:[#allocation6] sm:$0xf] }
 0x398   :  { %v998_v9 = vmax.f32 %v944_v6, 0.0 }
 0x39a   :  { %v9198_v10 = vpack.c.bf16 %v998_v9, %v997_v8 }
 0x39b   :  { %v948_v11 = vpop.f32.mrb[8].mxu0 }
 0x39c   :  { %v949_v12 = vadd.f32 %v9188_v53, %v948_v11  ;;  %v950_v13 = vpop.f32.mrb[9].mxu0  ;;  %7117 = vmatprep.subr.bf16.mxu1 %v9198_v10 }
 0x39d   :  { %v951_v14 = vpop.f32.mrb[10].mxu0  ;;  %7118 = vmatpush3.bf16.msra.mxu1 %v9198_v10 }
 0x39e   :  { %v952_v16 = vadd.f32 %v9188_v53, %v951_v14  ;;  %v953_v17 = vpop.f32.mrb[11].mxu0  ;;  %v999_v18 = vmax.f32 %v949_v12, 0.0 }
 0x3a0   :  { %v1000_v19 = vmax.f32 %v952_v16, 0.0 }
 0x3a2   :  { %v9204_v21 = vpack.c.bf16 %v1000_v19, %v999_v18  ;;  %v1075_v18 = vld [vmem:[#allocation6 + $0x8] sm:$0x1] }
 0x3a3   :  { %v956_v22 = vpop.f32.mrb[12].mxu0 }
 0x3a4   :  { %v957_v23 = vadd.f32 %v9188_v53, %v956_v22  ;;  %v958_v24 = vpop.f32.mrb[13].mxu0  ;;  %7119 = vmatprep.subr.bf16.mxu1 %v9204_v21 }
 0x3a5   :  { %v959_v25 = vpop.f32.mrb[14].mxu0  ;;  %7120 = vmatpush3.bf16.msra.mxu1 %v9204_v21 }
 0x3a6   :  { %v960_v27 = vadd.f32 %v9188_v53, %v959_v25  ;;  %v961_v28 = vpop.f32.mrb[15].mxu0  ;;  %v1001_v30 = vmax.f32 %v957_v23, 0.0 }
 0x3a8   :  { %v1002_v31 = vmax.f32 %v960_v27, 0.0 }
 0x3aa   :  { %v9210_v3 = vpack.c.bf16 %v1002_v31, %v1001_v30 }
 0x3ab   :  { %v964_v32 = vpop.f32.mrb[16].mxu0 }
 0x3ac   :  { %v965_v33 = vadd.f32 %v9188_v53, %v964_v32  ;;  %v966_v34 = vpop.f32.mrb[17].mxu0  ;;  %7121 = vmatprep.subr.bf16.mxu1 %v9210_v3 }
 0x3ad   :  { %v967_v15 = vpop.f32.mrb[18].mxu0  ;;  %7122 = vmatpush3.bf16.msra.mxu1 %v9210_v3 }
 0x3ae   :  { %v968_v35 = vadd.f32 %v9188_v53, %v967_v15  ;;  %v969_v36 = vpop.f32.mrb[19].mxu0  ;;  %v1003_v37 = vmax.f32 %v965_v33, 0.0 }
 0x3af   :  { %v1078_v36 = vld [vmem:[#allocation6 + $0xc] sm:$0xf] }
 0x3b0   :  { %v1004_v29 = vmax.f32 %v968_v35, 0.0  ;;  %v7501_v35 = vld [vmem:[#allocation40 + $0x8] sm:$0xff]  }
 0x3b2   :  { %v9216_v38 = vpack.c.bf16 %v1004_v29, %v1003_v37  ;;  %v7502_v29 = vld [vmem:[#allocation40 + $0x10] sm:$0xff]  }
 0x3b3   :  { %v972_v39 = vpop.f32.mrb[20].mxu0 }
 0x3b4   :  { %v973_v40 = vadd.f32 %v9188_v53, %v972_v39  ;;  %v974_v49 = vpop.f32.mrb[21].mxu0  ;;  %7123 = vmatprep.subr.bf16.mxu1 %v9216_v38 }
 0x3b5   :  { %v975_v41 = vpop.f32.mrb[22].mxu0  ;;  %7124 = vmatpush3.bf16.msra.mxu1 %v9216_v38  ;;  %v1082_v49 = vld [vmem:[#allocation6 + $0x14] sm:$0x1] }
 0x3b6   :  { %v976_v42 = vadd.f32 %v9188_v53, %v975_v41  ;;  %v977_v43 = vpop.f32.mrb[23].mxu0  ;;  %v1005_v2 = vmax.f32 %v973_v40, 0.0 }
 0x3b8   :  { %v1006_v44 = vmax.f32 %v976_v42, 0.0 }
 0x3ba   :  { %v9222_v45 = vpack.c.bf16 %v1006_v44, %v1005_v2 }
 0x3bb   :  { %v980_v46 = vpop.f32.mrb[24].mxu0 }
 0x3bc   :  { %v981_v20 = vadd.f32 %v9188_v53, %v980_v46  ;;  %v982_v47 = vpop.f32.mrb[25].mxu0  ;;  %7125 = vmatprep.subr.bf16.mxu1 %v9222_v45 }
 0x3bd   :  { %v983_v48 = vpop.f32.mrb[26].mxu0  ;;  %7126 = vmatpush3.bf16.msra.mxu1 %v9222_v45  ;;  %v7504_v47 = vld [vmem:[#allocation40 + $0x20] sm:$0xff]  }
 0x3be   :  { %v1007_v50 = vmax.f32 %v981_v20, 0.0  ;;  %v984_v51 = vadd.f32 %v9188_v53, %v983_v48  ;;  %v985_v52 = vpop.f32.mrb[27].mxu0  ;;  %v7503_v20 = vld [vmem:[#allocation40 + $0x18] sm:$0xff]   ;;  %v7512_v48 = vld [vmem:[#allocation41] sm:$0xff]  }
 0x3bf   :  { %v7516_v52 = vld [vmem:[#allocation41 + $0x18] sm:$0xff]  }
 0x3c0   :  { %v6782_v54 = vpack.c.bf16 %v1007_v50, %v1007_v50  ;;  %v1008_v55 = vmax.f32 %v984_v51, 0.0  ;;  %v7517_v51 = vld [vmem:[#allocation41 + $0x68] sm:$0xff]  }
 0x3c2   :  { %v1027_v56 = vshrl.u32 %v6782_v54, 16  ;;  %v9228_v57 = vpack.c.bf16 %v1008_v55, %v1007_v50  ;;  %v6783_v58 = vpack.c.bf16 %v1008_v55, %v1008_v55  ;;  %v1030_v61 = vshll.u32 %v6782_v54, 16  ;;  %v7513_v50 = vld [vmem:[#allocation41 + $0x8] sm:$0xff]   ;;  %v7520_v54 = vld [vmem:[#allocation41 + $0x70] sm:$0xff]   ;;  %v7518_v55 = vld [vmem:[#allocation41 + $0x20] sm:$0xff]  }
 0x3c3   :  { %v988_v59 = vpop.f32.mrb[28].mxu0 }
 0x3c4   :  { %v1029_v60 = vrot.slane %v1027_v56, 7  ;;  %v1035_v63 = vshrl.u32 %v6783_v58, 16  ;;  %v989_v1 = vadd.f32 %v9188_v53, %v988_v59  ;;  %v990_v4 = vpop.f32.mrb[29].mxu0  ;;  %7127 = vmatprep.subr.bf16.mxu1 %v9228_v57  ;;  %v1038_v12 = vshll.u32 %v6783_v58, 16  ;;  %v7519_v56 = vld [vmem:[#allocation41 + $0x28] sm:$0xff]   ;;  %v7522_v58 = vld [vmem:[#allocation41 + $0x38] sm:$0xff]  }
 0x3c5   :  { %v991_v5 = vpop.f32.mrb[30].mxu0  ;;  %7128 = vmatpush3.bf16.msra.mxu1 %v9228_v57  ;;  %v7523_v59 = vld [vmem:[#allocation41 + $0x78] sm:$0xff]  }
 0x3c6   :  { %v1032_v8 = vor.u32 %v1030_v61, %v1029_v60  ;;  %v1037_v11 = vrot.slane %v1035_v63, 7  ;;  %v1009_v13 = vmax.f32 %v989_v1, 0.0  ;;  %v993_v14 = vpop.f32.mrb[31].mxu0  ;;  %v1033_v16 = vrot.slane %v1029_v60, 4 }
 0x3c7   :  { %v992_v19 = vadd.f32 %v9188_v53, %v991_v5 }
 0x3c8   :  { %v1040_v22 = vor.u32 %v1038_v12, %v1037_v11  ;;  %v1042_v23 = vrot.slane %v1037_v11, 4  ;;  %v6784_v24 = vpack.c.bf16 %v1009_v13, %v1009_v13  ;;  %v1070_v25 = vsel %vm9235_vm12, %v1032_v8, %v1069_v7 }
 0x3c9   :  { %v1010_v27 = vmax.f32 %v992_v19, 0.0  ;;  %1071 = vst [vmem:[#allocation6] sm:$0xf] %v1070_v25 }
 0x3ca   :  { %v1041_v28 = vsel %vm9240_vm13, %v1033_v16, %v1040_v22  ;;  %v1076_v30 = vsel %vm9246_vm14, %v1042_v23, %v1075_v18  ;;  %v1044_v31 = vshrl.u32 %v6784_v24, 16  ;;  %v1047_v34 = vshll.u32 %v6784_v24, 16 }
 0x3cb   :  { %1072 = vst [vmem:[#allocation6 + $0x4] sm:$0xf] %v1041_v28  ;;  %1077 = vst [vmem:[#allocation6 + $0x8] sm:$0x1] %v1076_v30  ;;  %v1012_v32 = vpack.c.bf16 %v1010_v27, %v1009_v13  ;;  %v6785_v33 = vpack.c.bf16 %v1010_v27, %v1010_v27 }
 0x3cc   :  { %v1046_v53 = vrot.slane %v1044_v31, 7 }
 0x3cd   :  { %v1052_v15 = vshrl.u32 %v6785_v33, 16  ;;  %7129 = vmatprep.subr.bf16.mxu1 %v1012_v32  ;;  %v1055_v40 = vshll.u32 %v6785_v33, 16 }
 0x3ce   :  { %v1049_v37 = vor.u32 %v1047_v34, %v1046_v53  ;;  %7130 = vmatpush3.bf16.msra.mxu1 %v1012_v32  ;;  %v1050_v42 = vrot.slane %v1046_v53, 4 }
 0x3cf   :  { %v1054_v39 = vrot.slane %v1052_v15, 7  ;;  %7139 = vmatprep.subr.bf16.mxu1 %v9192_v62 }
 0x3d0   :  { %v1079_v41 = vsel %vm9235_vm12, %v1049_v37, %v1078_v36  ;;  %v7541_v36 = vld [vmem:[#allocation20 + $0x8] sm:$0xff]   ;;  %v7542_v37 = vld [vmem:[#allocation20 + $0x10] sm:$0xff]  }
 0x3d1   :  { %v1057_v43 = vor.u32 %v1055_v40, %v1054_v39  ;;  %v1059_v2 = vrot.slane %v1054_v39, 4  ;;  %7132 = vmatmul.mubr.bf16.vlgmr.msra.gmra.mrb[0].mxu1 %v7501_v35  ;;  %1080 = vst [vmem:[#allocation6 + $0xc] sm:$0xf] %v1079_v41  ;;  %v7540_v35 = vld [vmem:[#allocation20] sm:$0xff]   ;;  %v7545_v40 = vld [vmem:[#allocation20 + $0x28] sm:$0xff]   ;;  %v7547_v41 = vld [vmem:[#allocation20 + $0x38] sm:$0xff]  }
 0x3d2   :  { %7140 = vmatpush3.bf16.msra.mxu1 %v9192_v62  ;;  %7135 = vmatprep.mubr.bf16.mxu1 %v7502_v29  ;;  %v7505_v62 = vld [vmem:[#allocation40 + $0x28] sm:$0xff]   ;;  %v7543_v29 = vld [vmem:[#allocation20 + $0x18] sm:$0xff]  }
 0x3d3   :  { %v1058_v44 = vsel %vm9240_vm13, %v1050_v42, %v1057_v43  ;;  %v1083_v46 = vsel %vm9246_vm14, %v1059_v2, %v1082_v49  ;;  %7141 = vmatprep.subr.bf16.mxu1 %v9198_v10  ;;  %v7544_v39 = vld [vmem:[#allocation20 + $0x20] sm:$0xff]   ;;  %v7546_v49 = vld [vmem:[#allocation20 + $0x30] sm:$0xff]   ;;  %v7549_v43 = vld [vmem:[#allocation20 + $0x48] sm:$0xff]  }
 0x3d4   :  { %1081 = vst [vmem:[#allocation6 + $0x10] sm:$0xf] %v1058_v44  ;;  %1084 = vst [vmem:[#allocation6 + $0x14] sm:$0x1] %v1083_v46  ;;  %v7548_v42 = vld [vmem:[#allocation20 + $0x40] sm:$0xff]   ;;  %v7550_v2 = vld [vmem:[#allocation20 + $0x50] sm:$0xff]  }
 0x3d6   :  { %7142 = vmatpush3.bf16.msra.mxu1 %v9198_v10  ;;  %v7506_v10 = vld [vmem:[#allocation40 + $0x30] sm:$0xff]  }
 0x3d7   :  { %7143 = vmatprep.subr.bf16.mxu1 %v9204_v21 }
 0x3d9   :  { %7136 = vmatmul.mubr.bf16.gmra.mrb[4].mxu1 %v7503_v20 }
 0x3da   :  { %7144 = vmatpush3.bf16.msra.mxu1 %v9204_v21  ;;  %7155 = vmatprep.mubr.bf16.mxu1 %v7504_v47  ;;  %v7507_v21 = vld [vmem:[#allocation40 + $0x38] sm:$0xff]  }
 0x3db   :  { %7145 = vmatprep.subr.bf16.mxu1 %v9210_v3 }
 0x3de   :  { %7146 = vmatpush3.bf16.msra.mxu1 %v9210_v3  ;;  %v7511_v3 = vld [vmem:[#allocation41 + $0x58] sm:$0xff]  }
 0x3df   :  { %7147 = vmatprep.subr.bf16.mxu1 %v9216_v38  ;;  %7193 = vmatprep.subr.bf16.mxu0 %v7511_v3 }
 0x3e0   :  { %7194 = vmatpush3.bf16.msra.mxu0 %v7511_v3 }
 0x3e2   :  { %7148 = vmatpush3.bf16.msra.mxu1 %v9216_v38  ;;  %v7514_v38 = vld [vmem:[#allocation41 + $0x60] sm:$0xff]  }
 0x3e3   :  { %7149 = vmatprep.subr.bf16.mxu1 %v9222_v45  ;;  %7195 = vmatprep.subr.bf16.mxu0 %v7514_v38 }
 0x3e4   :  { %7196 = vmatpush3.bf16.msra.mxu0 %v7514_v38 }
 0x3e5   :  { %7197 = vmatprep.subr.bf16.mxu0 %v7517_v51 }
 0x3e6   :  { %7150 = vmatpush3.bf16.msra.mxu1 %v9222_v45  ;;  %v7515_v45 = vld [vmem:[#allocation41 + $0x10] sm:$0xff]  }
 0x3e7   :  { %7151 = vmatprep.subr.bf16.mxu1 %v9228_v57 }
 0x3e8   :  { %7198 = vmatpush3.bf16.msra.mxu0 %v7517_v51 }
 0x3e9   :  { %7199 = vmatprep.subr.bf16.mxu0 %v7520_v54 }
 0x3ea   :  { %7152 = vmatpush3.bf16.msra.mxu1 %v9228_v57  ;;  %v7521_v57 = vld [vmem:[#allocation41 + $0x30] sm:$0xff]  }
 0x3eb   :  { %7153 = vmatprep.subr.bf16.mxu1 %v1012_v32 }
 0x3ec   :  { %7200 = vmatpush3.bf16.msra.mxu0 %v7520_v54 }
 0x3ed   :  { %7201 = vmatprep.subr.bf16.mxu0 %v7523_v59 }
 0x3ee   :  { %7154 = vmatpush3.bf16.msra.mxu1 %v1012_v32 }
 0x3ef   :  { %7163 = vmatprep.subr.bf16.mxu1 %v7512_v48 }
 0x3f0   :  { %7202 = vmatpush3.bf16.msra.mxu0 %v7523_v59 }
 0x3f1   :  { %7156 = vmatmul.mubr.bf16.vlgmr.msra.gmra.mrb[8].mxu1 %v7505_v62 }
 0x3f2   :  { %7159 = vmatprep.mubr.bf16.mxu1 %v7506_v10  ;;  %7164 = vmatpush3.bf16.msra.mxu1 %v7512_v48 }
 0x3f3   :  { %7165 = vmatprep.subr.bf16.mxu1 %v7513_v50 }
 0x3f6   :  { %7166 = vmatpush3.bf16.msra.mxu1 %v7513_v50 }
 0x3f7   :  { %7167 = vmatprep.subr.bf16.mxu1 %v7515_v45 }
 0x3f9   :  { %7160 = vmatmul.mubr.bf16.gmra.mrb[12].mxu1 %v7507_v21 }
 0x3fa   :  { %7168 = vmatpush3.bf16.msra.mxu1 %v7515_v45 }
 0x3fb   :  { %7169 = vmatprep.subr.bf16.mxu1 %v7516_v52 }
 0x3fe   :  { %7170 = vmatpush3.bf16.msra.mxu1 %v7516_v52 }
 0x3ff   :  { %7171 = vmatprep.subr.bf16.mxu1 %v7518_v55 }
 0x402   :  { %7172 = vmatpush3.bf16.msra.mxu1 %v7518_v55 }
 0x403   :  { %7173 = vmatprep.subr.bf16.mxu1 %v7519_v56 }
 0x406   :  { %7174 = vmatpush3.bf16.msra.mxu1 %v7519_v56  ;;  %v1693_v56 = vld [vmem:[#allocation2 + $0x10] sm:$0xf] }
 0x407   :  { %7175 = vmatprep.subr.bf16.mxu1 %v7521_v57 }
 0x40a   :  { %7176 = vmatpush3.bf16.msra.mxu1 %v7521_v57  ;;  %v1696_v57 = vld [vmem:[#allocation2 + $0x14] sm:$0x1] }
 0x40b   :  { %7177 = vmatprep.subr.bf16.mxu1 %v7522_v58 }
 0x40e   :  { %7178 = vmatpush3.bf16.msra.mxu1 %v7522_v58 }
 0x40f   :  { %2073 = vmatprep.subr.bf16.mxu1 %v8512_v0 }
 0x4a4   :  { %v7133_v60 = vpop.f32.mrb[0].mxu1 }
 0x4a5   :  { %v1157_v61 = vpop.f32.mrb[1].mxu1 }
 0x4a6   :  { %v7134_v63 = vpop.f32.mrb[2].mxu1 }
 0x4a7   :  { %v1160_v1 = vpop.f32.mrb[3].mxu1 }
 0x4ac   :  { %v7137_v4 = vpop.f32.mrb[4].mxu1 }
 0x4ad   :  { %v1173_v5 = vpop.f32.mrb[5].mxu1 }
 0x4ae   :  { %v7138_v7 = vpop.f32.mrb[6].mxu1 }
 0x4af   :  { %v1176_v8 = vpop.f32.mrb[7].mxu1 }
 0x4c4   :  { %v7157_v11 = vpop.f32.mrb[8].mxu1 }
 0x4c5   :  { %v1288_v12 = vmax.f32 %v7133_v60, %v7157_v11  ;;  %v1255_v13 = vpop.f32.mrb[9].mxu1 }
 0x4c6   :  { %v1286_v14 = vmax.f32 %v1157_v61, %v1255_v13  ;;  %v7158_v16 = vpop.f32.mrb[10].mxu1 }
 0x4c7   :  { %v1289_v18 = vmax.f32 %v7134_v63, %v7158_v16  ;;  %v1258_v19 = vpop.f32.mrb[11].mxu1 }
 0x4c8   :  { %v1287_v22 = vmax.f32 %v1160_v1, %v1258_v19  ;;  %v1679_v1 = vld [vmem:[#allocation2] sm:$0xf] }
 0x4c9   :  { %v1295_v23 = vpack.c.bf16 %v1289_v18, %v1288_v12  ;;  %v1699_v12 = vld [vmem:[#allocation2 + $0x18] sm:$0xf] }
 0x4ca   :  { %v1294_v24 = vpack.c.bf16 %v1287_v22, %v1286_v14 }
 0x4cc   :  { %v7161_v25 = vpop.f32.mrb[12].mxu1  ;;  %7179 = vmatprep.mubr.bf16.mxu1 %v1294_v24  ;;  %7203 = vmatprep.mubr.bf16.mxu0 %v1294_v24  ;;  %v1702_v24 = vld [vmem:[#allocation2 + $0x1c] sm:$0x1] }
 0x4cd   :  { %v1292_v27 = vmax.f32 %v7137_v4, %v7161_v25  ;;  %v1271_v28 = vpop.f32.mrb[13].mxu1  ;;  %7180 = vmatmul.mubr.bf16.vlgmr.msra.gmra.mrb[16].mxu1 %v1295_v23  ;;  %7204 = vmatmul.mubr.bf16.vlgmr.msra.gmra.mrb[32].mxu0 %v1295_v23  ;;  %v1684_v4 = vld [vmem:[#allocation2 + $0x4] sm:$0x1] }
 0x4ce   :  { %v1290_v30 = vmax.f32 %v1173_v5, %v1271_v28  ;;  %v7162_v31 = vpop.f32.mrb[14].mxu1  ;;  %2074 = vmatpush1.bf16.msra.mxu1 %v7540_v35 }
 0x4cf   :  { %v1293_v32 = vmax.f32 %v7138_v7, %v7162_v31  ;;  %v1274_v33 = vpop.f32.mrb[15].mxu1  ;;  %2075 = vmatprep.subr.bf16.mxu1 %v8512_v0 }
 0x4d0   :  { %v1291_v53 = vmax.f32 %v1176_v8, %v1274_v33  ;;  %v1687_v33 = vld [vmem:[#allocation2 + $0x8] sm:$0xf] }
 0x4d1   :  { %v1297_v34 = vpack.c.bf16 %v1293_v32, %v1292_v27 }
 0x4d2   :  { %v1296_v15 = vpack.c.bf16 %v1291_v53, %v1290_v30  ;;  %2076 = vmatpush1.bf16.msra.mxu1 %v7541_v36 }
 0x4d3   :  { %2077 = vmatprep.subr.bf16.mxu1 %v8512_v0 }
 0x4d4   :  { %7183 = vmatprep.mubr.bf16.mxu1 %v1296_v15  ;;  %7207 = vmatprep.mubr.bf16.mxu0 %v1296_v15 }
 0x4d5   :  { %7184 = vmatmul.mubr.bf16.gmra.mrb[20].mxu1 %v1297_v34  ;;  %7208 = vmatmul.mubr.bf16.gmra.mrb[36].mxu0 %v1297_v34 }
 0x4d6   :  { %2078 = vmatpush1.bf16.msra.mxu1 %v7542_v37 }
 0x4d7   :  { %2079 = vmatprep.subr.bf16.mxu1 %v8512_v0 }
 0x4da   :  { %2080 = vmatpush1.bf16.msra.mxu1 %v7543_v29 }
 0x4db   :  { %2081 = vmatprep.subr.bf16.mxu1 %v8512_v0 }
 0x4de   :  { %2082 = vmatpush1.bf16.msra.mxu1 %v7544_v39  ;;  %v1690_v39 = vld [vmem:[#allocation2 + $0xc] sm:$0x1] }
 0x4df   :  { %2083 = vmatprep.subr.bf16.mxu1 %v8512_v0 }
 0x4e2   :  { %2084 = vmatpush1.bf16.msra.mxu1 %v7545_v40 }
 0x4e3   :  { %2085 = vmatprep.subr.bf16.mxu1 %v8512_v0 }
 0x4e6   :  { %2086 = vmatpush1.bf16.msra.mxu1 %v7546_v49 }
 0x4e7   :  { %2087 = vmatprep.subr.bf16.mxu1 %v8512_v0 }
 0x4ea   :  { %2088 = vmatpush1.bf16.msra.mxu1 %v7547_v41 }
 0x4eb   :  { %2089 = vmatprep.subr.bf16.mxu1 %v8512_v0 }
 0x4ee   :  { %2090 = vmatpush1.bf16.msra.mxu1 %v7548_v42 }
 0x4ef   :  { %2091 = vmatprep.subr.bf16.mxu1 %v8512_v0 }
 0x4f2   :  { %2092 = vmatpush1.bf16.msra.mxu1 %v7549_v43 }
 0x4f3   :  { %2093 = vmatprep.subr.bf16.mxu1 %v8512_v0 }
 0x4f6   :  { %2094 = vmatpush1.bf16.msra.mxu1 %v7550_v2 }
 0x4f7   :  { %2095 = vmatprep.subr.bf16.mxu1 %v8512_v0 }
 0x5a0   :  { %v7181_v44 = vpop.f32.mrb[16].mxu1  ;;  %v7205_v46 = vpop.f32.mrb[32].mxu0 }
 0x5a1   :  { %v1559_v20 = vmax.f32 %v7181_v44, %v7205_v46  ;;  %v1396_v47 = vpop.f32.mrb[17].mxu1  ;;  %v1526_v62 = vpop.f32.mrb[33].mxu0 }
 0x5a2   :  { %v1557_v10 = vmax.f32 %v1396_v47, %v1526_v62  ;;  %v7182_v21 = vpop.f32.mrb[18].mxu1  ;;  %v7206_v3 = vpop.f32.mrb[34].mxu0 }
 0x5a3   :  { %v6788_v48 = vpack.c.bf16 %v1559_v20, %v1559_v20  ;;  %v1560_v50 = vmax.f32 %v7182_v21, %v7206_v3  ;;  %v1399_v38 = vpop.f32.mrb[19].mxu1  ;;  %v1529_v45 = vpop.f32.mrb[35].mxu0 }
 0x5a4   :  { %v6786_v51 = vpack.c.bf16 %v1557_v10, %v1557_v10  ;;  %v1558_v52 = vmax.f32 %v1399_v38, %v1529_v45  ;;  %v1717_v38 = vld [vmem:[#allocation2 + $0x30] sm:$0xf]  ;;  %v1720_v45 = vld [vmem:[#allocation2 + $0x34] sm:$0x1] }
 0x5a5   :  { %v1614_v54 = vshrl.u32 %v6788_v48, 16  ;;  %v6789_v55 = vpack.c.bf16 %v1560_v50, %v1560_v50  ;;  %v1617_v61 = vshll.u32 %v6788_v48, 16 }
 0x5a6   :  { %v1598_v58 = vshrl.u32 %v6786_v51, 16  ;;  %v6787_v59 = vpack.c.bf16 %v1558_v52, %v1558_v52  ;;  %v1601_v63 = vshll.u32 %v6786_v51, 16 }
 0x5a7   :  { %v1616_v60 = vrot.slane %v1614_v54, 7  ;;  %v1622_v5 = vshrl.u32 %v6789_v55, 16  ;;  %v1625_v11 = vshll.u32 %v6789_v55, 16 }
 0x5a8   :  { %v1600_v8 = vrot.slane %v1598_v58, 7  ;;  %v1606_v13 = vshrl.u32 %v6787_v59, 16  ;;  %v1609_v14 = vshll.u32 %v6787_v59, 16  ;;  %v7185_v16 = vpop.f32.mrb[20].mxu1  ;;  %v7209_v18 = vpop.f32.mrb[36].mxu0 }
 0x5a9   :  { %v1619_v19 = vor.u32 %v1617_v61, %v1616_v60  ;;  %v1620_v22 = vrot.slane %v1616_v60, 4  ;;  %v1624_v23 = vrot.slane %v1622_v5, 7  ;;  %v1563_v25 = vmax.f32 %v7185_v16, %v7209_v18  ;;  %v1412_v27 = vpop.f32.mrb[21].mxu1  ;;  %v1542_v28 = vpop.f32.mrb[37].mxu0  ;;  %v1705_v58 = vld [vmem:[#allocation2 + $0x20] sm:$0xf] }
 0x5aa   :  { %v1603_v30 = vor.u32 %v1601_v63, %v1600_v8  ;;  %v1604_v31 = vrot.slane %v1600_v8, 4  ;;  %v1608_v32 = vrot.slane %v1606_v13, 7  ;;  %v1561_v53 = vmax.f32 %v1412_v27, %v1542_v28  ;;  %v7186_v34 = vpop.f32.mrb[22].mxu1  ;;  %v7210_v15 = vpop.f32.mrb[38].mxu0  ;;  %v1708_v59 = vld [vmem:[#allocation2 + $0x24] sm:$0x1] }
 0x5ab   :  { %v1694_v35 = vsel %vm9315_vm2, %v1619_v19, %v1693_v56  ;;  %v1697_v36 = vsel %vm9184_vm7, %v1620_v22, %v1696_v57  ;;  %v1627_v37 = vor.u32 %v1625_v11, %v1624_v23  ;;  %v1628_v29 = vrot.slane %v1624_v23, 4  ;;  %v1415_v40 = vpop.f32.mrb[23].mxu1  ;;  %v1545_v49 = vpop.f32.mrb[39].mxu0  ;;  %v1726_v13 = vld [vmem:[#allocation2 + $0x3c] sm:$0x1] }
 0x5ac   :  { %1695 = vst [vmem:[#allocation2 + $0x10] sm:$0xf] %v1694_v35  ;;  %1698 = vst [vmem:[#allocation2 + $0x14] sm:$0x1] %v1697_v36  ;;  %v1680_v41 = vsel %vm9315_vm2, %v1603_v30, %v1679_v1  ;;  %v1685_v42 = vsel %vm9184_vm7, %v1604_v31, %v1684_v4  ;;  %v1611_v43 = vor.u32 %v1609_v14, %v1608_v32  ;;  %v1612_v2 = vrot.slane %v1608_v32, 4 }
 0x5ad   :  { %1681 = vst [vmem:[#allocation2] sm:$0xf] %v1680_v41  ;;  %1686 = vst [vmem:[#allocation2 + $0x4] sm:$0x1] %v1685_v42  ;;  %v1700_v44 = vsel %vm9315_vm2, %v1627_v37, %v1699_v12  ;;  %v1703_v46 = vsel %vm9184_vm7, %v1628_v29, %v1702_v24  ;;  %v6792_v20 = vpack.c.bf16 %v1563_v25, %v1563_v25  ;;  %v1723_v12 = vld [vmem:[#allocation2 + $0x38] sm:$0xf] }
 0x5ae   :  { %v6790_v47 = vpack.c.bf16 %v1561_v53, %v1561_v53  ;;  %1701 = vst [vmem:[#allocation2 + $0x18] sm:$0xf] %v1700_v44  ;;  %1704 = vst [vmem:[#allocation2 + $0x1c] sm:$0x1] %v1703_v46  ;;  %v1688_v62 = vsel %vm9315_vm2, %v1611_v43, %v1687_v33  ;;  %v1691_v10 = vsel %vm9184_vm7, %v1612_v2, %v1690_v39  ;;  %v1711_v14 = vld [vmem:[#allocation2 + $0x28] sm:$0xf] }
 0x5af   :  { %v1564_v21 = vmax.f32 %v7186_v34, %v7210_v15  ;;  %v1562_v3 = vmax.f32 %v1415_v40, %v1545_v49  ;;  %1689 = vst [vmem:[#allocation2 + $0x8] sm:$0xf] %v1688_v62  ;;  %1692 = vst [vmem:[#allocation2 + $0xc] sm:$0x1] %v1691_v10  ;;  %v1646_v48 = vshrl.u32 %v6792_v20, 16  ;;  %v1649_v55 = vshll.u32 %v6792_v20, 16 }
 0x5b0   :  { %v1630_v50 = vshrl.u32 %v6790_v47, 16  ;;  %v1633_v57 = vshll.u32 %v6790_v47, 16  ;;  %v1714_v16 = vld [vmem:[#allocation2 + $0x2c] sm:$0x1]  ;;  %v7551_v2 = vld [vmem:[#allocation20 + $0x58] sm:$0xff]  }
 0x5b1   :  { %v6793_v51 = vpack.c.bf16 %v1564_v21, %v1564_v21  ;;  %v6791_v52 = vpack.c.bf16 %v1562_v3, %v1562_v3  ;;  %v1648_v54 = vrot.slane %v1646_v48, 7  ;;  %2096 = vmatpush1.bf16.msra.mxu1 %v7551_v2 }
 0x5b2   :  { %v1632_v56 = vrot.slane %v1630_v50, 7 }
 0x5b3   :  { %v1654_v60 = vshrl.u32 %v6793_v51, 16  ;;  %v1657_v61 = vshll.u32 %v6793_v51, 16  ;;  %v1638_v63 = vshrl.u32 %v6791_v52, 16  ;;  %v1641_v1 = vshll.u32 %v6791_v52, 16  ;;  %v9335_v18 = vld [vmem:[#allocation2 + $0x10] sm:$0xf] }
 0x5b4   :  { %v1651_v4 = vor.u32 %v1649_v55, %v1648_v54  ;;  %v1652_v5 = vrot.slane %v1648_v54, 4  ;;  %v1635_v8 = vor.u32 %v1633_v57, %v1632_v56  ;;  %v1636_v11 = vrot.slane %v1632_v56, 4  ;;  %v1739_v19 = vld [vmem:[#allocation2 + $0x14] sm:$0x1]  ;;  %v1737_v24 = vld [vmem:[#allocation2 + $0x4] sm:$0x1] }
 0x5b5   :  { %v1656_v22 = vrot.slane %v1654_v60, 7  ;;  %v1640_v23 = vrot.slane %v1638_v63, 7  ;;  %v1745_v25 = vld [vmem:[#allocation2] sm:$0xe]  ;;  %v9338_v27 = vcombine.low %v9335_v18, %v1739_v19  ;;  %v1747_v53 = vld [vmem:[#allocation2 + $0x10] sm:$0xe] }
 0x5b6   :  { %v1718_v28 = vsel %vm9315_vm2, %v1651_v4, %v1717_v38  ;;  %v1721_v30 = vsel %vm9184_vm7, %v1652_v5, %v1720_v45  ;;  %v1706_v31 = vsel %vm9315_vm2, %v1635_v8, %v1705_v58  ;;  %v1709_v32 = vsel %vm9184_vm7, %v1636_v11, %v1708_v59  ;;  %v9348_v33 = vld [vmem:[#allocation2] sm:$0xf]  ;;  %v9350_v34 = vld [vmem:[#allocation2 + $0x18] sm:$0xf]  ;;  %v1738_v29 = vld [vmem:[#allocation2 + $0xc] sm:$0x1] }
 0x5b7   :  { %1719 = vst [vmem:[#allocation2 + $0x30] sm:$0xf] %v1718_v28  ;;  %1722 = vst [vmem:[#allocation2 + $0x34] sm:$0x1] %v1721_v30  ;;  %v1659_v15 = vor.u32 %v1657_v61, %v1656_v22  ;;  %v1660_v35 = vrot.slane %v1656_v22, 4  ;;  %v1643_v36 = vor.u32 %v1641_v1, %v1640_v23  ;;  %v1644_v37 = vrot.slane %v1640_v23, 4 }
 0x5b8   :  { %1707 = vst [vmem:[#allocation2 + $0x20] sm:$0xf] %v1706_v31  ;;  %1710 = vst [vmem:[#allocation2 + $0x24] sm:$0x1] %v1709_v32  ;;  %v1746_v39 = vld [vmem:[#allocation2 + $0x8] sm:$0xe]  ;;  %v6449_v40 = vcombine.low %v1745_v25, %v1737_v24  ;;  %v6441_v41 = vcombine.low %v9348_v33, %v1737_v24  ;;  %v6451_v38 = vcombine.low %v1747_v53, %v1739_v19 }
 0x5b9   :  { %v6450_v49 = vcombine.low %v1746_v39, %v1738_v29  ;;  %v9353_v42 = vld [vmem:[#allocation2 + $0x8] sm:$0xf]  ;;  %v1740_v43 = vld [vmem:[#allocation2 + $0x1c] sm:$0x1]  ;;  %v1724_v44 = vsel %vm9315_vm2, %v1659_v15, %v1723_v12  ;;  %v1727_v46 = vsel %vm9184_vm7, %v1660_v35, %v1726_v13  ;;  %v1712_v20 = vsel %vm9315_vm2, %v1643_v36, %v1711_v14  ;;  %v1748_v62 = vld [vmem:[#allocation2 + $0x18] sm:$0xe] }
 0x5ba   :  { %v1715_v47 = vsel %vm9184_vm7, %v1644_v37, %v1714_v16  ;;  %1725 = vst [vmem:[#allocation2 + $0x38] sm:$0xf] %v1724_v44  ;;  %1728 = vst [vmem:[#allocation2 + $0x3c] sm:$0x1] %v1727_v46  ;;  %v1889_v10 = vrot.slane %v6449_v40, 1  ;;  %v1796_v3 = vshll.u32 %v6441_v41, 16  ;;  %v6442_v48 = vcombine.low %v9353_v42, %v1738_v29 }
 0x5bb   :  { %1713 = vst [vmem:[#allocation2 + $0x28] sm:$0xf] %v1712_v20  ;;  %1716 = vst [vmem:[#allocation2 + $0x2c] sm:$0x1] %v1715_v47  ;;  %v1890_v21 = vrot.slane %v6450_v49, 1  ;;  %v1810_v50 = vshll.u32 %v9338_v27, 16  ;;  %v6444_v45 = vcombine.low %v9350_v34, %v1740_v43  ;;  %v6452_v55 = vcombine.low %v1748_v62, %v1740_v43 }
 0x5bc   :  { %v1794_v52 = vshrl.u32 %v6441_v41, 16  ;;  %v1798_v54 = vrot.slane %v1796_v3, 1  ;;  %v1803_v56 = vshll.u32 %v6442_v48, 16  ;;  %v9367_v59 = vrot.slane %v6451_v38, 1 }
 0x5bd   :  { %v6459_v51 = vcombine.low %v1889_v10, %v1890_v21  ;;  %v1812_v57 = vrot.slane %v1810_v50, 1  ;;  %v1817_v60 = vshll.u32 %v6444_v45, 16  ;;  %v9369_v61 = vrot.slane %v6452_v55, 1 }
 0x5be   :  { %v1799_v58 = vor.u32 %v1798_v54, %v1794_v52  ;;  %v1801_v1 = vshrl.u32 %v6442_v48, 16  ;;  %v1805_v4 = vrot.slane %v1803_v56, 1  ;;  %v1808_v11 = vshrl.u32 %v9338_v27, 16  ;;  %v9376_v14 = vld [vmem:[#allocation2 + $0x30] sm:$0xf] }
 0x5bf   :  { %6478 = vmatprep.mubr.msk.bf16.mxu1 %vm1897_vm5, %v6459_v51  ;;  %v9371_v63 = vld [vmem:[#allocation2 + $0x20] sm:$0xf]  ;;  %v1741_v5 = vld [vmem:[#allocation2 + $0x24] sm:$0x1]  ;;  %v1819_v12 = vrot.slane %v1817_v60, 1  ;;  %v6461_v19 = vcombine.low %v9367_v59, %v9369_v61  ;;  %v1815_v32 = vshrl.u32 %v6444_v45, 16 }
 0x5c0   :  { %v1749_v8 = vld [vmem:[#allocation2 + $0x20] sm:$0xe]  ;;  %1849 = vrot.lane.b32.xlu0 %v1799_v58, %s8487_s3  ;;  %v6445_v13 = vcombine.low %v9371_v63, %v1741_v5  ;;  %v1743_v16 = vld [vmem:[#allocation2 + $0x34] sm:$0x1]  ;;  %v1806_v22 = vor.u32 %v1805_v4, %v1801_v1  ;;  %v1813_v31 = vor.u32 %v1812_v57, %v1808_v11  ;;  %v1751_v27 = vld [vmem:[#allocation2 + $0x30] sm:$0xe] }
 0x5c1   :  { %v6453_v23 = vcombine.low %v1749_v8, %v1741_v5  ;;  %v6447_v30 = vcombine.low %v9376_v14, %v1743_v16  ;;  %v1736_v37 = vld [vmem:[#allocation2 + $0x38] sm:$0xf]  ;;  %v1744_v29 = vld [vmem:[#allocation2 + $0x3c] sm:$0x1]  ;;  %v1820_v39 = vor.u32 %v1819_v12, %v1815_v32  ;;  %v6455_v20 = vcombine.low %v1751_v27, %v1743_v16 }
 0x5c2   :  { %v1734_v24 = vld [vmem:[#allocation2 + $0x28] sm:$0xf]  ;;  %v1742_v25 = vld [vmem:[#allocation2 + $0x2c] sm:$0x1]  ;;  %v1824_v53 = vshll.u32 %v6445_v13, 16  ;;  %1851 = vrot.lane.b32.xlu1 %v1806_v22, %s8487_s3  ;;  %v1822_v40 = vshrl.u32 %v6445_v13, 16  ;;  %v6448_v43 = vcombine.low %v1736_v37, %v1744_v29 }
 0x5c3   :  { %v1750_v28 = vld [vmem:[#allocation2 + $0x28] sm:$0xe]  ;;  %v6446_v15 = vcombine.low %v1734_v24, %v1742_v25  ;;  %v1838_v36 = vshll.u32 %v6447_v30, 16  ;;  %v1752_v41 = vld [vmem:[#allocation2 + $0x38] sm:$0xe]  ;;  %v1893_v2 = vrot.slane %v6453_v23, 1 }
 0x5c4   :  { %v6454_v35 = vcombine.low %v1750_v28, %v1742_v25  ;;  %1853 = vrot.lane.b32.xlu0 %v1813_v31, %s8487_s3  ;;  %v1826_v49 = vrot.slane %v1824_v53, 1  ;;  %v1845_v10 = vshll.u32 %v6448_v43, 16  ;;  %v6456_v48 = vcombine.low %v1752_v41, %v1744_v29 }
 0x5c5   :  { %v1831_v44 = vshll.u32 %v6446_v15, 16  ;;  %v1840_v62 = vrot.slane %v1838_v36, 1  ;;  %v1829_v21 = vshrl.u32 %v6446_v15, 16  ;;  %v1836_v38 = vshrl.u32 %v6447_v30, 16  ;;  %v7552_v30 = vld [vmem:[#allocation43] sm:$0xff]  }
 0x5c6   :  { %v1894_v46 = vrot.slane %v6454_v35, 1  ;;  %v1827_v47 = vor.u32 %v1826_v49, %v1822_v40  ;;  %1855 = vrot.lane.b32.xlu1 %v1820_v39, %s8487_s3  ;;  %v1895_v51 = vrot.slane %v6455_v20, 1  ;;  %v1847_v52 = vrot.slane %v1845_v10, 1  ;;  %7219 = vmatprep.mubr.msk.bf16.mxu0 %vm1897_vm5, %v7552_v30 }
 0x5c7   :  { %v1833_v3 = vrot.slane %v1831_v44, 1  ;;  %v1896_v54 = vrot.slane %v6456_v48, 1  ;;  %v1841_v55 = vor.u32 %v1840_v62, %v1836_v38  ;;  %v1843_v56 = vshrl.u32 %v6448_v43, 16 }
 0x5c8   :  { %v6463_v50 = vcombine.low %v1893_v2, %v1894_v46  ;;  %1857 = vrot.lane.b32.xlu0 %v1827_v47, %s8487_s3 }
 0x5c9   :  { %v1834_v45 = vor.u32 %v1833_v3, %v1829_v21  ;;  %v6465_v57 = vcombine.low %v1895_v51, %v1896_v54  ;;  %v1848_v58 = vor.u32 %v1847_v52, %v1843_v56 }
 0x5cb   :  { %1859 = vrot.lane.b32.xlu1 %v1834_v45, %s8487_s3 }
 0x5cc   :  { %1861 = vrot.lane.b32.xlu0 %v1841_v55, %s8487_s3 }
 0x5cf   :  { %1863 = vrot.lane.b32.xlu1 %v1848_v58, %s8487_s3 }
 0x632   :  { %v1850_v59 = vpop.permute.xlu0 %1849 }
 0x633   :  { %v1900_v61 = vsel %vm1897_vm5, %v9348_v33, %v1850_v59 }
 0x634   :  { %v1852_v60 = vpop.permute.xlu1 %1851 }
 0x635   :  { %v1903_v1 = vsel %vm1897_vm5, %v9353_v42, %v1852_v60 }
 0x636   :  { %v6458_v4 = vcombine.low %v1900_v61, %v1903_v1  ;;  %v1854_v8 = vpop.permute.xlu0 %1853 }
 0x637   :  { %v1906_v12 = vsel %vm1897_vm5, %v9335_v18, %v1854_v8  ;;  %v7553_v8 = vld [vmem:[#allocation43 + $0x8] sm:$0xff]  }
 0x638   :  { %v1856_v5 = vpop.permute.xlu1 %1855  ;;  %2106 = vmatmul.mubr.bf16.vlgmr.msra.gmra.mrb[24].mxu1 %v6458_v4 }
 0x639   :  { %6479 = vmatprep.mubr.msk.bf16.mxu1 %vm1897_vm5, %v6461_v19  ;;  %v1909_v11 = vsel %vm1897_vm5, %v9350_v34, %v1856_v5 }
 0x63a   :  { %v6460_v13 = vcombine.low %v1906_v12, %v1909_v11  ;;  %v1858_v33 = vpop.permute.xlu0 %1857  ;;  %v2174_v11 = vld [vmem:[#allocation7] sm:$0xf]  ;;  %v2177_v12 = vld [vmem:[#allocation7 + $0x4] sm:$0x1] }
 0x63b   :  { %v1912_v22 = vsel %vm1897_vm5, %v9371_v63, %v1858_v33 }
 0x63d   :  { %v1860_v16 = vpop.permute.xlu1 %1859 }
 0x63e   :  { %v1915_v42 = vsel %vm1897_vm5, %v1734_v24, %v1860_v16  ;;  %v1862_v34 = vpop.permute.xlu0 %1861  ;;  %v6457_v24 = vld [vmem:[#allocation22] ss:$0 sm:$0xff] }
 0x63f   :  { %v6462_v23 = vcombine.low %v1912_v22, %v1915_v42  ;;  %v1918_v18 = vsel %vm1897_vm5, %v9376_v14, %v1862_v34 }
 0x640   :  { %2114 = vmatmul.mubr.bf16.gmra.mrb[28].mxu1 %v6460_v13  ;;  %v7554_v13 = vld [vmem:[#allocation43 + $0x10] sm:$0xff]  }
 0x641   :  { %6480 = vmatprep.mubr.msk.bf16.mxu1 %vm1897_vm5, %v6463_v50  ;;  %v1864_v19 = vpop.permute.xlu1 %1863 }
 0x642   :  { %v1921_v25 = vsel %vm1897_vm5, %v1736_v37, %v1864_v19  ;;  %v2183_v19 = vld [vmem:[#allocation7 + $0xc] sm:$0x1] }
 0x643   :  { %v6464_v28 = vcombine.low %v1918_v18, %v1921_v25 }
 0x648   :  { %2122 = vmatmul.mubr.bf16.gmra.mrb[32].mxu1 %v6462_v23  ;;  %v2180_v23 = vld [vmem:[#allocation7 + $0x8] sm:$0xf] }
 0x649   :  { %6481 = vmatprep.mubr.msk.bf16.mxu1 %vm1897_vm5, %v6465_v57 }
 0x650   :  { %2130 = vmatmul.mubr.bf16.gmra.mrb[36].mxu1 %v6464_v28 }
 0x70b   :  { %v2107_v31 = vpop.f32.mrb[24].mxu1 }
 0x70c   :  { %v2108_v32 = vadd.f32 %v6457_v24, %v2107_v31  ;;  %v2109_v63 = vpop.f32.mrb[25].mxu1 }
 0x70d   :  { %v2110_v53 = vpop.f32.mrb[26].mxu1 }
 0x70e   :  { %v2111_v27 = vadd.f32 %v6457_v24, %v2110_v53  ;;  %v2112_v15 = vpop.f32.mrb[27].mxu1  ;;  %v2138_v35 = vmax.f32 %v2108_v32, 0.0 }
 0x710   :  { %v2139_v36 = vmax.f32 %v2111_v27, 0.0 }
 0x712   :  { %v2186_v29 = vpack.c.bf16 %v2139_v36, %v2138_v35  ;;  %v7555_v35 = vld [vmem:[#allocation43 + $0x18] sm:$0xff]  }
 0x713   :  { %v2115_v39 = vpop.f32.mrb[28].mxu1 }
 0x714   :  { %v2116_v37 = vadd.f32 %v6457_v24, %v2115_v39  ;;  %v2117_v40 = vpop.f32.mrb[29].mxu1  ;;  %7211 = vmatprep.subr.bf16.mxu0 %v2186_v29 }
 0x715   :  { %v2118_v14 = vpop.f32.mrb[30].mxu1  ;;  %7212 = vmatpush3.bf16.msra.mxu0 %v2186_v29  ;;  %v7557_v40 = vld [vmem:[#allocation44 + $0x8] sm:$0xff]  }
 0x716   :  { %v2119_v49 = vadd.f32 %v6457_v24, %v2118_v14  ;;  %v2120_v41 = vpop.f32.mrb[31].mxu1  ;;  %v2140_v43 = vmax.f32 %v2116_v37, 0.0  ;;  %v7556_v37 = vld [vmem:[#allocation44] sm:$0xff]   ;;  %v7558_v14 = vld [vmem:[#allocation44 + $0x10] sm:$0xff]  }
 0x717   :  { %v7560_v41 = vld [vmem:[#allocation44 + $0x20] sm:$0xff]  }
 0x718   :  { %v2141_v2 = vmax.f32 %v2119_v49, 0.0  ;;  %v7559_v49 = vld [vmem:[#allocation44 + $0x18] sm:$0xff]  }
 0x71a   :  { %v2187_v44 = vpack.c.bf16 %v2141_v2, %v2140_v43 }
 0x71b   :  { %v2123_v46 = vpop.f32.mrb[32].mxu1 }
 0x71c   :  { %v2124_v20 = vadd.f32 %v6457_v24, %v2123_v46  ;;  %v2125_v47 = vpop.f32.mrb[33].mxu1  ;;  %7213 = vmatprep.subr.bf16.mxu0 %v2187_v44 }
 0x71d   :  { %v2126_v62 = vpop.f32.mrb[34].mxu1  ;;  %7214 = vmatpush3.bf16.msra.mxu0 %v2187_v44 }
 0x71e   :  { %v2127_v10 = vadd.f32 %v6457_v24, %v2126_v62  ;;  %v2128_v21 = vpop.f32.mrb[35].mxu1  ;;  %v2142_v3 = vmax.f32 %v2124_v20, 0.0 }
 0x720   :  { %v2143_v48 = vmax.f32 %v2127_v10, 0.0 }
 0x722   :  { %v2188_v50 = vpack.c.bf16 %v2143_v48, %v2142_v3 }
 0x723   :  { %v2131_v38 = vpop.f32.mrb[36].mxu1 }
 0x724   :  { %v2132_v45 = vadd.f32 %v6457_v24, %v2131_v38  ;;  %v2133_v51 = vpop.f32.mrb[37].mxu1  ;;  %7215 = vmatprep.subr.bf16.mxu0 %v2188_v50 }
 0x725   :  { %v2134_v52 = vpop.f32.mrb[38].mxu1  ;;  %7216 = vmatpush3.bf16.msra.mxu0 %v2188_v50  ;;  %v7561_v51 = vld [vmem:[#allocation44 + $0x28] sm:$0xff]  }
 0x726   :  { %v2144_v54 = vmax.f32 %v2132_v45, 0.0  ;;  %v2135_v55 = vadd.f32 %v6457_v24, %v2134_v52  ;;  %v2136_v56 = vpop.f32.mrb[39].mxu1  ;;  %v7562_v52 = vld [vmem:[#allocation44 + $0x30] sm:$0xff]  }
 0x728   :  { %v6794_v57 = vpack.c.bf16 %v2144_v54, %v2144_v54  ;;  %v2145_v58 = vmax.f32 %v2135_v55, 0.0 }
 0x72a   :  { %v2155_v59 = vshrl.u32 %v6794_v57, 16  ;;  %v6795_v60 = vpack.c.bf16 %v2145_v58, %v2145_v58  ;;  %v2189_v61 = vpack.c.bf16 %v2145_v58, %v2144_v54  ;;  %v2158_v4 = vshll.u32 %v6794_v57, 16  ;;  %v7563_v54 = vld [vmem:[#allocation44 + $0x38] sm:$0xff]  }
 0x72c   :  { %v2157_v1 = vrot.slane %v2155_v59, 7  ;;  %v2163_v5 = vshrl.u32 %v6795_v60, 16  ;;  %7217 = vmatprep.subr.bf16.mxu0 %v2189_v61  ;;  %v2166_v22 = vshll.u32 %v6795_v60, 16 }
 0x72d   :  { %7218 = vmatpush3.bf16.msra.mxu0 %v2189_v61 }
 0x72e   :  { %v2160_v16 = vor.u32 %v2158_v4, %v2157_v1  ;;  %v2161_v33 = vrot.slane %v2157_v1, 4  ;;  %v2165_v42 = vrot.slane %v2163_v5, 7  ;;  %7223 = vmatprep.subr.bf16.mxu0 %v2186_v29 }
 0x730   :  { %v2175_v34 = vsel %vm9315_vm2, %v2160_v16, %v2174_v11  ;;  %v2178_v25 = vsel %vm9184_vm7, %v2161_v33, %v2177_v12  ;;  %v2168_v18 = vor.u32 %v2166_v22, %v2165_v42  ;;  %v2169_v28 = vrot.slane %v2165_v42, 4  ;;  %7220 = vmatmul.mubr.msk.bf16.vlgmr.msra.gmra.mrb[40].mxu0 %vm1897_vm5, %v7553_v8 }
 0x731   :  { %2176 = vst [vmem:[#allocation7] sm:$0xf] %v2175_v34  ;;  %2179 = vst [vmem:[#allocation7 + $0x4] sm:$0x1] %v2178_v25  ;;  %7224 = vmatpush3.bf16.msra.mxu0 %v2186_v29  ;;  %7231 = vmatprep.mubr.msk.bf16.mxu0 %vm1897_vm5, %v7554_v13 }
 0x732   :  { %v2181_v30 = vsel %vm9315_vm2, %v2168_v18, %v2180_v23  ;;  %v2184_v24 = vsel %vm9184_vm7, %v2169_v28, %v2183_v19  ;;  %7225 = vmatprep.subr.bf16.mxu0 %v2187_v44 }
 0x733   :  { %2182 = vst [vmem:[#allocation7 + $0x8] sm:$0xf] %v2181_v30  ;;  %2185 = vst [vmem:[#allocation7 + $0xc] sm:$0x1] %v2184_v24 }
 0x735   :  { %7226 = vmatpush3.bf16.msra.mxu0 %v2187_v44 }
 0x736   :  { %7227 = vmatprep.subr.bf16.mxu0 %v2188_v50 }
 0x738   :  { %v4614_v31 = vld [vmem:[#allocation7 + $0x4] sm:$0x1]  ;;  %v4616_v32 = vld [vmem:[#allocation7] sm:$0xe] }
 0x739   :  { %7228 = vmatpush3.bf16.msra.mxu0 %v2188_v50  ;;  %v6641_v63 = vcombine.low %v4616_v32, %v4614_v31 }
 0x73a   :  { %7229 = vmatprep.subr.bf16.mxu0 %v2189_v61  ;;  %v4615_v53 = vld [vmem:[#allocation7 + $0xc] sm:$0x1]  ;;  %v4617_v27 = vld [vmem:[#allocation7 + $0x8] sm:$0xe] }
 0x73b   :  { %v6642_v15 = vcombine.low %v4617_v27, %v4615_v53  ;;  %v9416_v36 = vrot.slane %v6641_v63, 1  ;;  %v2631_v63 = vld [vmem:[#allocation3 + $0x10] sm:$0x7] }
 0x73d   :  { %7230 = vmatpush3.bf16.msra.mxu0 %v2189_v61  ;;  %v9418_v29 = vrot.slane %v6642_v15, 1 }
 0x73e   :  { %7235 = vmatprep.subr.bf16.mxu0 %v7556_v37 }
 0x73f   :  { %v6646_v39 = vcombine.low %v9416_v36, %v9418_v29 }
 0x740   :  { %7232 = vmatmul.mubr.msk.bf16.vlgmr.msra.gmra.mrb[44].mxu0 %vm1897_vm5, %v7555_v35 }
 0x741   :  { %7236 = vmatpush3.bf16.msra.mxu0 %v7556_v37 }
 0x742   :  { %7237 = vmatprep.subr.bf16.mxu0 %v7557_v40 }
 0x745   :  { %7238 = vmatpush3.bf16.msra.mxu0 %v7557_v40 }
 0x746   :  { %7239 = vmatprep.subr.bf16.mxu0 %v7558_v14 }
 0x749   :  { %7240 = vmatpush3.bf16.msra.mxu0 %v7558_v14  ;;  %v2619_v14 = vld [vmem:[#allocation3] sm:$0x7] }
 0x74a   :  { %7241 = vmatprep.subr.bf16.mxu0 %v7559_v49 }
 0x74d   :  { %7242 = vmatpush3.bf16.msra.mxu0 %v7559_v49 }
 0x74e   :  { %7247 = vmatprep.subr.bf16.mxu0 %v7560_v41 }
 0x803   :  { %v7221_v43 = vpop.f32.mrb[40].mxu0 }
 0x804   :  { %v2244_v2 = vpop.f32.mrb[41].mxu0 }
 0x805   :  { %v7222_v44 = vpop.f32.mrb[42].mxu0 }
 0x806   :  { %v2247_v46 = vpop.f32.mrb[43].mxu0 }
 0x813   :  { %v7233_v20 = vpop.f32.mrb[44].mxu0 }
 0x814   :  { %v2331_v47 = vmax.f32 %v7221_v43, %v7233_v20  ;;  %v2314_v62 = vpop.f32.mrb[45].mxu0  ;;  %v2634_v43 = vld [vmem:[#allocation3 + $0x14] sm:$0x7] }
 0x815   :  { %v2329_v10 = vmax.f32 %v2244_v2, %v2314_v62  ;;  %v7234_v21 = vpop.f32.mrb[46].mxu0 }
 0x816   :  { %v2332_v3 = vmax.f32 %v7222_v44, %v7234_v21  ;;  %v2317_v48 = vpop.f32.mrb[47].mxu0 }
 0x817   :  { %v2330_v50 = vmax.f32 %v2247_v46, %v2317_v48 }
 0x818   :  { %v2334_v38 = vpack.c.bf16 %v2332_v3, %v2331_v47  ;;  %v2637_v3 = vld [vmem:[#allocation3 + $0x18] sm:$0x7] }
 0x819   :  { %v2333_v45 = vpack.c.bf16 %v2330_v50, %v2329_v10  ;;  %v2622_v10 = vld [vmem:[#allocation3 + $0x4] sm:$0x7] }
 0x81b   :  { %7243 = vmatprep.mubr.msk.bf16.mxu0 %vm1897_vm5, %v2333_v45 }
 0x81c   :  { %7244 = vmatmul.mubr.msk.bf16.vlgmr.msra.gmra.mrb[48].mxu0 %vm1897_vm5, %v2334_v38 }
 0x81d   :  { %7248 = vmatpush3.bf16.msra.mxu0 %v7560_v41  ;;  %7255 = vmatprep.mubr.msk.bf16.mxu0 %vm1897_vm5, %v2333_v45 }
 0x81e   :  { %7249 = vmatprep.subr.bf16.mxu0 %v7561_v51 }
 0x821   :  { %7250 = vmatpush3.bf16.msra.mxu0 %v7561_v51  ;;  %v2640_v51 = vld [vmem:[#allocation3 + $0x1c] sm:$0x7] }
 0x822   :  { %7251 = vmatprep.subr.bf16.mxu0 %v7562_v52 }
 0x825   :  { %7252 = vmatpush3.bf16.msra.mxu0 %v7562_v52 }
 0x826   :  { %7253 = vmatprep.subr.bf16.mxu0 %v7563_v54 }
 0x829   :  { %7254 = vmatpush3.bf16.msra.mxu0 %v7563_v54 }
 0x82c   :  { %7256 = vmatmul.mubr.msk.bf16.vlgmr.msra.gmra.mrb[52].mxu0 %vm1897_vm5, %v2334_v38 }
 0x8ef   :  { %v7245_v55 = vpop.f32.mrb[48].mxu0 }
 0x8f0   :  { %v2407_v56 = vpop.f32.mrb[49].mxu0 }
 0x8f1   :  { %v7246_v57 = vpop.f32.mrb[50].mxu0 }
 0x8f2   :  { %v2410_v58 = vpop.f32.mrb[51].mxu0 }
 0x8ff   :  { %v7257_v59 = vpop.f32.mrb[52].mxu0 }
 0x900   :  { %v2506_v60 = vmax.f32 %v7245_v55, %v7257_v59  ;;  %v2489_v61 = vpop.f32.mrb[53].mxu0 }
 0x901   :  { %v2504_v1 = vmax.f32 %v2407_v56, %v2489_v61  ;;  %v7258_v4 = vpop.f32.mrb[54].mxu0 }
 0x902   :  { %v2514_v5 = vcombine.high %v2506_v60, %v2506_v60  ;;  %v6800_v8 = vpack.c.bf16 %v2506_v60, %v2506_v60  ;;  %v2507_v11 = vmax.f32 %v7246_v57, %v7258_v4  ;;  %v2492_v12 = vpop.f32.mrb[55].mxu0 }
 0x903   :  { %v2512_v13 = vcombine.high %v2504_v1, %v2504_v1  ;;  %v6796_v16 = vpack.c.bf16 %v2504_v1, %v2504_v1  ;;  %v2505_v33 = vmax.f32 %v2410_v58, %v2492_v12 }
 0x904   :  { %v6801_v42 = vpack.c.bf16 %v2514_v5, %v2514_v5  ;;  %v2581_v22 = vshrl.u32 %v6800_v8, 16  ;;  %v2584_v0 = vshll.u32 %v6800_v8, 16  ;;  %v2515_v23 = vcombine.high %v2507_v11, %v2507_v11 }
 0x905   :  { %v6797_v19 = vpack.c.bf16 %v2512_v13, %v2512_v13  ;;  %v2553_v34 = vshrl.u32 %v6796_v16, 16  ;;  %v2556_v25 = vshll.u32 %v6796_v16, 16  ;;  %v6802_v18 = vpack.c.bf16 %v2507_v11, %v2507_v11  ;;  %v2625_v11 = vld [vmem:[#allocation3 + $0x8] sm:$0x7]  ;;  %v2628_v13 = vld [vmem:[#allocation3 + $0xc] sm:$0x7] }
 0x906   :  { %v2583_v28 = vrot.slane %v2581_v22, 7  ;;  %v2588_v30 = vshrl.u32 %v6801_v42, 16  ;;  %v2591_v24 = vshll.u32 %v6801_v42, 16  ;;  %v6803_v31 = vpack.c.bf16 %v2515_v23, %v2515_v23  ;;  %v7580_v16 = vld [vmem:[#allocation23] sm:$0xff]  }
 0x907   :  { %v2555_v53 = vrot.slane %v2553_v34, 7  ;;  %v2560_v27 = vshrl.u32 %v6797_v19, 16  ;;  %v2563_v15 = vshll.u32 %v6797_v19, 16  ;;  %v2595_v35 = vshrl.u32 %v6802_v18, 16  ;;  %7259 = vmatprep.subr.bf16.mxu1 %v7580_v16 }
 0x908   :  { %v2586_v37 = vor.u32 %v2584_v0, %v2583_v28  ;;  %v2590_v40 = vrot.slane %v2588_v30, 7  ;;  %v2598_v49 = vshll.u32 %v6802_v18, 16  ;;  %v2602_v41 = vshrl.u32 %v6803_v31, 16  ;;  %7260 = vmatpush3.bf16.msra.mxu1 %v7580_v16 }
 0x909   :  { %v2558_v2 = vor.u32 %v2556_v25, %v2555_v53  ;;  %v2562_v44 = vrot.slane %v2560_v27, 7  ;;  %v2597_v46 = vrot.slane %v2595_v35, 7  ;;  %v2605_v20 = vshll.u32 %v6803_v31, 16 }
 0x90a   :  { %v2593_v47 = vor.u32 %v2591_v24, %v2590_v40  ;;  %v2632_v62 = vsel %vm9465_vm10, %v2586_v37, %v2631_v63  ;;  %v2604_v21 = vrot.slane %v2602_v41, 7  ;;  %v2513_v48 = vcombine.high %v2505_v33, %v2505_v33 }
 0x90b   :  { %2633 = vst [vmem:[#allocation3 + $0x10] sm:$0x7] %v2632_v62  ;;  %v2565_v50 = vor.u32 %v2563_v15, %v2562_v44  ;;  %v2620_v38 = vsel %vm9465_vm10, %v2558_v2, %v2619_v14  ;;  %v2600_v45 = vor.u32 %v2598_v49, %v2597_v46  ;;  %v6798_v52 = vpack.c.bf16 %v2505_v33, %v2505_v33 }
 0x90c   :  { %v2635_v54 = vsel %vm9465_vm10, %v2593_v47, %v2634_v43  ;;  %2621 = vst [vmem:[#allocation3] sm:$0x7] %v2620_v38  ;;  %v2607_v55 = vor.u32 %v2605_v20, %v2604_v21  ;;  %v6799_v56 = vpack.c.bf16 %v2513_v48, %v2513_v48 }
 0x90d   :  { %2636 = vst [vmem:[#allocation3 + $0x14] sm:$0x7] %v2635_v54  ;;  %v2623_v57 = vsel %vm9465_vm10, %v2565_v50, %v2622_v10  ;;  %v2638_v58 = vsel %vm9465_vm10, %v2600_v45, %v2637_v3  ;;  %v2567_v59 = vshrl.u32 %v6798_v52, 16  ;;  %v2570_v4 = vshll.u32 %v6798_v52, 16 }
 0x90e   :  { %2624 = vst [vmem:[#allocation3 + $0x4] sm:$0x7] %v2623_v57  ;;  %2639 = vst [vmem:[#allocation3 + $0x18] sm:$0x7] %v2638_v58  ;;  %v2641_v60 = vsel %vm9465_vm10, %v2607_v55, %v2640_v51  ;;  %v2574_v61 = vshrl.u32 %v6799_v56, 16  ;;  %v2577_v8 = vshll.u32 %v6799_v56, 16 }
 0x90f   :  { %2642 = vst [vmem:[#allocation3 + $0x1c] sm:$0x7] %v2641_v60  ;;  %v2569_v1 = vrot.slane %v2567_v59, 7  ;;  %v7581_v60 = vld [vmem:[#allocation23 + $0x8] sm:$0xff]  }
 0x910   :  { %v2576_v5 = vrot.slane %v2574_v61, 7  ;;  %7261 = vmatprep.subr.bf16.mxu1 %v7581_v60 }
 0x911   :  { %v2572_v12 = vor.u32 %v2570_v4, %v2569_v1  ;;  %v7582_v1 = vld [vmem:[#allocation23 + $0x10] sm:$0xff]   ;;  %7262 = vmatpush3.bf16.msra.mxu1 %v7581_v60 }
 0x912   :  { %v2579_v33 = vor.u32 %v2577_v8, %v2576_v5  ;;  %v7564_v42 = vld [vmem:[#allocation3 + $0x10] ss:$0 sps:$4 sm:$0x66]   ;;  %7263 = vmatprep.subr.bf16.mxu1 %v7582_v1 }
 0x913   :  { %v2626_v22 = vsel %vm9465_vm10, %v2572_v12, %v2625_v11  ;;  %v7566_v0 = vld [vmem:[#allocation3] ss:$0 sps:$4 sm:$0x66]   ;;  %v2791_v19 = vrot.slane %v7564_v42, 1 }
 0x914   :  { %2627 = vst [vmem:[#allocation3 + $0x8] sm:$0x7] %v2626_v22  ;;  %v2629_v23 = vsel %vm9465_vm10, %v2579_v33, %v2628_v13  ;;  %v7565_v34 = vld [vmem:[#allocation3 + $0x14] ss:$0 sps:$4 sm:$0x66]   ;;  %v2787_v24 = vrot.slane %v7566_v0, 1 }
 0x915   :  { %2630 = vst [vmem:[#allocation3 + $0xc] sm:$0x7] %v2629_v23  ;;  %v7567_v25 = vld [vmem:[#allocation3 + $0x4] ss:$0 sps:$4 sm:$0x66]   ;;  %2803 = vrot.lane.b32.xlu0 %v2791_v19, %s8487_s3  ;;  %v2792_v18 = vrot.slane %v7565_v34, 1  ;;  %7264 = vmatpush3.bf16.msra.mxu1 %v7582_v1 }
 0x916   :  { %v7570_v28 = vld [vmem:[#allocation3 + $0x10] ss:$0 sps:$4 sm:$0x77]   ;;  %v7571_v30 = vld [vmem:[#allocation3 + $0x14] ss:$0 sps:$4 sm:$0x77]  }
 0x917   :  { %2805 = vrot.lane.b32.xlu1 %v2792_v18, %s8487_s3  ;;  %v2722_v31 = vshll.u32 %v7570_v28, 16  ;;  %v2729_v63 = vshll.u32 %v7571_v30, 16  ;;  %v7572_v53 = vld [vmem:[#allocation3] ss:$0 sps:$4 sm:$0x77]   ;;  %v2788_v27 = vrot.slane %v7567_v25, 1 }
 0x918   :  { %v7573_v15 = vld [vmem:[#allocation3 + $0x4] ss:$0 sps:$4 sm:$0x77]   ;;  %v2694_v41 = vshll.u32 %v7572_v53, 16  ;;  %v2720_v46 = vshrl.u32 %v7570_v28, 16  ;;  %v2727_v47 = vshrl.u32 %v7571_v30, 16 }
 0x919   :  { %2795 = vrot.lane.b32.xlu0 %v2787_v24, %s8487_s3  ;;  %v2724_v40 = vrot.slane %v2722_v31, 1  ;;  %v2731_v49 = vrot.slane %v2729_v63, 1  ;;  %v7574_v43 = vld [vmem:[#allocation3 + $0x18] ss:$0 sps:$4 sm:$0x77]   ;;  %v2701_v44 = vshll.u32 %v7573_v15, 16 }
 0x91a   :  { %v7575_v20 = vld [vmem:[#allocation3 + $0x1c] ss:$0 sps:$4 sm:$0x77]   ;;  %v2696_v62 = vrot.slane %v2694_v41, 1  ;;  %v2736_v10 = vshll.u32 %v7574_v43, 16  ;;  %v2692_v51 = vshrl.u32 %v7572_v53, 16  ;;  %v2884_v41 = vlaneseq }
 0x91b   :  { %v7568_v35 = vld [vmem:[#allocation3 + $0x8] ss:$0 sps:$4 sm:$0x66]   ;;  %2797 = vrot.lane.b32.xlu1 %v2788_v27, %s8487_s3  ;;  %v2725_v21 = vor.u32 %v2724_v40, %v2720_v46  ;;  %v2732_v50 = vor.u32 %v2731_v49, %v2727_v47  ;;  %v2703_v38 = vrot.slane %v2701_v44, 1  ;;  %v2743_v45 = vshll.u32 %v7575_v20, 16  ;;  %v7584_v19 = vld [vmem:[#allocation23 + $0x20] sm:$0xff]  }
 0x91c   :  { %v7569_v37 = vld [vmem:[#allocation3 + $0xc] ss:$0 sps:$4 sm:$0x66]   ;;  %v2789_v14 = vrot.slane %v7568_v35, 1  ;;  %v2699_v52 = vshrl.u32 %v7573_v15, 16  ;;  %v2697_v54 = vor.u32 %v2696_v62, %v2692_v51  ;;  %v2738_v55 = vrot.slane %v2736_v10, 1 }
 0x91d   :  { %v2790_v2 = vrot.slane %v7569_v37, 1  ;;  %v7576_v3 = vld [vmem:[#allocation3 + $0x8] ss:$0 sps:$4 sm:$0x77]   ;;  %v2745_v58 = vrot.slane %v2743_v45, 1  ;;  %v2734_v61 = vshrl.u32 %v7574_v43, 16 }
 0x91e   :  { %2799 = vrot.lane.b32.xlu0 %v2789_v14, %s8487_s3  ;;  %v7577_v48 = vld [vmem:[#allocation3 + $0xc] ss:$0 sps:$4 sm:$0x77]   ;;  %v2708_v56 = vshll.u32 %v7576_v3, 16  ;;  %v2704_v57 = vor.u32 %v2703_v38, %v2699_v52  ;;  %v2741_v4 = vshrl.u32 %v7575_v20, 16  ;;  %v7583_v13 = vld [vmem:[#allocation23 + $0x18] sm:$0xff]  }
 0x91f   :  { %2801 = vrot.lane.b32.xlu1 %v2790_v2, %s8487_s3  ;;  %v2715_v59 = vshll.u32 %v7577_v48, 16  ;;  %v2739_v5 = vor.u32 %v2738_v55, %v2734_v61  ;;  %v2706_v16 = vshrl.u32 %v7576_v3, 16  ;;  %v2713_v33 = vshrl.u32 %v7577_v48, 16  ;;  %v7578_v22 = vld [vmem:[#allocation3 + $0x18] ss:$0 sps:$4 sm:$0x66]   ;;  %7265 = vmatprep.subr.bf16.mxu1 %v7583_v13 }
 0x920   :  { %v2710_v8 = vrot.slane %v2708_v56, 1  ;;  %v2746_v11 = vor.u32 %v2745_v58, %v2741_v4  ;;  %v7579_v23 = vld [vmem:[#allocation3 + $0x1c] ss:$0 sps:$4 sm:$0x66]   ;;  %v2793_v34 = vrot.slane %v7578_v22, 1  ;;  %7266 = vmatpush3.bf16.msra.mxu1 %v7583_v13  ;;  %v7585_v18 = vld [vmem:[#allocation23 + $0x28] sm:$0xff]  }
 0x921   :  { %v2717_v12 = vrot.slane %v2715_v59, 1  ;;  %v2794_v25 = vrot.slane %v7579_v23, 1  ;;  %7267 = vmatprep.subr.bf16.mxu1 %v7584_v19  ;;  %v2644_v40 = vld [vmem:[#allocation3 + $0x4] sm:$0x3]  ;;  %v8516_v14 = vmov 1983009808  }
 0x922   :  { %2755 = vrot.lane.b32.xlu0 %v2725_v21, %s8515_s10  ;;  %v2711_v42 = vor.u32 %v2710_v8, %v2706_v16  ;;  %v2882_v49 = vunpack.c.l.s4 %v8516_v14  ;;  %v2643_v44 = vld [vmem:[#allocation3] sm:$0x3]  ;;  %v2648_v20 = vld [vmem:[#allocation3 + $0x14] sm:$0x3]  ;;  %v2647_v21 = vld [vmem:[#allocation3 + $0x10] sm:$0x3] }
 0x923   :  { %2757 = vrot.lane.b32.xlu1 %v2732_v50, %s8515_s10  ;;  %v2718_v0 = vor.u32 %v2717_v12, %v2713_v33  ;;  %v2885_v48 = vshrl.u32 %v2884_v41, 7  ;;  %v2645_v38 = vld [vmem:[#allocation3 + $0x8] sm:$0x3]  ;;  %v2646_v55 = vld [vmem:[#allocation3 + $0xc] sm:$0x3] }
 0x924   :  { %7268 = vmatpush3.bf16.msra.mxu1 %v7584_v19  ;;  %v2883_v3 = vunpack.c.0.s8 %v2882_v49  ;;  %v2649_v4 = vld [vmem:[#allocation3 + $0x18] sm:$0x3]  ;;  %v3531_v41 = vld [vmem:[#allocation5 + $0x4] sm:$0x7] }
 0x925   :  { %7269 = vmatprep.subr.bf16.mxu1 %v7585_v18 }
 0x926   :  { %2747 = vrot.lane.b32.xlu0 %v2697_v54, %s8515_s10  ;;  %v9513_v1 = vsub.s32 %v2883_v3, %v2885_v48 }
 0x927   :  { %2749 = vrot.lane.b32.xlu1 %v2704_v57, %s8515_s10 }
 0x928   :  { %7270 = vmatpush3.bf16.msra.mxu1 %v7585_v18 }
 0x92a   :  { %2759 = vrot.lane.b32.xlu0 %v2739_v5, %s8515_s10  ;;  %v2650_v5 = vld [vmem:[#allocation3 + $0x1c] sm:$0x3] }
 0x92b   :  { %2761 = vrot.lane.b32.xlu1 %v2746_v11, %s8515_s10 }
 0x92e   :  { %2751 = vrot.lane.b32.xlu0 %v2711_v42, %s8515_s10 }
 0x92f   :  { %2753 = vrot.lane.b32.xlu1 %v2718_v0, %s8515_s10 }
 0x932   :  { %2807 = vrot.lane.b32.xlu0 %v2793_v34, %s8487_s3 }
 0x933   :  { %2809 = vrot.lane.b32.xlu1 %v2794_v25, %s8487_s3 }
 0x987   :  { %v2804_v28 = vpop.permute.xlu0 %2803 }
 0x989   :  { %v2806_v30 = vpop.permute.xlu1 %2805 }
 0x98b   :  { %v2796_v24 = vpop.permute.xlu0 %2795 }
 0x98d   :  { %v2798_v31 = vpop.permute.xlu1 %2797 }
 0x990   :  { %v2800_v63 = vpop.permute.xlu0 %2799 }
 0x991   :  { %v2802_v53 = vpop.permute.xlu1 %2801 }
 0x994   :  { %v2756_v27 = vpop.permute.xlu0 %2755 }
 0x995   :  { %v2758_v15 = vpop.permute.xlu1 %2757  ;;  %v2826_v45 = vsel %vm2811_vm11, %v2647_v21, %v2756_v27 }
 0x996   :  { %v2829_v62 = vsel %vm2811_vm11, %v2648_v20, %v2758_v15  ;;  %v2845_v61 = vsel %vm1897_vm5, %v2826_v45, %v2804_v28 }
 0x997   :  { %v2847_v56 = vsel %vm1897_vm5, %v2829_v62, %v2806_v30  ;;  %v3500_v30 = vld [vmem:[#allocation14] sm:$0xff] }
 0x998   :  { %v2748_v35 = vpop.permute.xlu0 %2747  ;;  %v2896_v12 = vcombine.low %v2845_v61, %v2847_v56 }
 0x999   :  { %v2750_v37 = vpop.permute.xlu1 %2749  ;;  %v2814_v47 = vsel %vm2811_vm11, %v2643_v44, %v2748_v35 }
 0x99a   :  { %v2817_v43 = vsel %vm2811_vm11, %v2644_v40, %v2750_v37  ;;  %v2837_v51 = vsel %vm1897_vm5, %v2814_v47, %v2796_v24  ;;  %v2904_v25 = vrot.slane %v2896_v12, %v9513_v1  ;;  %v6812_v24 = vpack.c.bf16 %v3500_v30, %v3500_v30  ;;  %v3528_v37 = vld [vmem:[#allocation5] sm:$0x7] }
 0x99b   :  { %v2839_v10 = vsel %vm1897_vm5, %v2817_v43, %v2798_v31  ;;  %v3502_v31 = vcombine.high %v3500_v30, %v3500_v30 }
 0x99c   :  { %v2760_v2 = vpop.permute.xlu0 %2759  ;;  %v2879_v57 = vcombine.low %v2837_v51, %v2839_v10  ;;  %v3516_v27 = vshll.u32 %v6812_v24, 16 }
 0x99d   :  { %v2762_v46 = vpop.permute.xlu1 %2761  ;;  %v2832_v13 = vsel %vm2811_vm11, %v2649_v4, %v2760_v2 }
 0x99e   :  { %v2835_v16 = vsel %vm2811_vm11, %v2650_v5, %v2762_v46  ;;  %v2887_v42 = vrot.slane %v2879_v57, %v9513_v1  ;;  %v6528_v46 = vld [vmem:[#allocation25] ss:$0 sm:$0xff] }
 0x9a0   :  { %v2752_v50 = vpop.permute.xlu0 %2751 }
 0x9a1   :  { %v2820_v52 = vsel %vm2811_vm11, %v2645_v38, %v2752_v50  ;;  %v2754_v54 = vpop.permute.xlu1 %2753 }
 0x9a2   :  { %v2823_v58 = vsel %vm2811_vm11, %v2646_v55, %v2754_v54  ;;  %v2841_v59 = vsel %vm1897_vm5, %v2820_v52, %v2800_v63  ;;  %v3513_v63 = vshrl.u32 %v6812_v24, 16  ;;  %v3131_v24 = vld [vmem:[#allocation4 + $0x14] sm:$0x7] }
 0x9a3   :  { %v2843_v60 = vsel %vm1897_vm5, %v2823_v58, %v2802_v53  ;;  %v6813_v53 = vpack.c.bf16 %v3502_v31, %v3502_v31 }
 0x9a4   :  { %v2880_v8 = vcombine.low %v2841_v59, %v2843_v60  ;;  %v2808_v11 = vpop.permute.xlu0 %2807  ;;  %v3515_v15 = vrot.slane %v3513_v63, 7 }
 0x9a5   :  { %v2810_v33 = vpop.permute.xlu1 %2809  ;;  %v2849_v0 = vsel %vm1897_vm5, %v2832_v13, %v2808_v11  ;;  %v3520_v35 = vshrl.u32 %v6813_v53, 16  ;;  %v3523_v40 = vshll.u32 %v6813_v53, 16 }
 0x9a6   :  { %v2894_v22 = vrot.slane %v2880_v8, %v9513_v1  ;;  %v2851_v23 = vsel %vm1897_vm5, %v2835_v16, %v2810_v33  ;;  %v3518_v14 = vor.u32 %v3516_v27, %v3515_v15 }
 0x9a7   :  { %v2897_v19 = vcombine.low %v2849_v0, %v2851_v23  ;;  %v3522_v49 = vrot.slane %v3520_v35, 7 }
 0x9a8   :  { %v2895_v34 = vcombine.low %v2887_v42, %v2894_v22  ;;  %v3529_v43 = vsel %vm9465_vm10, %v3518_v14, %v3528_v37  ;;  %v3128_v42 = vld [vmem:[#allocation4 + $0x10] sm:$0x7]  ;;  %v3119_v37 = vld [vmem:[#allocation4 + $0x4] sm:$0x7]  ;;  %v3134_v14 = vld [vmem:[#allocation4 + $0x18] sm:$0x7] }
 0x9a9   :  { %v2911_v18 = vrot.slane %v2897_v19, %v9513_v1  ;;  %v3525_v2 = vor.u32 %v3523_v40, %v3522_v49  ;;  %3530 = vst [vmem:[#allocation5] sm:$0x7] %v3529_v43 }
 0x9aa   :  { %7271 = vmatprep.mubr.msk.bf16.mxu1 %vm777_vm4, %v2895_v34 }
 0x9ab   :  { %v2912_v28 = vcombine.low %v2904_v25, %v2911_v18  ;;  %v3532_v44 = vsel %vm9465_vm10, %v3525_v2, %v3531_v41  ;;  %v3116_v18 = vld [vmem:[#allocation4] sm:$0x7] }
 0x9ac   :  { %3533 = vst [vmem:[#allocation5 + $0x4] sm:$0x7] %v3532_v44  ;;  %v3137_v44 = vld [vmem:[#allocation4 + $0x1c] sm:$0x7] }
 0x9ad   :  { %7272 = vmatmul.mubr.msk.bf16.vlgmr.msra.gmra.mrb[40].mxu1 %vm777_vm4, %v2912_v28 }
 0xa80   :  { %v7273_v20 = vpop.f32.mrb[40].mxu1 }
 0xa81   :  { %v2998_v47 = vadd.f32 %v7273_v20, %v6528_v46  ;;  %v2989_v62 = vpop.f32.mrb[41].mxu1 }
 0xa82   :  { %v2990_v10 = vadd.f32 %v6528_v46, %v2989_v62  ;;  %v7274_v21 = vpop.f32.mrb[42].mxu1 }
 0xa83   :  { %v3006_v3 = vmax.f32 %v2998_v47, 0.0  ;;  %v3001_v48 = vadd.f32 %v7274_v21, %v6528_v46  ;;  %v2992_v50 = vpop.f32.mrb[43].mxu1 }
 0xa84   :  { %v3004_v38 = vmax.f32 %v2990_v10, 0.0  ;;  %v2993_v45 = vadd.f32 %v6528_v46, %v2992_v50 }
 0xa85   :  { %v3014_v51 = vcombine.high %v3006_v3, %v3006_v3  ;;  %v6808_v52 = vpack.c.bf16 %v3006_v3, %v3006_v3  ;;  %v3007_v54 = vmax.f32 %v3001_v48, 0.0 }
 0xa86   :  { %v3012_v55 = vcombine.high %v3004_v38, %v3004_v38  ;;  %v6804_v56 = vpack.c.bf16 %v3004_v38, %v3004_v38  ;;  %v3005_v57 = vmax.f32 %v2993_v45, 0.0 }
 0xa87   :  { %v6809_v58 = vpack.c.bf16 %v3014_v51, %v3014_v51  ;;  %v3081_v59 = vshrl.u32 %v6808_v52, 16  ;;  %v3084_v60 = vshll.u32 %v6808_v52, 16  ;;  %v3015_v61 = vcombine.high %v3007_v54, %v3007_v54 }
 0xa88   :  { %v6805_v4 = vpack.c.bf16 %v3012_v55, %v3012_v55  ;;  %v3053_v5 = vshrl.u32 %v6804_v56, 16  ;;  %v3056_v8 = vshll.u32 %v6804_v56, 16  ;;  %v6810_v11 = vpack.c.bf16 %v3007_v54, %v3007_v54  ;;  %v3122_v54 = vld [vmem:[#allocation4 + $0x8] sm:$0x7]  ;;  %v3125_v56 = vld [vmem:[#allocation4 + $0xc] sm:$0x7] }
 0xa89   :  { %v3083_v12 = vrot.slane %v3081_v59, 7  ;;  %v3088_v13 = vshrl.u32 %v6809_v58, 16  ;;  %v3091_v16 = vshll.u32 %v6809_v58, 16  ;;  %v6811_v33 = vpack.c.bf16 %v3015_v61, %v3015_v61 }
 0xa8a   :  { %v3055_v22 = vrot.slane %v3053_v5, 7  ;;  %v3060_v0 = vshrl.u32 %v6805_v4, 16  ;;  %v3063_v23 = vshll.u32 %v6805_v4, 16  ;;  %v3095_v19 = vshrl.u32 %v6810_v11, 16 }
 0xa8b   :  { %v3086_v34 = vor.u32 %v3084_v60, %v3083_v12  ;;  %v3090_v25 = vrot.slane %v3088_v13, 7  ;;  %v3098_v28 = vshll.u32 %v6810_v11, 16  ;;  %v3102_v30 = vshrl.u32 %v6811_v33, 16 }
 0xa8c   :  { %v3058_v31 = vor.u32 %v3056_v8, %v3055_v22  ;;  %v3062_v63 = vrot.slane %v3060_v0, 7  ;;  %v3097_v53 = vrot.slane %v3095_v19, 7  ;;  %v3105_v27 = vshll.u32 %v6811_v33, 16 }
 0xa8d   :  { %v3093_v15 = vor.u32 %v3091_v16, %v3090_v25  ;;  %v3129_v35 = vsel %vm9465_vm10, %v3086_v34, %v3128_v42  ;;  %v3104_v40 = vrot.slane %v3102_v30, 7  ;;  %v3013_v49 = vcombine.high %v3005_v57, %v3005_v57 }
 0xa8e   :  { %3130 = vst [vmem:[#allocation4 + $0x10] sm:$0x7] %v3129_v35  ;;  %v3065_v41 = vor.u32 %v3063_v23, %v3062_v63  ;;  %v3117_v43 = vsel %vm9465_vm10, %v3058_v31, %v3116_v18  ;;  %v3100_v2 = vor.u32 %v3098_v28, %v3097_v53  ;;  %v6806_v46 = vpack.c.bf16 %v3005_v57, %v3005_v57  ;;  %v7607_v28 = vld [vmem:[#allocation26] sm:$0xff]  }
 0xa8f   :  { %v3132_v20 = vsel %vm9465_vm10, %v3093_v15, %v3131_v24  ;;  %3118 = vst [vmem:[#allocation4] sm:$0x7] %v3117_v43  ;;  %v3107_v47 = vor.u32 %v3105_v27, %v3104_v40  ;;  %v6807_v62 = vpack.c.bf16 %v3013_v49, %v3013_v49  ;;  %7275 = vmatprep.subr.bf16.mxu0 %v7607_v28  ;;  %v9552_v49 = vld [vmem:[#allocation5] ss:$0 sps:$4 sm:$0x77]  }
 0xa90   :  { %3133 = vst [vmem:[#allocation4 + $0x14] sm:$0x7] %v3132_v20  ;;  %v3120_v10 = vsel %vm9465_vm10, %v3065_v41, %v3119_v37  ;;  %v3135_v21 = vsel %vm9465_vm10, %v3100_v2, %v3134_v14  ;;  %v3067_v3 = vshrl.u32 %v6806_v46, 16  ;;  %v3070_v45 = vshll.u32 %v6806_v46, 16  ;;  %7276 = vmatpush3.bf16.msra.mxu0 %v7607_v28  ;;  %v7615_v28 = vld [vmem:[#allocation28 + $0x18] sm:$0xff]  }
 0xa91   :  { %3121 = vst [vmem:[#allocation4 + $0x4] sm:$0x7] %v3120_v10  ;;  %3136 = vst [vmem:[#allocation4 + $0x18] sm:$0x7] %v3135_v21  ;;  %v3138_v48 = vsel %vm9465_vm10, %v3107_v47, %v3137_v44  ;;  %v3074_v50 = vshrl.u32 %v6807_v62, 16  ;;  %v3077_v52 = vshll.u32 %v6807_v62, 16 }
 0xa92   :  { %3139 = vst [vmem:[#allocation4 + $0x1c] sm:$0x7] %v3138_v48  ;;  %v3069_v38 = vrot.slane %v3067_v3, 7  ;;  %v7608_v10 = vld [vmem:[#allocation26 + $0x8] sm:$0xff]   ;;  %v7609_v48 = vld [vmem:[#allocation28] sm:$0xff]  }
 0xa93   :  { %v3076_v51 = vrot.slane %v3074_v50, 7  ;;  %v7610_v50 = vld [vmem:[#allocation26 + $0x10] sm:$0xff]   ;;  %7277 = vmatprep.subr.bf16.mxu0 %v7608_v10 }
 0xa94   :  { %v3072_v55 = vor.u32 %v3070_v45, %v3069_v38  ;;  %v8517_v38 = vmov 0.0   ;;  %7278 = vmatpush3.bf16.msra.mxu0 %v7608_v10 }
 0xa95   :  { %v3079_v57 = vor.u32 %v3077_v52, %v3076_v51  ;;  %v7586_v58 = vld [vmem:[#allocation4 + $0x10] ss:$0 sps:$4 sm:$0x66]   ;;  %7291 = vmatprep.subr.bf16.mxu1 %v8517_v38  ;;  %7279 = vmatprep.subr.bf16.mxu0 %v7610_v50 }
 0xa96   :  { %v3123_v59 = vsel %vm9465_vm10, %v3072_v55, %v3122_v54  ;;  %v7588_v60 = vld [vmem:[#allocation4] ss:$0 sps:$4 sm:$0x66]   ;;  %v3288_v4 = vrot.slane %v7586_v58, 1  ;;  %7292 = vmatpush3.bf16.msra.mxu1 %v7609_v48  ;;  %v7612_v58 = vld [vmem:[#allocation26 + $0x18] sm:$0xff]   ;;  %7303 = vmatprep.mubr.msk.bf16.mxu1 %vm8518_vm15, %v8517_v38 }
 0xa97   :  { %3124 = vst [vmem:[#allocation4 + $0x8] sm:$0x7] %v3123_v59  ;;  %v3126_v61 = vsel %vm9465_vm10, %v3079_v57, %v3125_v56  ;;  %v7587_v5 = vld [vmem:[#allocation4 + $0x14] ss:$0 sps:$4 sm:$0x66]   ;;  %v3284_v16 = vrot.slane %v7588_v60, 1  ;;  %7293 = vmatprep.subr.bf16.mxu1 %v8517_v38 }
 0xa98   :  { %3127 = vst [vmem:[#allocation4 + $0xc] sm:$0x7] %v3126_v61  ;;  %v7589_v8 = vld [vmem:[#allocation4 + $0x4] ss:$0 sps:$4 sm:$0x66]   ;;  %3300 = vrot.lane.b32.xlu0 %v3288_v4, %s8487_s3  ;;  %v3289_v11 = vrot.slane %v7587_v5, 1  ;;  %7280 = vmatpush3.bf16.msra.mxu0 %v7610_v50 }
 0xa99   :  { %v7590_v12 = vld [vmem:[#allocation4 + $0x18] ss:$0 sps:$4 sm:$0x66]   ;;  %v7591_v13 = vld [vmem:[#allocation4 + $0x1c] ss:$0 sps:$4 sm:$0x66]   ;;  %7281 = vmatprep.subr.bf16.mxu0 %v7612_v58 }
 0xa9a   :  { %3302 = vrot.lane.b32.xlu1 %v3289_v11, %s8487_s3  ;;  %v7594_v33 = vld [vmem:[#allocation4 + $0x10] ss:$0 sps:$4 sm:$0x77]   ;;  %v7595_v42 = vld [vmem:[#allocation4 + $0x14] ss:$0 sps:$4 sm:$0x77]  }
 0xa9b   :  { %v3285_v22 = vrot.slane %v7589_v8, 1  ;;  %v3219_v23 = vshll.u32 %v7594_v33, 16  ;;  %v3290_v19 = vrot.slane %v7590_v12, 1  ;;  %v3291_v25 = vrot.slane %v7591_v13, 1  ;;  %v7611_v57 = vld [vmem:[#allocation28 + $0x8] sm:$0xff]  }
 0xa9c   :  { %3292 = vrot.lane.b32.xlu0 %v3284_v16, %s8487_s3  ;;  %v7596_v18 = vld [vmem:[#allocation4] ss:$0 sps:$4 sm:$0x77]   ;;  %v3226_v30 = vshll.u32 %v7595_v42, 16  ;;  %v3217_v40 = vshrl.u32 %v7594_v33, 16  ;;  %v3224_v43 = vshrl.u32 %v7595_v42, 16  ;;  %7294 = vmatpush3.bf16.msra.mxu1 %v7611_v57 }
 0xa9d   :  { %v7597_v24 = vld [vmem:[#allocation4 + $0x4] ss:$0 sps:$4 sm:$0x77]   ;;  %v3221_v31 = vrot.slane %v3219_v23, 1  ;;  %v3191_v27 = vshll.u32 %v7596_v18, 16  ;;  %v3189_v20 = vshrl.u32 %v7596_v18, 16  ;;  %7295 = vmatprep.subr.bf16.mxu1 %v8517_v38  ;;  %7282 = vmatpush3.bf16.msra.mxu0 %v7612_v58 }
 0xa9e   :  { %v7592_v0 = vld [vmem:[#allocation4 + $0x8] ss:$0 sps:$4 sm:$0x66]   ;;  %3294 = vrot.lane.b32.xlu1 %v3285_v22, %s8487_s3  ;;  %v7598_v63 = vld [vmem:[#allocation4 + $0x18] ss:$0 sps:$4 sm:$0x77]  }
 0xa9f   :  { %v7593_v34 = vld [vmem:[#allocation4 + $0xc] ss:$0 sps:$4 sm:$0x66]   ;;  %v3286_v53 = vrot.slane %v7592_v0, 1  ;;  %v3198_v15 = vshll.u32 %v7597_v24, 16  ;;  %v3228_v14 = vrot.slane %v3226_v30, 1  ;;  %v3222_v41 = vor.u32 %v3221_v31, %v3217_v40 }
 0xaa0   :  { %3304 = vrot.lane.b32.xlu0 %v3290_v19, %s8487_s3  ;;  %v7599_v35 = vld [vmem:[#allocation4 + $0x1c] ss:$0 sps:$4 sm:$0x77]   ;;  %v3287_v37 = vrot.slane %v7593_v34, 1  ;;  %v3193_v2 = vrot.slane %v3191_v27, 1  ;;  %v3233_v44 = vshll.u32 %v7598_v63, 16 }
 0xaa1   :  { %v7600_v46 = vld [vmem:[#allocation4 + $0x8] ss:$0 sps:$4 sm:$0x77]   ;;  %v3200_v47 = vrot.slane %v3198_v15, 1  ;;  %v3240_v62 = vshll.u32 %v7599_v35, 16  ;;  %v3229_v21 = vor.u32 %v3228_v14, %v3224_v43  ;;  %v3196_v51 = vshrl.u32 %v7597_v24, 16 }
 0xaa2   :  { %3306 = vrot.lane.b32.xlu1 %v3291_v25, %s8487_s3  ;;  %v7601_v3 = vld [vmem:[#allocation4 + $0xc] ss:$0 sps:$4 sm:$0x77]   ;;  %v3194_v45 = vor.u32 %v3193_v2, %v3189_v20  ;;  %v3235_v52 = vrot.slane %v3233_v44, 1  ;;  %v3205_v54 = vshll.u32 %v7600_v46, 16  ;;  %v3550_v56 = vshll.u32 %v9552_v49, 16 }
 0xaa3   :  { %v7604_v55 = vld [vmem:[#allocation5 + $0x4] ss:$0 sps:$4 sm:$0x77]   ;;  %v3201_v59 = vor.u32 %v3200_v47, %v3196_v51  ;;  %v3231_v60 = vshrl.u32 %v7598_v63, 16  ;;  %v3242_v61 = vrot.slane %v3240_v62, 1  ;;  %v3212_v4 = vshll.u32 %v7601_v3, 16 }
 0xaa4   :  { %3296 = vrot.lane.b32.xlu0 %v3286_v53, %s8487_s3  ;;  %v3238_v8 = vshrl.u32 %v7599_v35, 16  ;;  %v3207_v11 = vrot.slane %v3205_v54, 1  ;;  %v3557_v12 = vshll.u32 %v7604_v55, 16  ;;  %v3548_v13 = vshrl.u32 %v9552_v49, 16  ;;  %v7613_v16 = vld [vmem:[#allocation28 + $0x10] sm:$0xff]   ;;  %v7616_v30 = vld [vmem:[#allocation26 + $0x28] sm:$0xff]  }
 0xaa5   :  { %v3236_v5 = vor.u32 %v3235_v52, %v3231_v60  ;;  %v7614_v33 = vld [vmem:[#allocation26 + $0x20] sm:$0xff]   ;;  %v3203_v22 = vshrl.u32 %v7600_v46, 16  ;;  %v3214_v0 = vrot.slane %v3212_v4, 1  ;;  %v3552_v23 = vrot.slane %v3550_v56, 1  ;;  %7296 = vmatpush3.bf16.msra.mxu1 %v7613_v16  ;;  %v7617_v15 = vld [vmem:[#allocation28 + $0x20] sm:$0xff]   ;;  %v7618_v40 = vld [vmem:[#allocation28 + $0x28] sm:$0xff]  }
 0xaa6   :  { %3298 = vrot.lane.b32.xlu1 %v3287_v37, %s8487_s3  ;;  %v3243_v42 = vor.u32 %v3242_v61, %v3238_v8  ;;  %v3210_v34 = vshrl.u32 %v7601_v3, 16  ;;  %v3555_v25 = vshrl.u32 %v7604_v55, 16  ;;  %v3559_v18 = vrot.slane %v3557_v12, 1  ;;  %7283 = vmatprep.subr.bf16.mxu0 %v7614_v33  ;;  %v7605_v63 = vld [vmem:[#allocation5] ss:$0 sps:$4 sm:$0x66]  }
 0xaa7   :  { %v3208_v19 = vor.u32 %v3207_v11, %v3203_v22  ;;  %v3553_v31 = vor.u32 %v3552_v23, %v3548_v13  ;;  %7297 = vmatprep.subr.bf16.mxu1 %v8517_v38  ;;  %v7606_v27 = vld [vmem:[#allocation5 + $0x4] ss:$0 sps:$4 sm:$0x66]   ;;  %7284 = vmatpush3.bf16.msra.mxu0 %v7614_v33  ;;  %v3571_v35 = vrot.slane %v7605_v63, 1  ;;  %v3534_v14 = vld [vmem:[#allocation16] sm:$0xff] }
 0xaa8   :  { %3252 = vrot.lane.b32.xlu0 %v3222_v41, %s8515_s10  ;;  %v3215_v24 = vor.u32 %v3214_v0, %v3210_v34  ;;  %v3560_v53 = vor.u32 %v3559_v18, %v3555_v25  ;;  %7285 = vmatprep.subr.bf16.mxu0 %v7616_v30  ;;  %v3572_v37 = vrot.slane %v7606_v27, 1  ;;  %v3141_v48 = vld [vmem:[#allocation4 + $0x4] sm:$0x3]  ;;  %v3146_v52 = vld [vmem:[#allocation4 + $0x18] sm:$0x3] }
 0xaa9   :  { %7298 = vmatpush3.bf16.msra.mxu1 %v7615_v28  ;;  %v3140_v55 = vld [vmem:[#allocation4] sm:$0x3]  ;;  %v3147_v57 = vld [vmem:[#allocation4 + $0x1c] sm:$0x3]  ;;  %v3142_v11 = vld [vmem:[#allocation4 + $0x8] sm:$0x3] }
 0xaaa   :  { %3254 = vrot.lane.b32.xlu1 %v3229_v21, %s8515_s10  ;;  %7299 = vmatprep.subr.bf16.mxu1 %v8517_v38  ;;  %v3143_v0 = vld [vmem:[#allocation4 + $0xc] sm:$0x3]  ;;  %v3535_v63 = vld [vmem:[#allocation5] sm:$0x3] }
 0xaab   :  { %7286 = vmatpush3.bf16.msra.mxu0 %v7616_v30 }
 0xaac   :  { %3244 = vrot.lane.b32.xlu0 %v3194_v45, %s8515_s10  ;;  %7307 = vmatprep.subr.bf16.mxu0 %v8517_v38  ;;  %v3145_v45 = vld [vmem:[#allocation4 + $0x14] sm:$0x3] }
 0xaad   :  { %7300 = vmatpush3.bf16.msra.mxu1 %v7617_v15 }
 0xaae   :  { %3246 = vrot.lane.b32.xlu1 %v3201_v59, %s8515_s10  ;;  %7301 = vmatprep.subr.bf16.mxu1 %v8517_v38  ;;  %v3144_v59 = vld [vmem:[#allocation4 + $0x10] sm:$0x3] }
 0xab0   :  { %3256 = vrot.lane.b32.xlu0 %v3236_v5, %s8515_s10 }
 0xab1   :  { %7302 = vmatpush3.bf16.msra.mxu1 %v7618_v40 }
 0xab2   :  { %3258 = vrot.lane.b32.xlu1 %v3243_v42, %s8515_s10  ;;  %7323 = vmatprep.subr.bf16.mxu1 %v8517_v38 }
 0xab4   :  { %3248 = vrot.lane.b32.xlu0 %v3208_v19, %s8515_s10 }
 0xab6   :  { %3250 = vrot.lane.b32.xlu1 %v3215_v24, %s8515_s10 }
 0xab8   :  { %3561 = vrot.lane.b32.xlu0 %v3553_v31, %s8515_s10 }
 0xaba   :  { %3563 = vrot.lane.b32.xlu1 %v3560_v53, %s8515_s10 }
 0xabc   :  { %3573 = vrot.lane.b32.xlu0 %v3571_v35, %s8487_s3 }
 0xabe   :  { %3575 = vrot.lane.b32.xlu1 %v3572_v37, %s8487_s3  ;;  %v3536_v37 = vld [vmem:[#allocation5 + $0x4] sm:$0x3] }
 0xac2   :  { %3697 = vrot.lane.b32.xlu1 %v3534_v14, %s8515_s10 }
 0xb0a   :  { %v3301_v49 = vpop.permute.xlu0 %3300 }
 0xb0c   :  { %v3303_v41 = vpop.permute.xlu1 %3302 }
 0xb0e   :  { %v3293_v43 = vpop.permute.xlu0 %3292 }
 0xb10   :  { %v3295_v2 = vpop.permute.xlu1 %3294 }
 0xb12   :  { %v3305_v44 = vpop.permute.xlu0 %3304 }
 0xb14   :  { %v3307_v46 = vpop.permute.xlu1 %3306 }
 0xb16   :  { %v3297_v20 = vpop.permute.xlu0 %3296 }
 0xb18   :  { %v3299_v47 = vpop.permute.xlu1 %3298 }
 0xb1a   :  { %v3253_v62 = vpop.permute.xlu0 %3252 }
 0xb1b   :  { %v3322_v4 = vsel %vm2811_vm11, %v3144_v59, %v3253_v62 }
 0xb1c   :  { %v3255_v10 = vpop.permute.xlu1 %3254  ;;  %v3341_v19 = vsel %vm1897_vm5, %v3322_v4, %v3301_v49 }
 0xb1d   :  { %v3325_v54 = vsel %vm2811_vm11, %v3145_v45, %v3255_v10  ;;  %v6561_v10 = vld [vmem:[#allocation29] ss:$0 sm:$0xff] }
 0xb1e   :  { %v3245_v21 = vpop.permute.xlu0 %3244  ;;  %v3343_v13 = vsel %vm1897_vm5, %v3325_v54, %v3303_v41 }
 0xb1f   :  { %v3310_v60 = vsel %vm2811_vm11, %v3140_v55, %v3245_v21  ;;  %v3392_v18 = vcombine.low %v3341_v19, %v3343_v13 }
 0xb20   :  { %v3247_v3 = vpop.permute.xlu1 %3246  ;;  %v3333_v42 = vsel %vm1897_vm5, %v3310_v60, %v3293_v43 }
 0xb21   :  { %v3313_v51 = vsel %vm2811_vm11, %v3141_v48, %v3247_v3  ;;  %v3400_v40 = vrot.slane %v3392_v18, %v9513_v1 }
 0xb22   :  { %v3257_v50 = vpop.permute.xlu0 %3256  ;;  %v3335_v5 = vsel %vm1897_vm5, %v3313_v51, %v3295_v2 }
 0xb23   :  { %v3328_v56 = vsel %vm2811_vm11, %v3146_v52, %v3257_v50  ;;  %v3375_v34 = vcombine.low %v3333_v42, %v3335_v5 }
 0xb24   :  { %v3259_v58 = vpop.permute.xlu1 %3258  ;;  %v3345_v16 = vsel %vm1897_vm5, %v3328_v56, %v3305_v44 }
 0xb25   :  { %v3331_v61 = vsel %vm2811_vm11, %v3147_v57, %v3259_v58  ;;  %v3383_v15 = vrot.slane %v3375_v34, %v9513_v1 }
 0xb26   :  { %v3347_v8 = vsel %vm1897_vm5, %v3331_v61, %v3307_v46  ;;  %v3249_v12 = vpop.permute.xlu0 %3248 }
 0xb27   :  { %v3316_v33 = vsel %vm2811_vm11, %v3142_v11, %v3249_v12  ;;  %v3393_v22 = vcombine.low %v3345_v16, %v3347_v8 }
 0xb28   :  { %v3251_v23 = vpop.permute.xlu1 %3250  ;;  %v3337_v28 = vsel %vm1897_vm5, %v3316_v33, %v3297_v20 }
 0xb29   :  { %v3319_v25 = vsel %vm2811_vm11, %v3143_v0, %v3251_v23  ;;  %v3407_v53 = vrot.slane %v3393_v22, %v9513_v1 }
 0xb2a   :  { %v3339_v30 = vsel %vm1897_vm5, %v3319_v25, %v3299_v47  ;;  %v3562_v24 = vpop.permute.xlu0 %3561 }
 0xb2b   :  { %v3376_v31 = vcombine.low %v3337_v28, %v3339_v30  ;;  %v3579_v14 = vsel %vm2811_vm11, %v3535_v63, %v3562_v24  ;;  %v3408_v43 = vcombine.low %v3400_v40, %v3407_v53  ;;  %v3748_v40 = vld [vmem:[#allocation5] sm:$0x7] }
 0xb2c   :  { %v3564_v27 = vpop.permute.xlu1 %3563 }
 0xb2d   :  { %v3390_v35 = vrot.slane %v3376_v31, %v9513_v1  ;;  %v3582_v2 = vsel %vm2811_vm11, %v3536_v37, %v3564_v27  ;;  %v7625_v37 = vld [vmem:[#allocation28 + $0x10] sm:$0xff]  }
 0xb2e   :  { %v3574_v49 = vpop.permute.xlu0 %3573 }
 0xb2f   :  { %v3391_v41 = vcombine.low %v3383_v15, %v3390_v35  ;;  %v3584_v46 = vsel %vm1897_vm5, %v3579_v14, %v3574_v49  ;;  %v7623_v15 = vld [vmem:[#allocation28] sm:$0xff]   ;;  %v7624_v35 = vld [vmem:[#allocation28 + $0x8] sm:$0xff]   ;;  %v3751_v49 = vld [vmem:[#allocation5 + $0x4] sm:$0x7] }
 0xb30   :  { %v3576_v44 = vpop.permute.xlu1 %3575 }
 0xb31   :  { %v3586_v20 = vsel %vm1897_vm5, %v3582_v2, %v3576_v44  ;;  %7287 = vmatprep.mubr.msk.bf16.mxu0 %vm777_vm4, %v3391_v41  ;;  %v7626_v44 = vld [vmem:[#allocation28 + $0x18] sm:$0xff]  }
 0xb32   :  { %v3601_v47 = vcombine.low %v3584_v46, %v3586_v20  ;;  %7288 = vmatmul.mubr.msk.bf16.vlgmr.msra.gmra.mrb[56].mxu0 %vm777_vm4, %v3408_v43  ;;  %v7627_v46 = vld [vmem:[#allocation28 + $0x20] sm:$0xff]  }
 0xb33   :  { %7319 = vmatprep.mubr.msk.bf16.mxu0 %vm8518_vm15, %v8517_v38  ;;  %7308 = vmatpush3.bf16.msra.mxu0 %v7623_v15 }
 0xb34   :  { %v3608_v62 = vrot.slane %v3601_v47, %v9513_v1  ;;  %v3698_v13 = vpop.permute.xlu1 %3697  ;;  %7309 = vmatprep.subr.bf16.mxu0 %v8517_v38 }
 0xb36   :  { %7304 = vmatmul.mubr.msk.bf16.vlgmr.msra.gmra.mrb[44].mxu1 %vm777_vm4, %v3608_v62 }
 0xb37   :  { %7335 = vmatprep.mubr.msk.bf16.mxu1 %vm8518_vm15, %v8517_v38  ;;  %7310 = vmatpush3.bf16.msra.mxu0 %v7624_v35 }
 0xb38   :  { %7311 = vmatprep.subr.bf16.mxu0 %v8517_v38 }
 0xb3b   :  { %7312 = vmatpush3.bf16.msra.mxu0 %v7625_v37 }
 0xb3c   :  { %7313 = vmatprep.subr.bf16.mxu0 %v8517_v38 }
 0xb3f   :  { %7314 = vmatpush3.bf16.msra.mxu0 %v7626_v44 }
 0xb40   :  { %7315 = vmatprep.subr.bf16.mxu0 %v8517_v38 }
 0xb43   :  { %7316 = vmatpush3.bf16.msra.mxu0 %v7627_v46 }
 0xb44   :  { %7317 = vmatprep.subr.bf16.mxu0 %v8517_v38 }
 0xc05   :  { %v7289_v21 = vpop.f32.mrb[56].mxu0 }
 0xc06   :  { %v9612_v3 = vadd.f32 %v7289_v21, %v6561_v10  ;;  %v3485_v48 = vpop.f32.mrb[57].mxu0 }
 0xc07   :  { %v3486_v50 = vadd.f32 %v6561_v10, %v3485_v48  ;;  %v7290_v45 = vpop.f32.mrb[58].mxu0 }
 0xc08   :  { %v9614_v51 = vadd.f32 %v7290_v45, %v6561_v10  ;;  %v3488_v52 = vpop.f32.mrb[59].mxu0 }
 0xc09   :  { %v9616_v54 = vadd.f32 %v6561_v10, %v3488_v52  ;;  %v3682_v55 = vpop.f32.mrb[44].mxu1 }
 0xc0a   :  { %v3688_v56 = vadd.f32 %v3682_v55, %v3486_v50  ;;  %v7305_v57 = vpop.f32.mrb[45].mxu1  ;;  %v7628_v50 = vld [vmem:[#allocation28 + $0x28] sm:$0xff]  }
 0xc0b   :  { %v3685_v58 = vpop.f32.mrb[46].mxu1  ;;  %7318 = vmatpush3.bf16.msra.mxu0 %v7628_v50  ;;  %v7634_v50 = vld [vmem:[#allocation28 + $0x8] sm:$0xff]  }
 0xc0c   :  { %7780 = vtanh.f32 %v3688_v56  ;;  %v7306_v59 = vpop.f32.mrb[47].mxu1  ;;  %v6583_v61 = vmul.f32 -1.442695, %v3688_v56  ;;  %7339 = vmatprep.subr.bf16.mxu0 %v8517_v38 }
 0xc0e   :  { %7782 = vpow2.f32 %v6583_v61 }
 0xc16   :  { %v7781_v60 = vpop.eup %7780 }
 0xc17   :  { %3702 = vrot.lane.b32.xlu0 %v7781_v60, %s8515_s10 }
 0xc18   :  { %v7783_v4 = vpop.eup %7782 }
 0xc19   :  { %v3692_v5 = vadd.f32 1.0, %v7783_v4 }
 0xc1b   :  { %7784 = vrcp.f32 %v3692_v5 }
 0xc25   :  { %v7785_v8 = vpop.eup %7784 }
 0xc26   :  { %v3700_v16 = vmul.f32 %v7785_v8, %v3698_v13 }
 0xc89   :  { %v3703_v11 = vpop.permute.xlu0 %3702 }
 0xc8a   :  { %v3705_v12 = vmul.f32 %v7785_v8, %v3703_v11 }
 0xc8c   :  { %3707 = vrot.lane.b32.xlu0 %v3705_v12, %s8515_s10 }
 0xcfe   :  { %v3708_v33 = vpop.permute.xlu0 %3707 }
 0xcff   :  { %v9620_v42 = vadd.f32 %v3708_v33, %v3700_v16 }
 0xd01   :  { %7786 = vtanh.f32 %v9620_v42 }
 0xd0b   :  { %v7787_v22 = vpop.eup %7786 }
 0xd0c   :  { %3713 = vrot.lane.b32.xlu1 %v7787_v22, %s8515_s10 }
 0xd7e   :  { %v3714_v0 = vpop.permute.xlu1 %3713 }
 0xd7f   :  { %v3716_v23 = vmul.f32 %v7785_v8, %v3714_v0 }
 0xd81   :  { %v3718_v19 = vcombine.high %v3716_v23, %v3716_v23  ;;  %v6814_v34 = vpack.c.bf16 %v3716_v23, %v3716_v23 }
 0xd83   :  { %v6815_v25 = vpack.c.bf16 %v3718_v19, %v3718_v19  ;;  %v3729_v18 = vshrl.u32 %v6814_v34, 16  ;;  %v3732_v30 = vshll.u32 %v6814_v34, 16 }
 0xd85   :  { %v3731_v28 = vrot.slane %v3729_v18, 7  ;;  %v3736_v24 = vshrl.u32 %v6815_v25, 16  ;;  %v3739_v53 = vshll.u32 %v6815_v25, 16 }
 0xd87   :  { %v3734_v31 = vor.u32 %v3732_v30, %v3731_v28  ;;  %v3738_v63 = vrot.slane %v3736_v24, 7 }
 0xd89   :  { %3742 = vrot.lane.b32.xlu0 %v3734_v31, %s8487_s3  ;;  %v3741_v27 = vor.u32 %v3739_v53, %v3738_v63 }
 0xd8b   :  { %3744 = vrot.lane.b32.xlu1 %v3741_v27, %s8487_s3 }
 0xdfb   :  { %v3743_v14 = vpop.permute.xlu0 %3742 }
 0xdfc   :  { %v3749_v41 = vsel %vm9465_vm10, %v3743_v14, %v3748_v40 }
 0xdfd   :  { %3750 = vst [vmem:[#allocation5] sm:$0x7] %v3749_v41  ;;  %v3745_v43 = vpop.permute.xlu1 %3744 }
 0xdfe   :  { %v3752_v2 = vsel %vm9465_vm10, %v3745_v43, %v3751_v49 }
 0xdff   :  { %3753 = vst [vmem:[#allocation5 + $0x4] sm:$0x7] %v3752_v2 }
 0xe04   :  { %v7619_v20 = vld [vmem:[#allocation5] ss:$0 sps:$4 sm:$0x77]  }
 0xe05   :  { %v3769_v47 = vshll.u32 %v7619_v20, 16  ;;  %v3767_v10 = vshrl.u32 %v7619_v20, 16  ;;  %v7621_v52 = vld [vmem:[#allocation5] ss:$0 sps:$4 sm:$0x66]  }
 0xe06   :  { %v7620_v62 = vld [vmem:[#allocation5 + $0x4] ss:$0 sps:$4 sm:$0x77]   ;;  %v3790_v59 = vrot.slane %v7621_v52, 1  ;;  %v3754_v8 = vld [vmem:[#allocation5] sm:$0x3] }
 0xe07   :  { %v3771_v21 = vrot.slane %v3769_v47, 1  ;;  %v3776_v48 = vshll.u32 %v7620_v62, 16  ;;  %v3774_v55 = vshrl.u32 %v7620_v62, 16  ;;  %v7622_v58 = vld [vmem:[#allocation5 + $0x4] ss:$0 sps:$4 sm:$0x66]  }
 0xe08   :  { %v3791_v60 = vrot.slane %v7622_v58, 1  ;;  %v3755_v11 = vld [vmem:[#allocation5 + $0x4] sm:$0x3]  ;;  %v3963_v52 = vld [vmem:[#allocation5] sm:$0x7] }
 0xe09   :  { %v3772_v45 = vor.u32 %v3771_v21, %v3767_v10  ;;  %v3778_v56 = vrot.slane %v3776_v48, 1  ;;  %v7633_v48 = vld [vmem:[#allocation28] sm:$0xff]  }
 0xe0a   :  { %7324 = vmatpush3.bf16.msra.mxu1 %v7633_v48 }
 0xe0b   :  { %3780 = vrot.lane.b32.xlu0 %v3772_v45, %s8515_s10  ;;  %v3779_v57 = vor.u32 %v3778_v56, %v3774_v55  ;;  %7325 = vmatprep.subr.bf16.mxu1 %v8517_v38  ;;  %v7635_v45 = vld [vmem:[#allocation28 + $0x10] sm:$0xff]  }
 0xe0d   :  { %3782 = vrot.lane.b32.xlu1 %v3779_v57, %s8515_s10  ;;  %v3966_v57 = vld [vmem:[#allocation5 + $0x4] sm:$0x7] }
 0xe0e   :  { %7326 = vmatpush3.bf16.msra.mxu1 %v7634_v50 }
 0xe0f   :  { %3792 = vrot.lane.b32.xlu0 %v3790_v59, %s8487_s3  ;;  %7327 = vmatprep.subr.bf16.mxu1 %v8517_v38 }
 0xe11   :  { %3794 = vrot.lane.b32.xlu1 %v3791_v60, %s8487_s3  ;;  %v7636_v60 = vld [vmem:[#allocation28 + $0x18] sm:$0xff]  }
 0xe12   :  { %7328 = vmatpush3.bf16.msra.mxu1 %v7635_v45 }
 0xe13   :  { %7329 = vmatprep.subr.bf16.mxu1 %v8517_v38 }
 0xe16   :  { %7330 = vmatpush3.bf16.msra.mxu1 %v7636_v60 }
 0xe17   :  { %7331 = vmatprep.subr.bf16.mxu1 %v8517_v38 }
 0xe7d   :  { %v3781_v61 = vpop.permute.xlu0 %3780 }
 0xe7e   :  { %v3798_v12 = vsel %vm2811_vm11, %v3754_v8, %v3781_v61  ;;  %v7637_v61 = vld [vmem:[#allocation28 + $0x20] sm:$0xff]  }
 0xe7f   :  { %v3783_v4 = vpop.permute.xlu1 %3782  ;;  %7332 = vmatpush3.bf16.msra.mxu1 %v7637_v61 }
 0xe80   :  { %v3801_v13 = vsel %vm2811_vm11, %v3755_v11, %v3783_v4  ;;  %7333 = vmatprep.subr.bf16.mxu1 %v8517_v38 }
 0xe81   :  { %v3793_v5 = vpop.permute.xlu0 %3792 }
 0xe82   :  { %v3803_v33 = vsel %vm1897_vm5, %v3798_v12, %v3793_v5 }
 0xe83   :  { %v3795_v16 = vpop.permute.xlu1 %3794 }
 0xe84   :  { %v3805_v22 = vsel %vm1897_vm5, %v3801_v13, %v3795_v16  ;;  %v7638_v16 = vld [vmem:[#allocation28 + $0x28] sm:$0xff]  }
 0xe85   :  { %v3820_v0 = vcombine.low %v3803_v33, %v3805_v22  ;;  %7334 = vmatpush3.bf16.msra.mxu1 %v7638_v16  ;;  %v7645_v16 = vld [vmem:[#allocation28 + $0x10] sm:$0xff]  }
 0xe86   :  { %7355 = vmatprep.subr.bf16.mxu1 %v8517_v38 }
 0xe87   :  { %v3827_v23 = vrot.slane %v3820_v0, %v9513_v1 }
 0xe89   :  { %7320 = vmatmul.mubr.msk.bf16.vlgmr.msra.gmra.mrb[60].mxu0 %vm777_vm4, %v3827_v23 }
 0xe8a   :  { %7351 = vmatprep.mubr.msk.bf16.mxu0 %vm8518_vm15, %v8517_v38 }
 0xf5c   :  { %v3901_v19 = vpop.f32.mrb[60].mxu0 }
 0xf5d   :  { %v3907_v34 = vadd.f32 %v3901_v19, %v9616_v54  ;;  %v7321_v25 = vpop.f32.mrb[61].mxu0 }
 0xf5e   :  { %v3904_v18 = vpop.f32.mrb[62].mxu0 }
 0xf5f   :  { %7788 = vtanh.f32 %v3907_v34  ;;  %v7322_v28 = vpop.f32.mrb[63].mxu0  ;;  %v6597_v24 = vmul.f32 -1.442695, %v3907_v34 }
 0xf61   :  { %7790 = vpow2.f32 %v6597_v24 }
 0xf69   :  { %v7789_v30 = vpop.eup %7788 }
 0xf6a   :  { %3917 = vrot.lane.b32.xlu0 %v7789_v30, %s8515_s10 }
 0xf6b   :  { %v7791_v31 = vpop.eup %7790 }
 0xf6c   :  { %v3911_v63 = vadd.f32 1.0, %v7791_v31 }
 0xf6e   :  { %7792 = vrcp.f32 %v3911_v63 }
 0xf78   :  { %v7793_v53 = vpop.eup %7792 }
 0xf79   :  { %v3915_v35 = vmul.f32 %v7793_v53, %v9620_v42 }
 0xfdc   :  { %v3918_v27 = vpop.permute.xlu0 %3917 }
 0xfdd   :  { %v3920_v15 = vmul.f32 %v7793_v53, %v3918_v27 }
 0xfdf   :  { %3922 = vrot.lane.b32.xlu1 %v3920_v15, %s8515_s10 }
0x1051   :  { %v3923_v54 = vpop.permute.xlu1 %3922 }
0x1052   :  { %v9652_v37 = vadd.f32 %v3923_v54, %v3915_v35 }
0x1054   :  { %7794 = vtanh.f32 %v9652_v37 }
0x105e   :  { %v7795_v40 = vpop.eup %7794 }
0x105f   :  { %3928 = vrot.lane.b32.xlu0 %v7795_v40, %s8515_s10 }
0x10d1   :  { %v3929_v14 = vpop.permute.xlu0 %3928 }
0x10d2   :  { %v3931_v49 = vmul.f32 %v7793_v53, %v3929_v14 }
0x10d4   :  { %v3933_v41 = vcombine.high %v3931_v49, %v3931_v49  ;;  %v6816_v43 = vpack.c.bf16 %v3931_v49, %v3931_v49 }
0x10d6   :  { %v6817_v2 = vpack.c.bf16 %v3933_v41, %v3933_v41  ;;  %v3944_v44 = vshrl.u32 %v6816_v43, 16  ;;  %v3947_v20 = vshll.u32 %v6816_v43, 16 }
0x10d8   :  { %v3946_v46 = vrot.slane %v3944_v44, 7  ;;  %v3951_v47 = vshrl.u32 %v6817_v2, 16  ;;  %v3954_v42 = vshll.u32 %v6817_v2, 16 }
0x10da   :  { %v3949_v62 = vor.u32 %v3947_v20, %v3946_v46  ;;  %v3953_v10 = vrot.slane %v3951_v47, 7 }
0x10dc   :  { %3957 = vrot.lane.b32.xlu1 %v3949_v62, %s8487_s3  ;;  %v3956_v21 = vor.u32 %v3954_v42, %v3953_v10 }
0x10de   :  { %3959 = vrot.lane.b32.xlu0 %v3956_v21, %s8487_s3 }
0x114e   :  { %v3958_v55 = vpop.permute.xlu1 %3957 }
0x114f   :  { %v3964_v56 = vsel %vm9465_vm10, %v3958_v55, %v3963_v52 }
0x1150   :  { %3965 = vst [vmem:[#allocation5] sm:$0x7] %v3964_v56  ;;  %v3960_v58 = vpop.permute.xlu0 %3959 }
0x1151   :  { %v3967_v59 = vsel %vm9465_vm10, %v3960_v58, %v3966_v57 }
0x1152   :  { %3968 = vst [vmem:[#allocation5 + $0x4] sm:$0x7] %v3967_v59 }
0x1157   :  { %v7629_v4 = vld [vmem:[#allocation5] ss:$0 sps:$4 sm:$0x77]  }
0x1158   :  { %v3984_v5 = vshll.u32 %v7629_v4, 16  ;;  %v3982_v11 = vshrl.u32 %v7629_v4, 16  ;;  %v7631_v22 = vld [vmem:[#allocation5] ss:$0 sps:$4 sm:$0x66]  }
0x1159   :  { %v7630_v8 = vld [vmem:[#allocation5 + $0x4] ss:$0 sps:$4 sm:$0x77]   ;;  %v4005_v25 = vrot.slane %v7631_v22, 1  ;;  %v3969_v31 = vld [vmem:[#allocation5] sm:$0x3] }
0x115a   :  { %v3986_v12 = vrot.slane %v3984_v5, 1  ;;  %v3991_v13 = vshll.u32 %v7630_v8, 16  ;;  %v3989_v0 = vshrl.u32 %v7630_v8, 16  ;;  %v7632_v34 = vld [vmem:[#allocation5 + $0x4] ss:$0 sps:$4 sm:$0x66]  }
0x115b   :  { %v4006_v18 = vrot.slane %v7632_v34, 1  ;;  %v3970_v63 = vld [vmem:[#allocation5 + $0x4] sm:$0x3] }
0x115c   :  { %v3987_v33 = vor.u32 %v3986_v12, %v3982_v11  ;;  %v3993_v23 = vrot.slane %v3991_v13, 1  ;;  %v7643_v12 = vld [vmem:[#allocation28] sm:$0xff]   ;;  %v7644_v13 = vld [vmem:[#allocation28 + $0x8] sm:$0xff]  }
0x115d   :  { %7340 = vmatpush3.bf16.msra.mxu0 %v7643_v12  ;;  %v9715_v12 = vld [vmem:[#allocation7] sm:$0xf] }
0x115e   :  { %3995 = vrot.lane.b32.xlu1 %v3987_v33, %s8515_s10  ;;  %v3994_v19 = vor.u32 %v3993_v23, %v3989_v0  ;;  %7341 = vmatprep.subr.bf16.mxu0 %v8517_v38  ;;  %v4178_v33 = vld [vmem:[#allocation5] sm:$0x7]  ;;  %v4181_v23 = vld [vmem:[#allocation5 + $0x4] sm:$0x7] }
0x1160   :  { %3997 = vrot.lane.b32.xlu0 %v3994_v19, %s8515_s10 }
0x1161   :  { %7342 = vmatpush3.bf16.msra.mxu0 %v7644_v13  ;;  %v7812_v13 = vld [vmem:[#allocation7 + $0x4] sm:$0x1] }
0x1162   :  { %4007 = vrot.lane.b32.xlu1 %v4005_v25, %s8487_s3  ;;  %7343 = vmatprep.subr.bf16.mxu0 %v8517_v38  ;;  %v7646_v25 = vld [vmem:[#allocation28 + $0x18] sm:$0xff]  }
0x1164   :  { %4009 = vrot.lane.b32.xlu0 %v4006_v18, %s8487_s3  ;;  %v7647_v18 = vld [vmem:[#allocation28 + $0x20] sm:$0xff]  }
0x1165   :  { %7344 = vmatpush3.bf16.msra.mxu0 %v7645_v16  ;;  %v6639_v16 = vcombine.low %v9715_v12, %v7812_v13 }
0x1166   :  { %7345 = vmatprep.subr.bf16.mxu0 %v8517_v38 }
0x1169   :  { %7346 = vmatpush3.bf16.msra.mxu0 %v7646_v25 }
0x116a   :  { %7347 = vmatprep.subr.bf16.mxu0 %v8517_v38 }
0x116d   :  { %7348 = vmatpush3.bf16.msra.mxu0 %v7647_v18 }
0x116e   :  { %7349 = vmatprep.subr.bf16.mxu0 %v8517_v38 }
0x11d0   :  { %v3996_v28 = vpop.permute.xlu1 %3995 }
0x11d1   :  { %v4013_v53 = vsel %vm2811_vm11, %v3969_v31, %v3996_v28 }
0x11d2   :  { %v3998_v30 = vpop.permute.xlu0 %3997 }
0x11d3   :  { %v4016_v27 = vsel %vm2811_vm11, %v3970_v63, %v3998_v30 }
0x11d4   :  { %v4008_v24 = vpop.permute.xlu1 %4007 }
0x11d5   :  { %v4018_v35 = vsel %vm1897_vm5, %v4013_v53, %v4008_v24 }
0x11d6   :  { %v4010_v15 = vpop.permute.xlu0 %4009 }
0x11d7   :  { %v4020_v54 = vsel %vm1897_vm5, %v4016_v27, %v4010_v15  ;;  %v7648_v27 = vld [vmem:[#allocation28 + $0x28] sm:$0xff]  }
0x11d8   :  { %v4035_v40 = vcombine.low %v4018_v35, %v4020_v54  ;;  %7350 = vmatpush3.bf16.msra.mxu0 %v7648_v27 }
0x11da   :  { %v4042_v14 = vrot.slane %v4035_v40, %v9513_v1 }
0x11dc   :  { %7336 = vmatmul.mubr.msk.bf16.vlgmr.msra.gmra.mrb[48].mxu1 %vm777_vm4, %v4042_v14 }
0x11dd   :  { %7357 = vmatprep.mubr.msk.bf16.mxu1 %vm8518_vm15, %v8517_v38 }
0x12af   :  { %v4116_v49 = vpop.f32.mrb[48].mxu1 }
0x12b0   :  { %v4122_v41 = vadd.f32 %v4116_v49, %v9612_v3  ;;  %v7337_v43 = vpop.f32.mrb[49].mxu1 }
0x12b1   :  { %v4119_v2 = vpop.f32.mrb[50].mxu1 }
0x12b2   :  { %7796 = vtanh.f32 %v4122_v41  ;;  %v7338_v44 = vpop.f32.mrb[51].mxu1  ;;  %v6611_v20 = vmul.f32 -1.442695, %v4122_v41 }
0x12b4   :  { %7798 = vpow2.f32 %v6611_v20 }
0x12bc   :  { %v7797_v46 = vpop.eup %7796 }
0x12bd   :  { %4132 = vrot.lane.b32.xlu1 %v7797_v46, %s8515_s10 }
0x12be   :  { %v7799_v47 = vpop.eup %7798 }
0x12bf   :  { %v4126_v62 = vadd.f32 1.0, %v7799_v47 }
0x12c1   :  { %7800 = vrcp.f32 %v4126_v62 }
0x12cb   :  { %v7801_v10 = vpop.eup %7800 }
0x12cc   :  { %v4130_v48 = vmul.f32 %v7801_v10, %v9652_v37 }
0x132f   :  { %v4133_v42 = vpop.permute.xlu1 %4132 }
0x1330   :  { %v4135_v21 = vmul.f32 %v7801_v10, %v4133_v42 }
0x1332   :  { %4137 = vrot.lane.b32.xlu0 %v4135_v21, %s8515_s10 }
0x13a4   :  { %v4138_v3 = vpop.permute.xlu0 %4137 }
0x13a5   :  { %v9684_v50 = vadd.f32 %v4138_v3, %v4130_v48 }
0x13a7   :  { %7802 = vtanh.f32 %v9684_v50 }
0x13b1   :  { %v7803_v45 = vpop.eup %7802 }
0x13b2   :  { %4143 = vrot.lane.b32.xlu1 %v7803_v45, %s8515_s10 }
0x1424   :  { %v4144_v52 = vpop.permute.xlu1 %4143 }
0x1425   :  { %v4146_v55 = vmul.f32 %v7801_v10, %v4144_v52 }
0x1427   :  { %v4148_v56 = vcombine.high %v4146_v55, %v4146_v55  ;;  %v6818_v57 = vpack.c.bf16 %v4146_v55, %v4146_v55 }
0x1429   :  { %v6819_v58 = vpack.c.bf16 %v4148_v56, %v4148_v56  ;;  %v4159_v59 = vshrl.u32 %v6818_v57, 16  ;;  %v4162_v61 = vshll.u32 %v6818_v57, 16 }
0x142b   :  { %v4161_v60 = vrot.slane %v4159_v59, 7  ;;  %v4166_v4 = vshrl.u32 %v6819_v58, 16  ;;  %v4169_v37 = vshll.u32 %v6819_v58, 16 }
0x142d   :  { %v4164_v5 = vor.u32 %v4162_v61, %v4161_v60  ;;  %v4168_v8 = vrot.slane %v4166_v4, 7 }
0x142f   :  { %4172 = vrot.lane.b32.xlu0 %v4164_v5, %s8487_s3  ;;  %v4171_v11 = vor.u32 %v4169_v37, %v4168_v8 }
0x1431   :  { %4174 = vrot.lane.b32.xlu1 %v4171_v11, %s8487_s3 }
0x14a1   :  { %v4173_v22 = vpop.permute.xlu0 %4172 }
0x14a2   :  { %v4179_v0 = vsel %vm9465_vm10, %v4173_v22, %v4178_v33  ;;  %v4631_v33 = vshll.u32 %v6639_v16, 16 }
0x14a3   :  { %4180 = vst [vmem:[#allocation5] sm:$0x7] %v4179_v0  ;;  %v4175_v19 = vpop.permute.xlu1 %4174 }
0x14a4   :  { %v4182_v34 = vsel %vm9465_vm10, %v4175_v19, %v4181_v23  ;;  %v4633_v22 = vrot.slane %v4631_v33, 1  ;;  %v4629_v23 = vshrl.u32 %v6639_v16, 16 }
0x14a5   :  { %4183 = vst [vmem:[#allocation5 + $0x4] sm:$0x7] %v4182_v34  ;;  %v7813_v34 = vld [vmem:[#allocation7 + $0xc] sm:$0x1] }
0x14a6   :  { %v4634_v19 = vor.u32 %v4633_v22, %v4629_v23  ;;  %v4546_v23 = vld [vmem:[#allocation8] sm:$0xf] }
0x14aa   :  { %v7639_v28 = vld [vmem:[#allocation5] ss:$0 sps:$4 sm:$0x77]  }
0x14ab   :  { %v4199_v30 = vshll.u32 %v7639_v28, 16  ;;  %v4197_v31 = vshrl.u32 %v7639_v28, 16  ;;  %v7641_v35 = vld [vmem:[#allocation5] ss:$0 sps:$4 sm:$0x66]  }
0x14ac   :  { %v7640_v24 = vld [vmem:[#allocation5 + $0x4] ss:$0 sps:$4 sm:$0x77]   ;;  %v4220_v41 = vrot.slane %v7641_v35, 1  ;;  %v4184_v20 = vld [vmem:[#allocation5] sm:$0x3] }
0x14ad   :  { %v4201_v63 = vrot.slane %v4199_v30, 1  ;;  %v4206_v53 = vshll.u32 %v7640_v24, 16  ;;  %v4204_v54 = vshrl.u32 %v7640_v24, 16  ;;  %v7642_v49 = vld [vmem:[#allocation5 + $0x4] ss:$0 sps:$4 sm:$0x66]  }
0x14ae   :  { %v4221_v43 = vrot.slane %v7642_v49, 1  ;;  %v4185_v47 = vld [vmem:[#allocation5 + $0x4] sm:$0x3]  ;;  %v7651_v35 = vld [vmem:[#allocation46] sm:$0xff]  }
0x14af   :  { %v4202_v15 = vor.u32 %v4201_v63, %v4197_v31  ;;  %v4208_v40 = vrot.slane %v4206_v53, 1 }
0x14b1   :  { %4210 = vrot.lane.b32.xlu0 %v4202_v15, %s8515_s10  ;;  %v4209_v14 = vor.u32 %v4208_v40, %v4204_v54  ;;  %v7652_v54 = vld [vmem:[#allocation47] sm:$0xff]   ;;  %v7653_v40 = vld [vmem:[#allocation47 + $0x8] sm:$0xff]  }
0x14b3   :  { %4212 = vrot.lane.b32.xlu1 %v4209_v14, %s8515_s10 }
0x14b5   :  { %4222 = vrot.lane.b32.xlu0 %v4220_v41, %s8487_s3 }
0x14b7   :  { %4224 = vrot.lane.b32.xlu1 %v4221_v43, %s8487_s3 }
0x1523   :  { %v4211_v2 = vpop.permute.xlu0 %4210 }
0x1524   :  { %v4228_v62 = vsel %vm2811_vm11, %v4184_v20, %v4211_v2  ;;  %v7662_v20 = vld [vmem:[#allocation31 + $0x80] sm:$0xff]  }
0x1525   :  { %v4213_v44 = vpop.permute.xlu1 %4212 }
0x1526   :  { %v4231_v10 = vsel %vm2811_vm11, %v4185_v47, %v4213_v44  ;;  %v7660_v44 = vld [vmem:[#allocation31 + $0x40] sm:$0xff]   ;;  %v7663_v47 = vld [vmem:[#allocation31 + $0x48] sm:$0xff]  }
0x1527   :  { %v4223_v46 = vpop.permute.xlu0 %4222  ;;  %6953 = vmatprep.subr.bf16.mxu0 %v7660_v44 }
0x1528   :  { %v4233_v21 = vsel %vm1897_vm5, %v4228_v62, %v4223_v46  ;;  %v7661_v46 = vld [vmem:[#allocation31] sm:$0xff]   ;;  %v7665_v62 = vld [vmem:[#allocation31 + $0x88] sm:$0xff]  }
0x1529   :  { %v4225_v42 = vpop.permute.xlu1 %4224 }
0x152a   :  { %v4235_v48 = vsel %vm1897_vm5, %v4231_v10, %v4225_v42  ;;  %v7664_v10 = vld [vmem:[#allocation31 + $0x8] sm:$0xff]   ;;  %v7666_v42 = vld [vmem:[#allocation31 + $0x50] sm:$0xff]  }
0x152b   :  { %v4250_v3 = vcombine.low %v4233_v21, %v4235_v48  ;;  %v7668_v21 = vld [vmem:[#allocation31 + $0x90] sm:$0xff]  }
0x152c   :  { %v7667_v48 = vld [vmem:[#allocation31 + $0x10] sm:$0xff]  }
0x152d   :  { %v4257_v45 = vrot.slane %v4250_v3, %v9513_v1  ;;  %v7669_v3 = vld [vmem:[#allocation31 + $0x58] sm:$0xff]  }
0x152f   :  { %7352 = vmatmul.mubr.msk.bf16.vlgmr.msra.gmra.mrb[64].mxu0 %vm777_vm4, %v4257_v45  ;;  %vm4408_vm4 = vcmask 64512   ;;  %v7671_v45 = vld [vmem:[#allocation31 + $0x98] sm:$0xff]  }
0x1530   :  { %6954 = vmatpush3.bf16.msra.mxu0 %v7661_v46 }
0x1531   :  { %6955 = vmatprep.subr.bf16.mxu0 %v7663_v47 }
0x1534   :  { %6956 = vmatpush3.bf16.msra.mxu0 %v7664_v10 }
0x1535   :  { %6957 = vmatprep.subr.bf16.mxu0 %v7666_v42 }
0x1538   :  { %6958 = vmatpush3.bf16.msra.mxu0 %v7667_v48 }
0x1539   :  { %6959 = vmatprep.subr.bf16.mxu0 %v7669_v3 }
0x1602   :  { %v4331_v52 = vpop.f32.mrb[64].mxu0 }
0x1603   :  { %v4337_v55 = vadd.f32 %v4331_v52, %v9614_v51  ;;  %v7353_v56 = vpop.f32.mrb[65].mxu0  ;;  %v7670_v52 = vld [vmem:[#allocation31 + $0x18] sm:$0xff]  }
0x1604   :  { %v4334_v57 = vpop.f32.mrb[66].mxu0  ;;  %v7674_v56 = vld [vmem:[#allocation31 + $0xa0] sm:$0xff]   ;;  %6960 = vmatpush3.bf16.msra.mxu0 %v7670_v52 }
0x1605   :  { %7804 = vtanh.f32 %v4337_v55  ;;  %v7354_v58 = vpop.f32.mrb[67].mxu0  ;;  %v6625_v60 = vmul.f32 -1.442695, %v4337_v55  ;;  %v7672_v55 = vld [vmem:[#allocation31 + $0x60] sm:$0xff]  }
0x1606   :  { %v7673_v57 = vld [vmem:[#allocation31 + $0x20] sm:$0xff]   ;;  %6961 = vmatprep.subr.bf16.mxu0 %v7672_v55  ;;  %v7675_v58 = vld [vmem:[#allocation31 + $0x68] sm:$0xff]  }
0x1607   :  { %7806 = vpow2.f32 %v6625_v60  ;;  %v7676_v60 = vld [vmem:[#allocation31 + $0x28] sm:$0xff]  }
0x1608   :  { %6962 = vmatpush3.bf16.msra.mxu0 %v7673_v57 }
0x1609   :  { %6963 = vmatprep.subr.bf16.mxu0 %v7675_v58 }
0x160c   :  { %6964 = vmatpush3.bf16.msra.mxu0 %v7676_v60 }
0x160f   :  { %v7805_v59 = vpop.eup %7804 }
0x1610   :  { %4347 = vrot.lane.b32.xlu0 %v7805_v59, %s8515_s10  ;;  %v7677_v59 = vld [vmem:[#allocation31 + $0xa8] sm:$0xff]  }
0x1611   :  { %v7807_v61 = vpop.eup %7806 }
0x1612   :  { %v4341_v4 = vadd.f32 1.0, %v7807_v61  ;;  %v7678_v61 = vld [vmem:[#allocation31 + $0x70] sm:$0xff]  }
0x1613   :  { %6965 = vmatprep.subr.bf16.mxu0 %v7678_v61 }
0x1614   :  { %7808 = vrcp.f32 %v4341_v4  ;;  %v7679_v4 = vld [vmem:[#allocation31 + $0x30] sm:$0xff]  }
0x1615   :  { %6966 = vmatpush3.bf16.msra.mxu0 %v7679_v4 }
0x161e   :  { %v7809_v5 = vpop.eup %7808 }
0x161f   :  { %v4345_v37 = vmul.f32 %v7809_v5, %v9684_v50  ;;  %v9721_v50 = vld [vmem:[#allocation7 + $0x8] sm:$0xf] }
0x1620   :  { %v6640_v25 = vcombine.low %v9721_v50, %v7813_v34 }
0x1622   :  { %v4638_v18 = vshll.u32 %v6640_v25, 16  ;;  %v4636_v63 = vshrl.u32 %v6640_v25, 16 }
0x1624   :  { %v4640_v31 = vrot.slane %v4638_v18, 1 }
0x1626   :  { %v4641_v53 = vor.u32 %v4640_v31, %v4636_v63  ;;  %v4552_v31 = vld [vmem:[#allocation8 + $0x8] sm:$0xf]  ;;  %v4555_v63 = vld [vmem:[#allocation8 + $0xc] sm:$0x1] }
0x1682   :  { %v4348_v8 = vpop.permute.xlu0 %4347 }
0x1683   :  { %v4350_v1 = vmul.f32 %v7809_v5, %v4348_v8 }
0x1685   :  { %4352 = vrot.lane.b32.xlu1 %v4350_v1, %s8515_s10 }
0x16f7   :  { %v4353_v51 = vpop.permute.xlu1 %4352 }
0x16f8   :  { %v9713_v11 = vadd.f32 %v4353_v51, %v4345_v37 }
0x16fa   :  { %7810 = vtanh.f32 %v9713_v11 }
0x1704   :  { %v7811_v0 = vpop.eup %7810 }
0x1705   :  { %4358 = vrot.lane.b32.xlu0 %v7811_v0, %s8515_s10 }
0x1709   :  { %4642 = vrot.lane.b32.xlu0 %v4634_v19, %s8487_s3  ;;  %v4549_v19 = vld [vmem:[#allocation8 + $0x4] sm:$0x1] }
0x1777   :  { %v4359_v28 = vpop.permute.xlu0 %4358 }
0x1778   :  { %v9724_v30 = vmul.f32 %v7809_v5, %v4359_v28 }
0x177a   :  { %v9728_v24 = vpack.c.bf16 %v9724_v30, %v9724_v30  ;;  %v4363_v26 = vcombine.high %v9724_v30, %v9724_v30 }
0x177b   :  { %v4643_v58 = vpop.permute.xlu0 %4642 }
0x177c   :  { %4406 = vrot.lane.b32.xlu1 %v9728_v24, %s8487_s3  ;;  %v6821_v57 = vpack.c.bf16 %v4363_v26, %v4363_v26 }
0x1780   :  { %4644 = vrot.lane.b32.xlu1 %v4641_v53, %s8487_s3 }
0x17ee   :  { %v4407_v27 = vpop.permute.xlu1 %4406 }
0x17ef   :  { %v4414_v15 = vsel %vm1066_vm9, %v4407_v27, 0 }
0x17f0   :  { %7356 = vmatpush3.bf16.msra.mxu1 %v4414_v15 }
0x17f1   :  { %7361 = vmatprep.subr.bf16.mxu1 %v8517_v38 }
0x17f2   :  { %v4645_v3 = vpop.permute.xlu1 %4644 }
0x17f3   :  { %7358 = vmatmul.mubr.msk.bf16.vlgmr.msra.gmra.mrb[52].mxu1 %vm4408_vm4, %v7651_v35  ;;  %v4659_v4 = vsel %vm1897_vm5, %v9721_v50, %v4645_v3  ;;  %v4377_v50 = vshll.u32 %v9728_v24, 16  ;;  %v7685_v3 = vld [vmem:[#allocation49 + $0x8] sm:$0xff]  }
0x17f4   :  { %7362 = vmatpush3.bf16.msra.mxu1 %v7652_v54  ;;  %7365 = vmatprep.mubr.msk.bf16.mxu1 %vm8518_vm15, %v8517_v38 }
0x17f5   :  { %7363 = vmatprep.subr.bf16.mxu1 %v8517_v38 }
0x17f8   :  { %7364 = vmatpush3.bf16.msra.mxu1 %v7653_v40 }
0x17f9   :  { %7369 = vmatprep.subr.bf16.mxu1 %v8517_v38 }
0x18c6   :  { %v4450_v14 = vpop.f32.mrb[52].mxu1 }
0x18c7   :  { %v7359_v49 = vpop.f32.mrb[53].mxu1 }
0x18c8   :  { %v4453_v41 = vpop.f32.mrb[54].mxu1  ;;  %v7681_v49 = vld [vmem:[#allocation31 + $0x78] sm:$0xff]  }
0x18c9   :  { %v4457_v43 = vpack.c.bf16 %v4453_v41, %v4450_v14  ;;  %v7360_v2 = vpop.f32.mrb[55].mxu1  ;;  %v7680_v14 = vld [vmem:[#allocation31 + $0xb0] sm:$0xff]   ;;  %v7682_v41 = vld [vmem:[#allocation31 + $0x38] sm:$0xff]   ;;  %6967 = vmatprep.subr.bf16.mxu0 %v7681_v49 }
0x18ca   :  { %6968 = vmatpush3.bf16.msra.mxu0 %v7682_v41 }
0x18cb   :  { %7366 = vmatmul.mubr.msk.bf16.vlgmr.msra.gmra.mrb[56].mxu1 %vm2811_vm11, %v4457_v43  ;;  %v7683_v43 = vld [vmem:[#allocation31 + $0xb8] sm:$0xff]  }
0x18cc   :  { %7385 = vmatprep.mubr.msk.bf16.mxu1 %vm8518_vm15, %v8517_v38  ;;  %7370 = vmatpush3.bf16.msra.mxu1 %v7662_v20 }
0x18cd   :  { %7371 = vmatprep.subr.bf16.mxu1 %v8517_v38 }
0x18d0   :  { %7372 = vmatpush3.bf16.msra.mxu1 %v7665_v62 }
0x18d1   :  { %7373 = vmatprep.subr.bf16.mxu1 %v8517_v38 }
0x18d4   :  { %7374 = vmatpush3.bf16.msra.mxu1 %v7668_v21 }
0x18d5   :  { %7375 = vmatprep.subr.bf16.mxu1 %v8517_v38 }
0x18d8   :  { %7376 = vmatpush3.bf16.msra.mxu1 %v7671_v45 }
0x18d9   :  { %7377 = vmatprep.subr.bf16.mxu1 %v8517_v38 }
0x18dc   :  { %7378 = vmatpush3.bf16.msra.mxu1 %v7674_v56 }
0x18dd   :  { %7379 = vmatprep.subr.bf16.mxu1 %v8517_v38 }
0x18e0   :  { %7380 = vmatpush3.bf16.msra.mxu1 %v7677_v59 }
0x18e1   :  { %7381 = vmatprep.subr.bf16.mxu1 %v8517_v38 }
0x18e4   :  { %7382 = vmatpush3.bf16.msra.mxu1 %v7680_v14  ;;  %v6647_v14 = vld [vmem:[#allocation32] ss:$0 sm:$0xff] }
0x18e5   :  { %7383 = vmatprep.subr.bf16.mxu1 %v8517_v38 }
0x18e8   :  { %7384 = vmatpush3.bf16.msra.mxu1 %v7683_v43 }
0x199e   :  { %v4511_v5 = vpop.f32.mrb[56].mxu1 }
0x199f   :  { %v6822_v8 = vpack.c.bf16 %v4511_v5, %v4511_v5  ;;  %v7367_v1 = vpop.f32.mrb[57].mxu1 }
0x19a0   :  { %v4514_v37 = vpop.f32.mrb[58].mxu1  ;;  %v4374_v1 = vshrl.u32 %v9728_v24, 16 }
0x19a1   :  { %v4527_v51 = vshrl.u32 %v6822_v8, 16  ;;  %v6823_v13 = vpack.c.bf16 %v4514_v37, %v4514_v37  ;;  %v7368_v16 = vpop.f32.mrb[59].mxu1  ;;  %v4530_v22 = vshll.u32 %v6822_v8, 16  ;;  %v4656_v37 = vsel %vm1897_vm5, %v9715_v12, %v4643_v58 }
0x19a2   :  { %v4376_v16 = vrot.slane %v4374_v1, 7  ;;  %v4384_v12 = vshll.u32 %v6821_v57, 16  ;;  %v7693_v1 = vld [vmem:[#allocation34 + $0x80] sm:$0xff]  }
0x19a3   :  { %v4529_v33 = vrot.slane %v4527_v51, 7  ;;  %v4535_v0 = vshrl.u32 %v6823_v13, 16  ;;  %v4538_v28 = vshll.u32 %v6823_v13, 16  ;;  %v6645_v51 = vcombine.low %v4656_v37, %v4659_v4  ;;  %v5256_v37 = vld [vmem:[#allocation6] sm:$0xf] }
0x19a4   :  { %v4381_v13 = vshrl.u32 %v6821_v57, 16  ;;  %v7696_v57 = vld [vmem:[#allocation34] sm:$0xff]  }
0x19a5   :  { %v4532_v34 = vor.u32 %v4530_v22, %v4529_v33  ;;  %v4533_v25 = vrot.slane %v4529_v33, 4  ;;  %v4537_v18 = vrot.slane %v4535_v0, 7  ;;  %v4379_v22 = vor.u32 %v4377_v50, %v4376_v16  ;;  %v7697_v16 = vld [vmem:[#allocation34 + $0x88] sm:$0xff]  }
0x19a6   :  { %v4383_v33 = vrot.slane %v4381_v13, 7  ;;  %v7698_v50 = vld [vmem:[#allocation34 + $0x48] sm:$0xff]  }
0x19a7   :  { %v4547_v53 = vsel %vm9315_vm2, %v4532_v34, %v4546_v23  ;;  %v4550_v27 = vsel %vm9184_vm7, %v4533_v25, %v4549_v19  ;;  %v4540_v15 = vor.u32 %v4538_v28, %v4537_v18  ;;  %v4541_v35 = vrot.slane %v4537_v18, 4 }
0x19a8   :  { %4548 = vst [vmem:[#allocation8] sm:$0xf] %v4547_v53  ;;  %4551 = vst [vmem:[#allocation8 + $0x4] sm:$0x1] %v4550_v27  ;;  %v4386_v0 = vor.u32 %v4384_v12, %v4383_v33  ;;  %v7699_v33 = vld [vmem:[#allocation34 + $0xd0] sm:$0xff]  }
0x19a9   :  { %v4553_v54 = vsel %vm9315_vm2, %v4540_v15, %v4552_v31  ;;  %v4556_v40 = vsel %vm9184_vm7, %v4541_v35, %v4555_v63  ;;  %v4396_v63 = vld [vmem:[#allocation5 + $0x4] sm:$0x7]  ;;  %v7701_v12 = vld [vmem:[#allocation34 + $0x90] sm:$0xff]  }
0x19aa   :  { %4554 = vst [vmem:[#allocation8 + $0x8] sm:$0xf] %v4553_v54  ;;  %4557 = vst [vmem:[#allocation8 + $0xc] sm:$0x1] %v4556_v40  ;;  %v7684_v35 = vld [vmem:[#allocation49] sm:$0xff]  }
0x19af   :  { %v4558_v2 = vld [vmem:[#allocation8] sm:$0xf]  ;;  %v4560_v44 = vld [vmem:[#allocation8 + $0x4] sm:$0x1] }
0x19b0   :  { %v4562_v46 = vld [vmem:[#allocation8] sm:$0xe]  ;;  %v6635_v20 = vcombine.low %v4558_v2, %v4560_v44 }
0x19b1   :  { %v6637_v47 = vcombine.low %v4562_v46, %v4560_v44  ;;  %v4559_v7 = vld [vmem:[#allocation8 + $0x8] sm:$0xf]  ;;  %v4561_v62 = vld [vmem:[#allocation8 + $0xc] sm:$0x1] }
0x19b2   :  { %v4563_v10 = vld [vmem:[#allocation8 + $0x8] sm:$0xe]  ;;  %v4577_v42 = vshll.u32 %v6635_v20, 16  ;;  %v6636_v21 = vcombine.low %v4559_v7, %v4561_v62  ;;  %v4575_v38 = vshrl.u32 %v6635_v20, 16 }
0x19b3   :  { %v6638_v48 = vcombine.low %v4563_v10, %v4561_v62  ;;  %v4598_v55 = vrot.slane %v6637_v47, 1 }
0x19b4   :  { %v4579_v45 = vrot.slane %v4577_v42, 1  ;;  %v4584_v52 = vshll.u32 %v6636_v21, 16  ;;  %v4582_v60 = vshrl.u32 %v6636_v21, 16 }
0x19b5   :  { %v4599_v56 = vrot.slane %v6638_v48, 1  ;;  %v7686_v48 = vld [vmem:[#allocation50] sm:$0xff]  }
0x19b6   :  { %v4580_v59 = vor.u32 %v4579_v45, %v4575_v38  ;;  %v4586_v61 = vrot.slane %v4584_v52, 1  ;;  %v7687_v38 = vld [vmem:[#allocation50 + $0x8] sm:$0xff]   ;;  %v7688_v45 = vld [vmem:[#allocation50 + $0x10] sm:$0xff]   ;;  %v7689_v52 = vld [vmem:[#allocation50 + $0x18] sm:$0xff]  }
0x19b7   :  { %v6644_v5 = vcombine.low %v4598_v55, %v4599_v56  ;;  %v7692_v55 = vld [vmem:[#allocation34 + $0xc0] sm:$0xff]  }
0x19b8   :  { %4588 = vrot.lane.b32.xlu0 %v4580_v59, %s8487_s3  ;;  %v4587_v8 = vor.u32 %v4586_v61, %v4582_v60  ;;  %v7694_v56 = vld [vmem:[#allocation34 + $0x40] sm:$0xff]  }
0x19b9   :  { %6993 = vmatprep.subr.bf16.mxu0 %v7694_v56 }
0x19ba   :  { %4590 = vrot.lane.b32.xlu1 %v4587_v8, %s8487_s3 }
0x19bc   :  { %4671 = vrot.lane.b32.xlu0 %v6645_v51, %s8487_s3  ;;  %v7695_v51 = vld [vmem:[#allocation34 + $0xc8] sm:$0xff]  }
0x19be   :  { %4673 = vrot.lane.b32.xlu1 %v6646_v39, %s8487_s3 }
0x19c0   :  { %6297 = vrot.lane.b32.xlu0 %v9724_v30, %s8487_s3 }
0x19c2   :  { %4387 = vrot.lane.b32.xlu1 %v4379_v22, %s8487_s3  ;;  %v7700_v22 = vld [vmem:[#allocation34 + $0x8] sm:$0xff]  }
0x19c4   :  { %4389 = vrot.lane.b32.xlu0 %v4386_v0, %s8487_s3  ;;  %v7702_v0 = vld [vmem:[#allocation34 + $0x50] sm:$0xff]   ;;  %s8519_s3 = smov [#allocation53]  }
0x19c5   :  { %s6324_s19 = sshll.u32 %s8519_s3, 4  ;;  %s6325_s19 = int_to_ptr.vmem [resolvable:$true] %s6324_s19 }
0x19c6   :  { %6302 = vrot.lane.b32.xlu1 %v9713_v11, %s8514_s7  ;;  %v4393_v11 = vld [vmem:[#allocation5] sm:$0x7]  ;;  %s8386_s27 = scalar_lea.vmem %s6325_s19, 128  ;;  %p8391_p13 = scmp.lt.s32.totalorder %s6325_s19, %s6325_s19 }
0x19c7   :  { %p8387_p12 = scmp.ne.s32.totalorder %s6325_s19, %s8386_s27  ;;  %p8392_p0 = scmp.lt.s32.totalorder %s8386_s27, %s8386_s27 }
0x19c9   :  { %p8393_p1 = por %p8392_p0, %p8391_p13 }
0x19cb   :  { %p8394_p2 = pnand %p8393_p1, %p8387_p12 }
0x1a2a   :  { %v4589_v23 = vpop.permute.xlu0 %4588 }
0x1a2b   :  { %v4602_v36 = vsel %vm1897_vm5, %v4558_v2, %v4589_v23  ;;  %v7703_v23 = vld [vmem:[#allocation34 + $0xd8] sm:$0xff]  }
0x1a2c   :  { %v4591_v19 = vpop.permute.xlu1 %4590 }
0x1a2d   :  { %v4605_v29 = vsel %vm1897_vm5, %v4559_v7, %v4591_v19  ;;  %v7704_v19 = vld [vmem:[#allocation34 + $0x10] sm:$0xff]  }
0x1a2e   :  { %v6643_v39 = vcombine.low %v4602_v36, %v4605_v29  ;;  %v4672_v24 = vpop.permute.xlu0 %4671  ;;  %v7705_v36 = vld [vmem:[#allocation34 + $0x98] sm:$0xff]  }
0x1a2f   :  { %v4680_v30 = vsel %vm1897_vm5, %v6644_v5, %v4672_v24  ;;  %v9790_v5 = vld [vmem:[#allocation6 + $0x4] sm:$0xf]  ;;  %v7706_v29 = vld [vmem:[#allocation34 + $0x58] sm:$0xff]  }
0x1a30   :  { %v4674_v34 = vpop.permute.xlu1 %4673  ;;  %4913 = vmatprep.mubr.bf16.mxu0 %v4680_v30  ;;  %v9794_v13 = vcombine.low %v5256_v37, %v9790_v5  ;;  %v7709_v30 = vld [vmem:[#allocation34 + $0xa0] sm:$0xff]  }
0x1a31   :  { %v4676_v25 = vsel %vm1897_vm5, %v4672_v24, %v4674_v34  ;;  %4914 = vmatmul.mubr.bf16.vlgmr.msra.gmra.mrb[68].mxu0 %v6643_v39  ;;  %v7707_v39 = vld [vmem:[#allocation34 + $0xe0] sm:$0xff]   ;;  %v7708_v24 = vld [vmem:[#allocation34 + $0x18] sm:$0xff]  }
0x1a32   :  { %7386 = vmatmul.mubr.bf16.vlgmr.msra.gmra.mrb[60].mxu1 %v4676_v25  ;;  %v6298_v18 = vpop.permute.xlu0 %6297  ;;  %6994 = vmatpush3.bf16.msra.mxu0 %v7696_v57  ;;  %v7710_v34 = vld [vmem:[#allocation34 + $0x60] sm:$0xff]   ;;  %v7711_v25 = vld [vmem:[#allocation34 + $0xe8] sm:$0xff]  }
0x1a33   :  { %6300 = vst.msk [vmem:[#allocation53] sm:$0xff] %vm2811_vm11, %v6298_v18  ;;  %7391 = vmatprep.mubr.msk.bf16.mxu1 %vm881_vm3, %v7684_v35  ;;  %6995 = vmatprep.subr.bf16.mxu0 %v7698_v50  ;;  %v7712_v18 = vld [vmem:[#allocation34 + $0x20] sm:$0xff]   ;;  %v7720_v35 = vld [vmem:[#allocation34 + $0x30] sm:$0xff]  }
0x1a34   :  { %v4388_v28 = vpop.permute.xlu1 %4387  ;;  %v5180_v37 = vld [vmem:[#allocation9 + $0x8] sm:$0x1] }
0x1a35   :  { %v4394_v31 = vsel %vm9465_vm10, %v4388_v28, %v4393_v11  ;;  %v7713_v11 = vld [vmem:[#allocation34 + $0xa8] sm:$0xff]  }
0x1a36   :  { %4395 = vst [vmem:[#allocation5] sm:$0x7] %v4394_v31  ;;  %v4390_v53 = vpop.permute.xlu0 %4389  ;;  %6996 = vmatpush3.bf16.msra.mxu0 %v7700_v22  ;;  %v7714_v28 = vld [vmem:[#allocation34 + $0x68] sm:$0xff]   ;;  %v7715_v31 = vld [vmem:[#allocation34 + $0xf0] sm:$0xff]  }
0x1a37   :  { %v4397_v27 = vsel %vm9465_vm10, %v4390_v53, %v4396_v63  ;;  %6997 = vmatprep.subr.bf16.mxu0 %v7702_v0  ;;  %v7716_v63 = vld [vmem:[#allocation34 + $0x28] sm:$0xff]   ;;  %v7717_v53 = vld [vmem:[#allocation34 + $0xb0] sm:$0xff]  }
0x1a38   :  { %4398 = vst [vmem:[#allocation5 + $0x4] sm:$0x7] %v4397_v27  ;;  %v6303_v15 = vpop.permute.xlu1 %6302  ;;  %v7718_v27 = vld [vmem:[#allocation34 + $0x70] sm:$0xff]  }
0x1a39   :  { %6305 = vst.msk [vmem:[#allocation55] sm:$0xff] %vm2811_vm11, %v6303_v15  ;;  %v7719_v15 = vld [vmem:[#allocation34 + $0xf8] sm:$0xff]  }
0x1a3a   :  { %6998 = vmatpush3.bf16.msra.mxu0 %v7704_v19  ;;  %v9810_v19 = vld [vmem:[#allocation6 + $0x10] sm:$0xf] }
0x1a3b   :  { %6999 = vmatprep.subr.bf16.mxu0 %v7706_v29 }
0x1a3e   :  { %7000 = vmatpush3.bf16.msra.mxu0 %v7708_v24 }
0x1a3f   :  { %7001 = vmatprep.subr.bf16.mxu0 %v7710_v34 }
0x1a42   :  { %7002 = vmatpush3.bf16.msra.mxu0 %v7712_v18 }
0x1a43   :  { %7003 = vmatprep.subr.bf16.mxu0 %v7714_v28 }
0x1a46   :  { %7004 = vmatpush3.bf16.msra.mxu0 %v7716_v63 }
0x1a47   :  { %7005 = vmatprep.subr.bf16.mxu0 %v7718_v27 }
0x1a4a   :  { %7006 = vmatpush3.bf16.msra.mxu0 %v7720_v35 }
0x1b04   :  { %v6969_v54 = vpop.f32.mrb[68].mxu0 }
0x1b05   :  { %v6970_v40 = vpop.f32.mrb[69].mxu0  ;;  %v4956_v49 = vpop.f32.mrb[60].mxu1 }
0x1b06   :  { %v6971_v41 = vadd.f32 %v6970_v40, %v6969_v54  ;;  %v6972_v43 = vpop.f32.mrb[70].mxu0  ;;  %v7387_v2 = vpop.f32.mrb[61].mxu1  ;;  %v7721_v54 = vld [vmem:[#allocation34 + $0xb8] sm:$0xff]  }
0x1b07   :  { %v6973_v44 = vpop.f32.mrb[71].mxu0  ;;  %v4959_v46 = vpop.f32.mrb[62].mxu1  ;;  %v7722_v40 = vld [vmem:[#allocation34 + $0x78] sm:$0xff]  }
0x1b08   :  { %v4916_v20 = vadd.f32 %v6971_v41, %v6647_v14  ;;  %v6974_v47 = vadd.f32 %v6973_v44, %v6972_v43  ;;  %v7388_v32 = vpop.f32.mrb[63].mxu1  ;;  %7007 = vmatprep.subr.bf16.mxu0 %v7722_v40 }
0x1b0a   :  { %v4957_v7 = vadd.f32 %v4956_v49, %v4916_v20  ;;  %v4919_v62 = vadd.f32 %v6974_v47, %v6647_v14  ;;  %v7726_v14 = vld [vmem:[#allocation34 + $0x38] sm:$0xff]   ;;  %v7729_v49 = vld [vmem:[#allocation34 + $0x140] sm:$0xff]  }
0x1b0b   :  { %7008 = vmatpush3.bf16.msra.mxu0 %v7726_v14 }
0x1b0c   :  { %v4960_v10 = vadd.f32 %v4959_v46, %v4919_v62  ;;  %v4963_v26 = vmax.f32 %v4957_v7, 0.0  ;;  %7049 = vmatprep.subr.bf16.mxu0 %v7729_v49 }
0x1b0e   :  { %v4964_v42 = vmax.f32 %v4960_v10, 0.0 }
0x1b10   :  { %v4965_v21 = vpack.c.bf16 %v4964_v42, %v4963_v26 }
0x1b12   :  { %7389 = vmatprep.subr.bf16.mxu1 %v4965_v21 }
0x1b13   :  { %7390 = vmatpush3.bf16.msra.mxu1 %v4965_v21  ;;  %v5183_v21 = vld [vmem:[#allocation9 + $0xc] sm:$0xf] }
0x1b14   :  { %7395 = vmatprep.subr.bf16.mxu1 %v7686_v48 }
0x1b16   :  { %7392 = vmatmul.mubr.msk.bf16.vlgmr.msra.gmra.mrb[64].mxu1 %vm881_vm3, %v7685_v3 }
0x1b17   :  { %7396 = vmatpush3.bf16.msra.mxu1 %v7686_v48 }
0x1b18   :  { %7397 = vmatprep.subr.bf16.mxu1 %v7687_v38 }
0x1b1b   :  { %7398 = vmatpush3.bf16.msra.mxu1 %v7687_v38 }
0x1b1c   :  { %7399 = vmatprep.subr.bf16.mxu1 %v7688_v45 }
0x1b1f   :  { %7400 = vmatpush3.bf16.msra.mxu1 %v7688_v45 }
0x1b20   :  { %7401 = vmatprep.subr.bf16.mxu1 %v7689_v52 }
0x1b23   :  { %7402 = vmatpush3.bf16.msra.mxu1 %v7689_v52  ;;  %v5176_v52 = vld [vmem:[#allocation9] sm:$0xf] }
0x1b24   :  { %7021 = vmatprep.subr.bf16.mxu1 %v7692_v55 }
0x1be9   :  { %v7393_v58 = vpop.f32.mrb[64].mxu1 }
0x1bea   :  { %v5020_v59 = vpop.f32.mrb[65].mxu1 }
0x1beb   :  { %v7394_v60 = vpop.f32.mrb[66].mxu1 }
0x1bec   :  { %v5036_v61 = vpack.c.bf16 %v7394_v60, %v7393_v58  ;;  %v5023_v4 = vpop.f32.mrb[67].mxu1  ;;  %v5187_v58 = vld [vmem:[#allocation9 + $0x14] sm:$0x1] }
0x1bed   :  { %v5035_v8 = vpack.c.bf16 %v5023_v4, %v5020_v59 }
0x1bef   :  { %7403 = vmatprep.mubr.msk.bf16.mxu1 %vm1897_vm5, %v5035_v8 }
0x1bf0   :  { %7404 = vmatmul.mubr.msk.bf16.vlgmr.msra.gmra.mrb[68].mxu1 %vm1897_vm5, %v5036_v61 }
0x1bf1   :  { %5794 = vmatprep.mubr.bf16.mxu1 %v9794_v13  ;;  %7022 = vmatpush3.bf16.msra.mxu1 %v7693_v1 }
0x1bf2   :  { %7023 = vmatprep.subr.bf16.mxu1 %v7695_v51 }
0x1bf5   :  { %7024 = vmatpush3.bf16.msra.mxu1 %v7697_v16 }
0x1bf6   :  { %7025 = vmatprep.subr.bf16.mxu1 %v7699_v33 }
0x1bf9   :  { %7026 = vmatpush3.bf16.msra.mxu1 %v7701_v12 }
0x1bfa   :  { %7027 = vmatprep.subr.bf16.mxu1 %v7703_v23 }
0x1bfd   :  { %7028 = vmatpush3.bf16.msra.mxu1 %v7705_v36 }
0x1bfe   :  { %7029 = vmatprep.subr.bf16.mxu1 %v7707_v39 }
0x1c01   :  { %7030 = vmatpush3.bf16.msra.mxu1 %v7709_v30 }
0x1c02   :  { %7031 = vmatprep.subr.bf16.mxu1 %v7711_v25 }
0x1c05   :  { %7032 = vmatpush3.bf16.msra.mxu1 %v7713_v11 }
0x1c06   :  { %7033 = vmatprep.subr.bf16.mxu1 %v7715_v31  ;;  %v5258_v31 = vld [vmem:[#allocation6 + $0xc] sm:$0xf] }
0x1c09   :  { %7034 = vmatpush3.bf16.msra.mxu1 %v7717_v53 }
0x1c0a   :  { %7035 = vmatprep.subr.bf16.mxu1 %v7719_v15  ;;  %v9813_v15 = vcombine.low %v5258_v31, %v9810_v19 }
0x1c0d   :  { %7036 = vmatpush3.bf16.msra.mxu1 %v7721_v54 }
0x1cc3   :  { %v7405_v41 = vpop.f32.mrb[68].mxu1 }
0x1cc4   :  { %v6826_v43 = vpack.c.bf16 %v7405_v41, %v7405_v41  ;;  %v5109_v2 = vpop.f32.mrb[69].mxu1 }
0x1cc5   :  { %v6824_v44 = vpack.c.bf16 %v5109_v2, %v5109_v2  ;;  %v7406_v46 = vpop.f32.mrb[70].mxu1 }
0x1cc6   :  { %v5154_v20 = vshrl.u32 %v6826_v43, 16  ;;  %v6827_v47 = vpack.c.bf16 %v7406_v46, %v7406_v46  ;;  %v5112_v32 = vpop.f32.mrb[71].mxu1  ;;  %v5157_v26 = vshll.u32 %v6826_v43, 16 }
0x1cc7   :  { %v5137_v7 = vshrl.u32 %v6824_v44, 16  ;;  %v6825_v62 = vpack.c.bf16 %v5112_v32, %v5112_v32  ;;  %v5140_v3 = vshll.u32 %v6824_v44, 16 }
0x1cc8   :  { %v5156_v10 = vrot.slane %v5154_v20, 7  ;;  %v5162_v42 = vshrl.u32 %v6827_v47, 16  ;;  %v5165_v56 = vshll.u32 %v6827_v47, 16 }
0x1cc9   :  { %v5139_v48 = vrot.slane %v5137_v7, 7  ;;  %v5145_v38 = vshrl.u32 %v6825_v62, 16  ;;  %v5148_v60 = vshll.u32 %v6825_v62, 16  ;;  %v7730_v7 = vld [vmem:[#allocation34 + $0x100] sm:$0xff]  }
0x1cca   :  { %v5159_v45 = vor.u32 %v5157_v26, %v5156_v10  ;;  %v5164_v55 = vrot.slane %v5162_v42, 7  ;;  %v5160_v61 = vrot.slane %v5156_v10, 4 }
0x1ccb   :  { %v5142_v57 = vor.u32 %v5140_v3, %v5139_v48  ;;  %v5147_v59 = vrot.slane %v5145_v38, 7  ;;  %v5143_v51 = vrot.slane %v5139_v48, 4  ;;  %v5262_v48 = vld [vmem:[#allocation6] sm:$0xe] }
0x1ccc   :  { %v5184_v4 = vsel %vm9235_vm12, %v5159_v45, %v5183_v21  ;;  %v5167_v8 = vor.u32 %v5165_v56, %v5164_v55  ;;  %v5169_v1 = vrot.slane %v5164_v55, 4  ;;  %v7734_v21 = vld [vmem:[#allocation34 + $0x148] sm:$0xff]   ;;  %v6696_v3 = vcombine.low %v5262_v48, %v9790_v5  ;;  %v7736_v56 = vld [vmem:[#allocation34 + $0x150] sm:$0xff]  }
0x1ccd   :  { %5185 = vst [vmem:[#allocation9 + $0xc] sm:$0xf] %v5184_v4  ;;  %v5177_v16 = vsel %vm9235_vm12, %v5142_v57, %v5176_v52  ;;  %v5150_v50 = vor.u32 %v5148_v60, %v5147_v59  ;;  %v5152_v33 = vrot.slane %v5147_v59, 4  ;;  %v7738_v45 = vld [vmem:[#allocation6 + $0x8] ss:$0 sps:$4 sm:$0x11]  }
0x1cce   :  { %5178 = vst [vmem:[#allocation9] sm:$0xf] %v5177_v16  ;;  %v5168_v22 = vsel %vm9240_vm13, %v5160_v61, %v5167_v8  ;;  %v5188_v12 = vsel %vm9246_vm14, %v5169_v1, %v5187_v58  ;;  %v7735_v52 = vld [vmem:[#allocation34 + $0x108] sm:$0xff]   ;;  %v5314_v57 = vrot.slane %v6696_v3, 1  ;;  %v5315_v58 = vrot.slane %v7738_v45, 1  ;;  %v7737_v59 = vld [vmem:[#allocation34 + $0x110] sm:$0xff]  }
0x1ccf   :  { %5186 = vst [vmem:[#allocation9 + $0x10] sm:$0xf] %v5168_v22  ;;  %5189 = vst [vmem:[#allocation9 + $0x14] sm:$0x1] %v5188_v12  ;;  %v5151_v0 = vsel %vm9240_vm13, %v5143_v51, %v5150_v50  ;;  %v5181_v23 = vsel %vm9246_vm14, %v5152_v33, %v5180_v37  ;;  %v7739_v60 = vld [vmem:[#allocation34 + $0x158] sm:$0xff]   ;;  %v7741_v4 = vld [vmem:[#allocation34 + $0x160] sm:$0xff]  }
0x1cd0   :  { %5179 = vst [vmem:[#allocation9 + $0x4] sm:$0xf] %v5151_v0  ;;  %5182 = vst [vmem:[#allocation9 + $0x8] sm:$0x1] %v5181_v23  ;;  %v5316_v5 = vsel %vm719_vm1, %v5314_v57, %v5315_v58  ;;  %v7740_v61 = vld [vmem:[#allocation34 + $0x118] sm:$0xff]   ;;  %v7742_v8 = vld [vmem:[#allocation34 + $0x120] sm:$0xff]  }
0x1cd1   :  { %v7743_v1 = vld [vmem:[#allocation34 + $0x168] sm:$0xff]   ;;  %v7745_v51 = vld [vmem:[#allocation34 + $0x170] sm:$0xff]   ;;  %v5285_v16 = vshll.u32 %v9794_v13, 16  ;;  %v7747_v33 = vld [vmem:[#allocation34 + $0x178] sm:$0xff]  }
0x1cd2   :  { %v7744_v37 = vld [vmem:[#allocation34 + $0x128] sm:$0xff]   ;;  %v7746_v50 = vld [vmem:[#allocation34 + $0x130] sm:$0xff]   ;;  %v7749_v23 = vld [vmem:[#allocation6 + $0x14] ss:$0 sps:$4 sm:$0x11]  }
0x1cd3   :  { %v5287_v22 = vrot.slane %v5285_v16, 1  ;;  %v5263_v12 = vld [vmem:[#allocation6 + $0xc] sm:$0xe]  ;;  %v5302_v31 = vshll.u32 %v7749_v23, 16  ;;  %v7774_v3 = vld [vmem:[#allocation37 + $0x78] sm:$0xff]  }
0x1cd4   :  { %v5192_v36 = vld [vmem:[#allocation9 + $0xc] sm:$0xf]  ;;  %v6697_v0 = vcombine.low %v5263_v12, %v9810_v19  ;;  %v7770_v48 = vld [vmem:[#allocation37 + $0xb0] sm:$0xff]  }
0x1cd5   :  { %v5190_v29 = vld [vmem:[#allocation9] sm:$0xf]  ;;  %v5197_v54 = vld [vmem:[#allocation9 + $0xc] sm:$0xe] }
0x1cd6   :  { %v5193_v39 = vld [vmem:[#allocation9 + $0x10] sm:$0xf]  ;;  %v5196_v30 = vld [vmem:[#allocation9] sm:$0xe] }
0x1cd7   :  { %v5191_v24 = vld [vmem:[#allocation9 + $0x4] sm:$0xf]  ;;  %v6687_v34 = vcombine.low %v5192_v36, %v5193_v39  ;;  %v7724_v18 = vld [vmem:[#allocation9 + $0x8] ss:$0 sps:$4 sm:$0x11]   ;;  %v6691_v41 = vcombine.low %v5197_v54, %v5193_v39  ;;  %v5283_v36 = vshrl.u32 %v9794_v13, 16 }
0x1cd8   :  { %v6686_v25 = vcombine.low %v5190_v29, %v5191_v24  ;;  %v6690_v11 = vcombine.low %v5196_v30, %v5191_v24  ;;  %v7732_v28 = vld [vmem:[#allocation9 + $0x14] ss:$0 sps:$4 sm:$0x11]   ;;  %v5249_v27 = vrot.slane %v7724_v18, 1  ;;  %v5224_v40 = vshll.u32 %v7724_v18, 16  ;;  %v7748_v39 = vld [vmem:[#allocation34 + $0x138] sm:$0xff]  }
0x1cd9   :  { %v5231_v63 = vshll.u32 %v6687_v34, 16  ;;  %v5229_v14 = vshrl.u32 %v6687_v34, 16  ;;  %v5236_v46 = vshll.u32 %v7732_v28, 16  ;;  %v5251_v26 = vrot.slane %v6691_v41, 1  ;;  %v7751_v54 = vld [vmem:[#allocation37] sm:$0xff]   ;;  %v7755_v41 = vld [vmem:[#allocation37 + $0x88] sm:$0xff]  }
0x1cda   :  { %v5248_v53 = vrot.slane %v6690_v11, 1  ;;  %v5219_v35 = vshll.u32 %v6686_v25, 16  ;;  %v5217_v2 = vshrl.u32 %v6686_v25, 16  ;;  %v5226_v47 = vrot.slane %v5224_v40, 1  ;;  %v7752_v40 = vld [vmem:[#allocation37 + $0x80] sm:$0xff]  }
0x1cdb   :  { %v5233_v49 = vrot.slane %v5231_v63, 1  ;;  %v5238_v10 = vrot.slane %v5236_v46, 1  ;;  %v5252_v42 = vrot.slane %v7732_v28, 1  ;;  %v5290_v29 = vshll.u32 %v7738_v45, 16  ;;  %v7760_v46 = vld [vmem:[#allocation37 + $0x18] sm:$0xff]  }
0x1cdc   :  { %v5250_v43 = vsel %vm719_vm1, %v5248_v53, %v5249_v27  ;;  %v5221_v44 = vrot.slane %v5219_v35, 1  ;;  %v5297_v24 = vshll.u32 %v9813_v15, 16  ;;  %v5288_v30 = vor.u32 %v5287_v22, %v5283_v36  ;;  %v7750_v35 = vld [vmem:[#allocation37 + $0x40] sm:$0xff]   ;;  %v7776_v45 = vld [vmem:[#allocation37 + $0xb8] sm:$0xff]  }
0x1cdd   :  { %5795 = vmatmul.mubr.bf16.vlgmr.msra.gmra.mrb[72].mxu1 %v5250_v43  ;;  %v5234_v32 = vor.u32 %v5233_v49, %v5229_v14  ;;  %v5253_v55 = vsel %vm719_vm1, %v5251_v26, %v5252_v42  ;;  %v5292_v18 = vrot.slane %v5290_v29, 1  ;;  %v5295_v13 = vshrl.u32 %v9813_v15, 16  ;;  %7077 = vmatprep.subr.bf16.mxu1 %v7750_v35  ;;  %v7753_v14 = vld [vmem:[#allocation37 + $0x48] sm:$0xff]   ;;  %v7756_v43 = vld [vmem:[#allocation37 + $0x50] sm:$0xff]  }
0x1cde   :  { %5802 = vmatprep.mubr.bf16.mxu1 %v9813_v15  ;;  %v5222_v20 = vor.u32 %v5221_v44, %v5217_v2  ;;  %v5299_v28 = vrot.slane %v5297_v24, 1  ;;  %v5304_v53 = vrot.slane %v5302_v31, 1  ;;  %7078 = vmatpush3.bf16.msra.mxu1 %v7751_v54  ;;  %v7754_v49 = vld [vmem:[#allocation37 + $0x8] sm:$0xff]   ;;  %v7757_v15 = vld [vmem:[#allocation37 + $0x10] sm:$0xff]   ;;  %v7759_v44 = vld [vmem:[#allocation37 + $0x58] sm:$0xff]  }
0x1cdf   :  { %v5239_v38 = vsel %vm582_vm0, %v5234_v32, %v5238_v10  ;;  %v5293_v11 = vsel %vm582_vm0, %v5288_v30, %v5292_v18  ;;  %7079 = vmatprep.subr.bf16.mxu1 %v7753_v14  ;;  %v7758_v2 = vld [vmem:[#allocation37 + $0x90] sm:$0xff]   ;;  %v7763_v32 = vld [vmem:[#allocation37 + $0x20] sm:$0xff]   ;;  %v7766_v10 = vld [vmem:[#allocation37 + $0x28] sm:$0xff]  }
0x1ce0   :  { %v5227_v62 = vsel %vm582_vm0, %v5222_v20, %v5226_v47  ;;  %v5300_v63 = vor.u32 %v5299_v28, %v5295_v13  ;;  %v7761_v20 = vld [vmem:[#allocation37 + $0x98] sm:$0xff]   ;;  %v7762_v47 = vld [vmem:[#allocation37 + $0x60] sm:$0xff]   ;;  %v7767_v26 = vld [vmem:[#allocation37 + $0xa8] sm:$0xff]  }
0x1ce1   :  { %5745 = vmatprep.mubr.bf16.mxu0 %v5227_v62  ;;  %v7765_v62 = vld [vmem:[#allocation37 + $0x68] sm:$0xff]   ;;  %v7768_v42 = vld [vmem:[#allocation37 + $0x70] sm:$0xff]  }
0x1ce2   :  { %5746 = vmatmul.mubr.bf16.vlgmr.msra.gmra.mrb[72].mxu0 %v6686_v25  ;;  %v5318_v25 = vrot.slane %v7749_v23, 1  ;;  %v5305_v27 = vsel %vm582_vm0, %v5300_v63, %v5304_v53  ;;  %7080 = vmatpush3.bf16.msra.mxu1 %v7754_v49 }
0x1ce3   :  { %7050 = vmatpush3.bf16.msra.mxu0 %v7730_v7  ;;  %5753 = vmatprep.mubr.bf16.mxu0 %v5239_v38  ;;  %v7764_v7 = vld [vmem:[#allocation37 + $0xa0] sm:$0xff]   ;;  %v7775_v38 = vld [vmem:[#allocation37 + $0x38] sm:$0xff]  }
0x1ce4   :  { %7051 = vmatprep.subr.bf16.mxu0 %v7734_v21  ;;  %7081 = vmatprep.subr.bf16.mxu1 %v7756_v43  ;;  %v7769_v21 = vld [vmem:[#allocation37 + $0x30] sm:$0xff]  }
0x1ce5   :  { %5803 = vmatmul.mubr.bf16.gmra.mrb[76].mxu1 %v5253_v55 }
0x1ce6   :  { %7082 = vmatpush3.bf16.msra.mxu1 %v7757_v15 }
0x1ce7   :  { %7052 = vmatpush3.bf16.msra.mxu0 %v7735_v52  ;;  %7083 = vmatprep.subr.bf16.mxu1 %v7759_v44 }
0x1ce8   :  { %7053 = vmatprep.subr.bf16.mxu0 %v7736_v56 }
0x1cea   :  { %5754 = vmatmul.mubr.bf16.gmra.mrb[76].mxu0 %v6687_v34  ;;  %v5317_v34 = vrot.slane %v6697_v0, 1  ;;  %7084 = vmatpush3.bf16.msra.mxu1 %v7760_v46 }
0x1ceb   :  { %7054 = vmatpush3.bf16.msra.mxu0 %v7737_v59  ;;  %5843 = vmatprep.mubr.bf16.mxu0 %v5316_v5  ;;  %v6698_v5 = vld [vmem:[#allocation35] ss:$0 sm:$0xff] }
0x1cec   :  { %7055 = vmatprep.subr.bf16.mxu0 %v7739_v60  ;;  %v5319_v19 = vsel %vm719_vm1, %v5317_v34, %v5318_v25  ;;  %7085 = vmatprep.subr.bf16.mxu1 %v7762_v47 }
0x1cee   :  { %7086 = vmatpush3.bf16.msra.mxu1 %v7763_v32 }
0x1cef   :  { %7056 = vmatpush3.bf16.msra.mxu0 %v7740_v61  ;;  %7087 = vmatprep.subr.bf16.mxu1 %v7765_v62 }
0x1cf0   :  { %7057 = vmatprep.subr.bf16.mxu0 %v7741_v4 }
0x1cf2   :  { %7088 = vmatpush3.bf16.msra.mxu1 %v7766_v10 }
0x1cf3   :  { %7058 = vmatpush3.bf16.msra.mxu0 %v7742_v8  ;;  %7089 = vmatprep.subr.bf16.mxu1 %v7768_v42  ;;  %v5916_v42 = vld [vmem:[#allocation10] sm:$0xf] }
0x1cf4   :  { %7059 = vmatprep.subr.bf16.mxu0 %v7743_v1 }
0x1cf6   :  { %7090 = vmatpush3.bf16.msra.mxu1 %v7769_v21 }
0x1cf7   :  { %7060 = vmatpush3.bf16.msra.mxu0 %v7744_v37  ;;  %7091 = vmatprep.subr.bf16.mxu1 %v7774_v3 }
0x1cf8   :  { %7061 = vmatprep.subr.bf16.mxu0 %v7745_v51 }
0x1cfa   :  { %7092 = vmatpush3.bf16.msra.mxu1 %v7775_v38 }
0x1cfb   :  { %7062 = vmatpush3.bf16.msra.mxu0 %v7746_v50 }
0x1cfc   :  { %7063 = vmatprep.subr.bf16.mxu0 %v7747_v33 }
0x1cff   :  { %7064 = vmatpush3.bf16.msra.mxu0 %v7748_v39 }
0x1d00   :  { %7407 = vmatprep.subr.bf16.mxu0 %v7752_v40 }
0x1d02   :  { %5844 = vmatmul.mubr.bf16.vlgmr.msra.gmra.mrb[80].mxu0 %v5293_v11 }
0x1d03   :  { %5851 = vmatprep.mubr.bf16.mxu0 %v5319_v19  ;;  %7408 = vmatpush3.bf16.msra.mxu0 %v7752_v40 }
0x1d04   :  { %7409 = vmatprep.subr.bf16.mxu0 %v7755_v41 }
0x1d07   :  { %7410 = vmatpush3.bf16.msra.mxu0 %v7755_v41 }
0x1d08   :  { %7411 = vmatprep.subr.bf16.mxu0 %v7758_v2 }
0x1d0a   :  { %5852 = vmatmul.mubr.bf16.gmra.mrb[84].mxu0 %v5305_v27 }
0x1d0b   :  { %7412 = vmatpush3.bf16.msra.mxu0 %v7758_v2 }
0x1d0c   :  { %7413 = vmatprep.subr.bf16.mxu0 %v7761_v20 }
0x1d0f   :  { %7414 = vmatpush3.bf16.msra.mxu0 %v7761_v20 }
0x1d10   :  { %7415 = vmatprep.subr.bf16.mxu0 %v7764_v7 }
0x1d13   :  { %7416 = vmatpush3.bf16.msra.mxu0 %v7764_v7 }
0x1d14   :  { %7417 = vmatprep.subr.bf16.mxu0 %v7767_v26 }
0x1d17   :  { %7418 = vmatpush3.bf16.msra.mxu0 %v7767_v26 }
0x1d18   :  { %7419 = vmatprep.subr.bf16.mxu0 %v7770_v48 }
0x1d1b   :  { %7420 = vmatpush3.bf16.msra.mxu0 %v7770_v48 }
0x1d1c   :  { %7421 = vmatprep.subr.bf16.mxu0 %v7776_v45 }
0x1d1f   :  { %7422 = vmatpush3.bf16.msra.mxu0 %v7776_v45 }
0x1db0   :  { %v7037_v52 = vpop.f32.mrb[72].mxu1 }
0x1db1   :  { %v7038_v55 = vpop.f32.mrb[73].mxu1 }
0x1db2   :  { %v7039_v56 = vadd.f32 %v7038_v55, %v7037_v52  ;;  %v7040_v57 = vpop.f32.mrb[74].mxu1  ;;  %v5920_v55 = vld [vmem:[#allocation10 + $0x8] sm:$0x1] }
0x1db3   :  { %v7041_v58 = vpop.f32.mrb[75].mxu1 }
0x1db4   :  { %v7042_v59 = vadd.f32 %v7041_v58, %v7040_v57 }
0x1db5   :  { %v7009_v60 = vpop.f32.mrb[72].mxu0 }
0x1db6   :  { %v7010_v61 = vpop.f32.mrb[73].mxu0 }
0x1db7   :  { %v7011_v4 = vadd.f32 %v7010_v61, %v7009_v60  ;;  %v7012_v8 = vpop.f32.mrb[74].mxu0 }
0x1db8   :  { %v7013_v1 = vpop.f32.mrb[75].mxu0  ;;  %v7043_v37 = vpop.f32.mrb[76].mxu1 }
0x1db9   :  { %v5748_v51 = vadd.f32 %v7011_v4, %v6698_v5  ;;  %v7014_v16 = vadd.f32 %v7013_v1, %v7012_v8  ;;  %v7044_v50 = vpop.f32.mrb[77].mxu1 }
0x1dba   :  { %v7045_v33 = vadd.f32 %v7044_v50, %v7043_v37  ;;  %v7046_v22 = vpop.f32.mrb[78].mxu1 }
0x1dbb   :  { %v5751_v12 = vadd.f32 %v7014_v16, %v6698_v5  ;;  %v7047_v0 = vpop.f32.mrb[79].mxu1  ;;  %v5797_v23 = vadd.f32 %v7039_v56, %v5748_v51  ;;  %v5923_v16 = vld [vmem:[#allocation10 + $0xc] sm:$0xf] }
0x1dbc   :  { %v7048_v36 = vadd.f32 %v7047_v0, %v7046_v22 }
0x1dbd   :  { %v7015_v29 = vpop.f32.mrb[76].mxu0  ;;  %v5800_v39 = vadd.f32 %v7042_v59, %v5751_v12 }
0x1dbe   :  { %v7016_v24 = vpop.f32.mrb[77].mxu0 }
0x1dbf   :  { %v7017_v30 = vadd.f32 %v7016_v24, %v7015_v29  ;;  %v7018_v34 = vpop.f32.mrb[78].mxu0 }
0x1dc0   :  { %v7019_v25 = vpop.f32.mrb[79].mxu0 }
0x1dc1   :  { %v5756_v18 = vadd.f32 %v7017_v30, %v6698_v5  ;;  %v7020_v11 = vadd.f32 %v7019_v25, %v7018_v34 }
0x1dc3   :  { %v5759_v28 = vadd.f32 %v7020_v11, %v6698_v5  ;;  %v5805_v19 = vadd.f32 %v7045_v33, %v5756_v18 }
0x1dc5   :  { %v5808_v13 = vadd.f32 %v7048_v36, %v5759_v28 }
0x1dd5   :  { %v7065_v31 = vpop.f32.mrb[80].mxu0 }
0x1dd6   :  { %v7066_v63 = vpop.f32.mrb[81].mxu0 }
0x1dd7   :  { %v7067_v53 = vadd.f32 %v7066_v63, %v7065_v31  ;;  %v7068_v27 = vpop.f32.mrb[82].mxu0 }
0x1dd8   :  { %v7069_v35 = vpop.f32.mrb[83].mxu0 }
0x1dd9   :  { %v5846_v54 = vadd.f32 %v7067_v53, %v5797_v23  ;;  %v7070_v40 = vadd.f32 %v7069_v35, %v7068_v27  ;;  %v5927_v23 = vld [vmem:[#allocation10 + $0x14] sm:$0x1] }
0x1ddb   :  { %v5860_v14 = vmax.f32 %v5846_v54, 0.0  ;;  %v5849_v49 = vadd.f32 %v7070_v40, %v5800_v39 }
0x1ddd   :  { %v6828_v41 = vpack.c.bf16 %v5860_v14, %v5860_v14  ;;  %v5861_v43 = vmax.f32 %v5849_v49, 0.0  ;;  %v7071_v15 = vpop.f32.mrb[84].mxu0 }
0x1dde   :  { %v7072_v2 = vpop.f32.mrb[85].mxu0 }
0x1ddf   :  { %v5877_v44 = vshrl.u32 %v6828_v41, 16  ;;  %v6829_v46 = vpack.c.bf16 %v5861_v43, %v5861_v43  ;;  %v7073_v20 = vadd.f32 %v7072_v2, %v7071_v15  ;;  %v7074_v47 = vpop.f32.mrb[86].mxu0  ;;  %v5880_v62 = vshll.u32 %v6828_v41, 16 }
0x1de0   :  { %v7075_v32 = vpop.f32.mrb[87].mxu0 }
0x1de1   :  { %v5879_v7 = vrot.slane %v5877_v44, 7  ;;  %v5885_v10 = vshrl.u32 %v6829_v46, 16  ;;  %v5854_v26 = vadd.f32 %v7073_v20, %v5805_v19  ;;  %v7076_v21 = vadd.f32 %v7075_v32, %v7074_v47 }
0x1de2   :  { %v5888_v38 = vshll.u32 %v6829_v46, 16 }
0x1de3   :  { %v5882_v48 = vor.u32 %v5880_v62, %v5879_v7  ;;  %v5887_v3 = vrot.slane %v5885_v10, 7  ;;  %v5862_v45 = vmax.f32 %v5854_v26, 0.0  ;;  %v5883_v52 = vrot.slane %v5879_v7, 4 }
0x1de4   :  { %v5857_v56 = vadd.f32 %v7076_v21, %v5808_v13 }
0x1de5   :  { %v5917_v57 = vsel %vm9235_vm12, %v5882_v48, %v5916_v42  ;;  %v5890_v58 = vor.u32 %v5888_v38, %v5887_v3  ;;  %v5892_v59 = vrot.slane %v5887_v3, 4  ;;  %v6830_v60 = vpack.c.bf16 %v5862_v45, %v5862_v45 }
0x1de6   :  { %5918 = vst [vmem:[#allocation10] sm:$0xf] %v5917_v57  ;;  %v5863_v5 = vmax.f32 %v5857_v56, 0.0 }
0x1de7   :  { %v5891_v61 = vsel %vm9240_vm13, %v5883_v52, %v5890_v58  ;;  %v5921_v4 = vsel %vm9246_vm14, %v5892_v59, %v5920_v55  ;;  %v5894_v8 = vshrl.u32 %v6830_v60, 16  ;;  %v5897_v51 = vshll.u32 %v6830_v60, 16 }
0x1de8   :  { %5919 = vst [vmem:[#allocation10 + $0x4] sm:$0xf] %v5891_v61  ;;  %5922 = vst [vmem:[#allocation10 + $0x8] sm:$0x1] %v5921_v4  ;;  %v6831_v1 = vpack.c.bf16 %v5863_v5, %v5863_v5 }
0x1de9   :  { %v5896_v37 = vrot.slane %v5894_v8, 7 }
0x1dea   :  { %v5902_v50 = vshrl.u32 %v6831_v1, 16  ;;  %v5905_v12 = vshll.u32 %v6831_v1, 16 }
0x1deb   :  { %v5899_v33 = vor.u32 %v5897_v51, %v5896_v37  ;;  %v5900_v36 = vrot.slane %v5896_v37, 4 }
0x1dec   :  { %v5904_v22 = vrot.slane %v5902_v50, 7 }
0x1ded   :  { %v5924_v0 = vsel %vm9235_vm12, %v5899_v33, %v5923_v16  ;;  %v5930_v24 = vld [vmem:[#allocation10] sm:$0xf] }
0x1dee   :  { %5925 = vst [vmem:[#allocation10 + $0xc] sm:$0xf] %v5924_v0  ;;  %v5907_v29 = vor.u32 %v5905_v12, %v5904_v22  ;;  %v5909_v39 = vrot.slane %v5904_v22, 4  ;;  %v5936_v34 = vld [vmem:[#allocation10] sm:$0xe] }
0x1def   :  { %v5931_v30 = vld [vmem:[#allocation10 + $0x4] sm:$0xf]  ;;  %v7772_v28 = vld [vmem:[#allocation10 + $0x8] ss:$0 sps:$4 sm:$0x11]  }
0x1df0   :  { %v5908_v25 = vsel %vm9240_vm13, %v5900_v36, %v5907_v29  ;;  %v5928_v18 = vsel %vm9246_vm14, %v5909_v39, %v5927_v23  ;;  %v6751_v11 = vcombine.low %v5930_v24, %v5931_v30  ;;  %v6755_v19 = vcombine.low %v5936_v34, %v5931_v30 }
0x1df1   :  { %5926 = vst [vmem:[#allocation10 + $0x10] sm:$0xf] %v5908_v25  ;;  %5929 = vst [vmem:[#allocation10 + $0x14] sm:$0x1] %v5928_v18  ;;  %v5989_v13 = vrot.slane %v7772_v28, 1  ;;  %v5964_v63 = vshll.u32 %v7772_v28, 16 }
0x1df2   :  { %v5988_v6 = vrot.slane %v6755_v19, 1  ;;  %v5959_v31 = vshll.u32 %v6751_v11, 16  ;;  %v5957_v27 = vshrl.u32 %v6751_v11, 16 }
0x1df3   :  { %v5966_v9 = vrot.slane %v5964_v63, 1 }
0x1df4   :  { %v5990_v53 = vsel %vm719_vm1, %v5988_v6, %v5989_v13  ;;  %v5961_v35 = vrot.slane %v5959_v31, 1 }
0x1df5   :  { %7423 = vmatprep.mubr.bf16.mxu0 %v5990_v53  ;;  %v5937_v40 = vld [vmem:[#allocation10 + $0xc] sm:$0xe] }
0x1df6   :  { %v5962_v54 = vor.u32 %v5961_v35, %v5957_v27  ;;  %v5932_v49 = vld [vmem:[#allocation10 + $0xc] sm:$0xf] }
0x1df8   :  { %v5967_v17 = vsel %vm582_vm0, %v5962_v54, %v5966_v9  ;;  %v5933_v14 = vld [vmem:[#allocation10 + $0x10] sm:$0xf]  ;;  %v7777_v41 = vld [vmem:[#allocation10 + $0x14] ss:$0 sps:$4 sm:$0x11]  }
0x1df9   :  { %6227 = vmatprep.mubr.bf16.mxu1 %v5967_v17  ;;  %v6756_v43 = vcombine.low %v5937_v40, %v5933_v14  ;;  %v6752_v15 = vcombine.low %v5932_v49, %v5933_v14  ;;  %v5992_v44 = vrot.slane %v7777_v41, 1  ;;  %v5976_v20 = vshll.u32 %v7777_v41, 16 }
0x1dfa   :  { %6228 = vmatmul.mubr.bf16.vlgmr.msra.gmra.mrb[80].mxu1 %v6751_v11 }
0x1dfb   :  { %v5991_v2 = vrot.slane %v6756_v43, 1  ;;  %v5971_v46 = vshll.u32 %v6752_v15, 16  ;;  %v5969_v32 = vshrl.u32 %v6752_v15, 16  ;;  %v5978_v10 = vrot.slane %v5976_v20, 1 }
0x1dfd   :  { %v5993_v47 = vsel %vm719_vm1, %v5991_v2, %v5992_v44  ;;  %v5973_v7 = vrot.slane %v5971_v46, 1 }
0x1dfe   :  { %7424 = vmatmul.mubr.bf16.vlgmr.msra.gmra.mrb[88].mxu0 %v5993_v47 }
0x1dff   :  { %v5974_v62 = vor.u32 %v5973_v7, %v5969_v32 }
0x1e01   :  { %v5979_v26 = vsel %vm582_vm0, %v5974_v62, %v5978_v10 }
0x1e02   :  { %6235 = vmatprep.mubr.bf16.mxu1 %v5979_v26 }
0x1e03   :  { %6236 = vmatmul.mubr.bf16.gmra.mrb[84].mxu1 %v6752_v15 }
0x1e04   :  { %8397 = shalt.err (!%p8394_p2)
}
0x1e05   :  { %s9972_s16 = sld [smem:[#allocation86_spill]] }
0x1e0b   :  { %s8398_s23 = scalar_lea.hbm %s9972_s16, 128 }
0x1e0c   :  { %p8399_p3 = scmp.ne.s32.totalorder %s9972_s16, %s8398_s23  ;;  %p8402_p4 = scmp.lt.u32.totalorder %s8398_s23, %s9972_s16 }
0x1e0e   :  { %p8404_p5 = pnand %p8402_p4, %p8399_p3 }
0x1e10   :  { %8407 = shalt.err (!%p8404_p5)
}
0x1e11   :  { %6327 = dma.vmem_to_hbm [thread:$0]  %s6325_s19, 128, %s9972_s16, [#allocation54]  }
0x1e12   :  { %s8520_s29 = smov [#allocation55]  }
0x1e13   :  { %s6334_s22 = sshll.u32 %s8520_s29, 4  ;;  %s6335_s22 = int_to_ptr.vmem [resolvable:$true] %s6334_s22 }
0x1e14   :  { %s8408_s13 = scalar_lea.vmem %s6335_s22, 128  ;;  %p8413_p7 = scmp.lt.s32.totalorder %s6335_s22, %s6335_s22 }
0x1e15   :  { %p8409_p6 = scmp.ne.s32.totalorder %s6335_s22, %s8408_s13  ;;  %p8414_p8 = scmp.lt.s32.totalorder %s8408_s13, %s8408_s13 }
0x1e17   :  { %p8415_p9 = por %p8414_p8, %p8413_p7 }
0x1e19   :  { %p8416_p10 = pnand %p8415_p9, %p8409_p6 }
0x1e1b   :  { %8419 = shalt.err (!%p8416_p10)
}
0x1e1c   :  { %s9973_s14 = sld [smem:[#allocation87_spill]] }
0x1e22   :  { %s8420_s11 = scalar_lea.hbm %s9973_s14, 128 }
0x1e23   :  { %p8421_p11 = scmp.ne.s32.totalorder %s9973_s14, %s8420_s11  ;;  %p8424_p12 = scmp.lt.u32.totalorder %s8420_s11, %s9973_s14 }
0x1e25   :  { %p8426_p13 = pnand %p8424_p12, %p8421_p11 }
0x1e27   :  { %8429 = shalt.err (!%p8426_p13)
}
0x1e28   :  { %6337 = dma.vmem_to_hbm [thread:$0]  %s6335_s22, 128, %s9973_s14, [#allocation54]   ;;  %v6757_v48 = vld [vmem:[#allocation38] ss:$0 sm:$0xff] }
0x1e29   :  { %s8521_s24 = smov [#allocation52]  }
0x1e2a   :  { %s6311_s9 = sshll.u32 %s8521_s24, 4  ;;  %s6312_s9 = int_to_ptr.vmem [resolvable:$true] %s6311_s9 }
0x1e2b   :  { %s8430_s25 = scalar_lea.vmem %s6312_s9, 512  ;;  %p8435_p1 = scmp.lt.s32.totalorder %s6312_s9, %s6312_s9 }
0x1e2c   :  { %p8431_p0 = scmp.ne.s32.totalorder %s6312_s9, %s8430_s25  ;;  %p8436_p2 = scmp.lt.s32.totalorder %s8430_s25, %s8430_s25 }
0x1e2e   :  { %p8437_p3 = por %p8436_p2, %p8435_p1 }
0x1e30   :  { %p8438_p4 = pnand %p8437_p3, %p8431_p0 }
0x1ecd   :  { %v7093_v42 = vpop.f32.mrb[80].mxu1 }
0x1ece   :  { %v7094_v21 = vpop.f32.mrb[81].mxu1 }
0x1ecf   :  { %v7095_v3 = vadd.f32 %v7094_v21, %v7093_v42  ;;  %v7096_v38 = vpop.f32.mrb[82].mxu1 }
0x1ed0   :  { %v7097_v45 = vpop.f32.mrb[83].mxu1 }
0x1ed1   :  { %v7098_v52 = vadd.f32 %v7097_v45, %v7096_v38  ;;  %v7425_v55 = vpop.f32.mrb[88].mxu0  ;;  %v6230_v56 = vadd.f32 %v7095_v3, %v6757_v48 }
0x1ed2   :  { %v6278_v57 = vpop.f32.mrb[89].mxu0 }
0x1ed3   :  { %v6279_v58 = vadd.f32 %v6278_v57, %v6230_v56  ;;  %v7426_v59 = vpop.f32.mrb[90].mxu0  ;;  %v6233_v60 = vadd.f32 %v7098_v52, %v6757_v48 }
0x1ed4   :  { %v6281_v5 = vpop.f32.mrb[91].mxu0 }
0x1ed5   :  { %6293 = vst.msk [vmem:[#allocation52] sm:$0xff] %vm2811_vm11, %v6279_v58  ;;  %v6282_v61 = vadd.f32 %v6281_v5, %v6233_v60 }
0x1ed6   :  { %v7099_v4 = vpop.f32.mrb[84].mxu1 }
0x1ed7   :  { %6294 = vst.msk [vmem:[#allocation52 + $0x8] sm:$0xff] %vm2811_vm11, %v6282_v61  ;;  %v7100_v8 = vpop.f32.mrb[85].mxu1 }
0x1ed8   :  { %v7101_v1 = vadd.f32 %v7100_v8, %v7099_v4  ;;  %v7102_v37 = vpop.f32.mrb[86].mxu1 }
0x1ed9   :  { %v7103_v51 = vpop.f32.mrb[87].mxu1 }
0x1eda   :  { %v6238_v16 = vadd.f32 %v7101_v1, %v6757_v48  ;;  %v7104_v50 = vadd.f32 %v7103_v51, %v7102_v37 }
0x1edc   :  { %v6287_v33 = vadd.f32 %v7425_v55, %v6238_v16  ;;  %v6241_v22 = vadd.f32 %v7104_v50, %v6757_v48 }
0x1ede   :  { %6295 = vst.msk [vmem:[#allocation52 + $0x10] sm:$0xff] %vm2811_vm11, %v6287_v33  ;;  %v6290_v12 = vadd.f32 %v7426_v59, %v6241_v22 }
0x1ee0   :  { %6296 = vst.msk [vmem:[#allocation52 + $0x18] sm:$0xff] %vm2811_vm11, %v6290_v12 }
0x1ee1   :  { %8441 = shalt.err (!%p8438_p4)
}
0x1ee2   :  { %s9974_s3 = sld [smem:[#allocation85_spill]] }
0x1ee8   :  { %s8442_s19 = scalar_lea.hbm %s9974_s3, 512 }
0x1ee9   :  { %p8443_p5 = scmp.ne.s32.totalorder %s9974_s3, %s8442_s19  ;;  %p8446_p6 = scmp.lt.u32.totalorder %s8442_s19, %s9974_s3 }
0x1eeb   :  { %p8448_p7 = pnand %p8446_p6, %p8443_p5 }
0x1eed   :  { %8451 = shalt.err (!%p8448_p7)
}
0x1eee   :  { %s8522_s23 = smov 128   ;;  %s8523_s4 = smov 8  }
0x1eef   :  { %6317 = dma.vmem_to_hbm [thread:$0]  %s6312_s9, 512, %s9974_s3, [#allocation13], %s8522_s23, %s8522_s23, %s8523_s4  }
0x1ef0   :  { %8480 = dma.done.wait [#allocation13], 512  }
0x1ef1   :  { %8481 = vsyncadd [#allocation13], 4294966784 }
0x1ef2   :  { %8482 = dma.done.wait [#allocation54], 256  }
0x1ef3   :  { %8483 = vsyncadd [#allocation54], 4294967040 }
0x1ef4   :  { %6347 = vsyncpa [#allocation12], 1 }
0x1ef5   :  { %6348 = vsyncpa [#allocation15], 1 }
0x1ef6   :  { %6349 = vsyncpa [#allocation18], 1 }
0x1ef7   :  { %6350 = vsyncpa [#allocation21], 1 }
0x1ef8   :  { %6351 = vsyncpa [#allocation24], 1 }
0x1ef9   :  { %6352 = vsyncpa [#allocation27], 1 }
0x1efa   :  { %6353 = vsyncpa [#allocation30], 1 }
0x1efb   :  { %6354 = vsyncpa [#allocation33], 1 }
0x1efc   :  { %6355 = vsyncpa [#allocation36], 1 }
0x1efd   :  { %6356 = vsyncpa [#allocation39], 1 }
0x1efe   :  { %6357 = vsyncpa [#allocation42], 1 }
0x1eff   :  { %6358 = vsyncpa [#allocation45], 1 }
0x1f00   :  { %6359 = vsyncpa [#allocation48], 1 }
0x1f01   :  { %6360 = vsyncpa [#allocation51], 1 }
0x1f02   :  { %6361 = vsyncpa [#allocation13], 1 }
0x1f03   :  { %6362 = vsyncpa [#allocation54], 1 }

</bundles_post_ra>
